<compile_context>
chip_gen: v7x
topology: tpu7x:2x2x1
jax: 0.10.0
libtpu: 0.0.40
codegen_flags: <defaults>
</compile_context>

<pallas_src>
import functools
import math

import jax
import jax.numpy as jnp
from jax.experimental import pallas as pl
from jax.experimental.pallas import tpu as pltpu

# ---- model hyper-params (mirroring the PyTorch module) ----
EMBD = 256
HEAD = 4
SQNZ = 512   # torch registers a [SQNZ,SQNZ] tril mask; we build the mask with iota instead
DROP = 0.1   # dropout implemented as identity (eval-mode semantics)


# ---------------------------------------------------------------------------
# Fused decoder-block kernel (one grid step = one batch element, all heads)
# ---------------------------------------------------------------------------
def _decoder_block_kernel(
    src_ref, tgt_ref,
    qkv_w_ref, qkv_b_ref,      # self-attn qkv projection      [E,3E], [1,3E]
    co_w_ref, co_b_ref,        # causal-attn output projection [E,E],  [1,E]
    qry_w_ref, qry_b_ref,      # cross-attn query projection   [E,E],  [1,E]
    kv_w_ref, kv_b_ref,        # fused key|val projection      [E,2E], [1,2E]
    xo_w_ref, xo_b_ref,        # cross-attn output projection  [E,E],  [1,E]
    fc_w_ref, fc_b_ref,        # FFN expand                    [E,4E], [1,4E]
    pj_w_ref, pj_b_ref,        # FFN contract                  [4E,E], [1,E]
    o_ref,
    *, heads,
):
    f32 = jnp.float32
    src = src_ref[0].astype(f32)          # [Ss, E]
    tgt = tgt_ref[0].astype(f32)          # [St, E]
    St, E = tgt.shape
    Dh = E // heads
    scale = 1.0 / math.sqrt(Dh)

    def linear(x, w_ref, b_ref):
        w = w_ref[...]
        y = jnp.dot(x.astype(w.dtype), w, preferred_element_type=f32)
        return y + b_ref[...].astype(f32)

    def mha(q, k, v, causal):
        """q:[Sq,E], k/v:[Sk,E] -> [Sq,E]; all heads inside one kernel step."""
        Sq, Sk = q.shape[0], k.shape[0]
        outs = []
        for h in range(heads):                      # static, tiny loop (H=4)
            qh = q[:, h * Dh:(h + 1) * Dh]          # [Sq, Dh]
            kh = k[:, h * Dh:(h + 1) * Dh]          # [Sk, Dh]
            vh = v[:, h * Dh:(h + 1) * Dh]          # [Sk, Dh]
            att = jax.lax.dot_general(
                qh, kh, (((1,), (1,)), ((), ())),
                preferred_element_type=f32) * scale              # [Sq, Sk]
            if causal:
                row = jax.lax.broadcasted_iota(jnp.int32, (Sq, Sk), 0)
                col = jax.lax.broadcasted_iota(jnp.int32, (Sq, Sk), 1)
                att = jnp.where(col > row, -1e30, att)           # finite mask
            att = att - jnp.max(att, axis=-1, keepdims=True)
            p = jnp.exp(att)
            p = p * pl.reciprocal(jnp.sum(p, axis=-1, keepdims=True), approx=True)
            outs.append(jnp.dot(p, vh, preferred_element_type=f32))
        return jnp.concatenate(outs, axis=-1)       # [Sq, E], lane-dense

    # ---- causal self-attention: tgt = tgt + c_att(q, k, v) ----
    qkv = linear(tgt, qkv_w_ref, qkv_b_ref)         # [St, 3E]
    q, k, v = qkv[:, :E], qkv[:, E:2 * E], qkv[:, 2 * E:]
    sa = mha(q, k, v, causal=True)
    tgt = tgt + linear(sa, co_w_ref, co_b_ref)

    # ---- cross attention: tgt = tgt + x_attn(qry(tgt), key(src), val(src)) ----
    qry = linear(tgt, qry_w_ref, qry_b_ref)         # [St, E]
    kv = linear(src, kv_w_ref, kv_b_ref)            # [Ss, 2E] (key|val fused)
    key, val = kv[:, :E], kv[:, E:]
    xa = mha(qry, key, val, causal=False)
    tgt = tgt + linear(xa, xo_w_ref, xo_b_ref)

    # ---- feed-forward: tgt = tgt + proj(relu(fc(tgt))) ----
    # TODO(synk): torch Dropout(p=0.1) in train mode is stochastic; identity here (eval).
    hid = jnp.maximum(linear(tgt, fc_w_ref, fc_b_ref), 0.0)      # [St, 4E]
    tgt = tgt + linear(hid, pj_w_ref, pj_b_ref)

    o_ref[0] = tgt.astype(o_ref.dtype)


# ---------------------------------------------------------------------------
# Host wrapper
# ---------------------------------------------------------------------------
_WEIGHT_ORDER = ("qkv_w", "qkv_b", "co_w", "co_b", "qry_w", "qry_b",
                 "kv_w", "kv_b", "xo_w", "xo_b", "fc_w", "fc_b", "pj_w", "pj_b")


def decoder_block(prep, src, tgt):
    """src: [B, Ss, EMBD], tgt: [B, St, EMBD] -> [B, St, EMBD]."""
    B, St, E = tgt.shape
    Ss = src.shape[1]
    weights = [prep[name] for name in _WEIGHT_ORDER]

    def _full2d(a):
        return pl.BlockSpec(a.shape, lambda b: (0, 0))   # resident across grid

    grid_spec = pltpu.PrefetchScalarGridSpec(
        num_scalar_prefetch=0,
        grid=(B,),
        in_specs=[pl.BlockSpec((1, Ss, E), lambda b: (b, 0, 0)),
                  pl.BlockSpec((1, St, E), lambda b: (b, 0, 0))]
                 + [_full2d(w) for w in weights],
        out_specs=pl.BlockSpec((1, St, E), lambda b: (b, 0, 0)),
    )
    return pl.pallas_call(
        functools.partial(_decoder_block_kernel, heads=HEAD),
        out_shape=jax.ShapeDtypeStruct((B, St, E), tgt.dtype),
        grid_spec=grid_spec,
        compiler_params=pltpu.CompilerParams(
            dimension_semantics=("parallel",),          # megacore split over batch
            vmem_limit_bytes=32 * 1024 * 1024,          # headroom on v7x's 64 MiB
        ),
    )(src, tgt, *weights)


# ---------------------------------------------------------------------------
# Deterministic parameter init (torch nn.Linear defaults) + kernel-side packing
# ---------------------------------------------------------------------------
def _init_linear(key, fan_in, fan_out):
    kw, kb = jax.random.split(key)
    bound = 1.0 / math.sqrt(fan_in)
    w = jax.random.uniform(kw, (fan_in, fan_out), jnp.float32, -bound, bound)
    b = jax.random.uniform(kb, (1, fan_out), jnp.float32, -bound, bound)
    return w, b


def init_decoder_params(key):
    ks = jax.random.split(key, 8)
    p = {}
    p["qkv_w"], p["qkv_b"] = _init_linear(ks[0], EMBD, 3 * EMBD)
    p["qry_w"], p["qry_b"] = _init_linear(ks[1], EMBD, EMBD)
    p["key_w"], p["key_b"] = _init_linear(ks[2], EMBD, EMBD)
    p["val_w"], p["val_b"] = _init_linear(ks[3], EMBD, EMBD)
    p["catt_ow"], p["catt_ob"] = _init_linear(ks[4], EMBD, EMBD)
    p["xatt_ow"], p["xatt_ob"] = _init_linear(ks[5], EMBD, EMBD)
    p["fc_w"], p["fc_b"] = _init_linear(ks[6], EMBD, 4 * EMBD)
    p["proj_w"], p["proj_b"] = _init_linear(ks[7], 4 * EMBD, EMBD)
    return p


def prepare_params(p, weight_dtype=jnp.bfloat16):
    """Pack params for the fused kernel: fuse key|val, cast weights to bf16
    (f32 accumulation in-kernel); biases stay f32."""
    wd = weight_dtype
    kv_w = jnp.concatenate([p["key_w"], p["val_w"]], axis=1)       # [E, 2E]
    kv_b = jnp.concatenate([p["key_b"], p["val_b"]], axis=1)       # [1, 2E]
    return {
        "qkv_w": p["qkv_w"].astype(wd), "qkv_b": p["qkv_b"],
        "co_w": p["catt_ow"].astype(wd), "co_b": p["catt_ob"],
        "qry_w": p["qry_w"].astype(wd), "qry_b": p["qry_b"],
        "kv_w": kv_w.astype(wd), "kv_b": kv_b,
        "xo_w": p["xatt_ow"].astype(wd), "xo_b": p["xatt_ob"],
        "fc_w": p["fc_w"].astype(wd), "fc_b": p["fc_b"],
        "pj_w": p["proj_w"].astype(wd), "pj_b": p["proj_b"],
    }


# ---------------------------------------------------------------------------
if __name__ == "__main__":
    key = jax.random.PRNGKey(0)
    kp, ks, kt = jax.random.split(key, 3)

    params = init_decoder_params(kp)
    prep = prepare_params(params, weight_dtype=jnp.bfloat16)

    B, S_SRC, S_TGT = 2, 16, 8
    src = jax.random.normal(ks, (B, S_SRC, EMBD), jnp.float32)   # encoder output
    tgt = jax.random.normal(kt, (B, S_TGT, EMBD), jnp.float32)   # decoder input

    fwd = jax.jit(decoder_block)
    out = jax.block_until_ready(fwd(prep, src, tgt))

    assert out.shape == (B, S_TGT, EMBD), out.shape
    assert jnp.all(jnp.isfinite(out)), "non-finite output"
    print("KERNEL_OK")
</pallas_src>

<mosaic_0001>
module attributes {stable_mosaic.version = 11 : i64} {
  func.func @_decoder_block_kernel(%arg0: i32, %arg1: memref<1x16x256xf32, #tpu.memory_space<vmem>>, %arg2: memref<1x8x256xf32, #tpu.memory_space<vmem>>, %arg3: memref<256x768xbf16, #tpu.memory_space<vmem>>, %arg4: memref<1x768xf32, #tpu.memory_space<vmem>>, %arg5: memref<256x256xbf16, #tpu.memory_space<vmem>>, %arg6: memref<1x256xf32, #tpu.memory_space<vmem>>, %arg7: memref<256x256xbf16, #tpu.memory_space<vmem>>, %arg8: memref<1x256xf32, #tpu.memory_space<vmem>>, %arg9: memref<256x512xbf16, #tpu.memory_space<vmem>>, %arg10: memref<1x512xf32, #tpu.memory_space<vmem>>, %arg11: memref<256x256xbf16, #tpu.memory_space<vmem>>, %arg12: memref<1x256xf32, #tpu.memory_space<vmem>>, %arg13: memref<256x1024xbf16, #tpu.memory_space<vmem>>, %arg14: memref<1x1024xf32, #tpu.memory_space<vmem>>, %arg15: memref<1024x256xbf16, #tpu.memory_space<vmem>>, %arg16: memref<1x256xf32, #tpu.memory_space<vmem>>, %arg17: memref<1x8x256xf32, #tpu.memory_space<vmem>>) attributes {dimension_semantics = [#tpu.dimension_semantics<parallel>], iteration_bounds = array<i64: 2>, scalar_prefetch = 0 : i64, scratch_operands = 0 : i64, tpu.core_type = #tpu.core_type<tc>, window_params = [{transform_indices = @transform_0, window_bounds = array<i64: 1, 16, 256>}, {transform_indices = @transform_1, window_bounds = array<i64: 1, 8, 256>}, {pipeline_mode = #tpu.pipeline_mode<synchronous>, transform_indices = @transform_2, window_bounds = array<i64: 256, 768>}, {pipeline_mode = #tpu.pipeline_mode<synchronous>, transform_indices = @transform_3, window_bounds = array<i64: 1, 768>}, {pipeline_mode = #tpu.pipeline_mode<synchronous>, transform_indices = @transform_4, window_bounds = array<i64: 256, 256>}, {pipeline_mode = #tpu.pipeline_mode<synchronous>, transform_indices = @transform_5, window_bounds = array<i64: 1, 256>}, {pipeline_mode = #tpu.pipeline_mode<synchronous>, transform_indices = @transform_6, window_bounds = array<i64: 256, 256>}, {pipeline_mode = #tpu.pipeline_mode<synchronous>, transform_indices = @transform_7, window_bounds = array<i64: 1, 256>}, {pipeline_mode = #tpu.pipeline_mode<synchronous>, transform_indices = @transform_8, window_bounds = array<i64: 256, 512>}, {pipeline_mode = #tpu.pipeline_mode<synchronous>, transform_indices = @transform_9, window_bounds = array<i64: 1, 512>}, {pipeline_mode = #tpu.pipeline_mode<synchronous>, transform_indices = @transform_10, window_bounds = array<i64: 256, 256>}, {pipeline_mode = #tpu.pipeline_mode<synchronous>, transform_indices = @transform_11, window_bounds = array<i64: 1, 256>}, {pipeline_mode = #tpu.pipeline_mode<synchronous>, transform_indices = @transform_12, window_bounds = array<i64: 256, 1024>}, {pipeline_mode = #tpu.pipeline_mode<synchronous>, transform_indices = @transform_13, window_bounds = array<i64: 1, 1024>}, {pipeline_mode = #tpu.pipeline_mode<synchronous>, transform_indices = @transform_14, window_bounds = array<i64: 1024, 256>}, {pipeline_mode = #tpu.pipeline_mode<synchronous>, transform_indices = @transform_15, window_bounds = array<i64: 1, 256>}, {transform_indices = @transform_16, window_bounds = array<i64: 1, 8, 256>}]} {
    %c0 = arith.constant 0 : index
    %c0_0 = arith.constant 0 : index
    %c0_1 = arith.constant 0 : index
    %0 = vector.load %arg1[%c0, %c0_0, %c0_1] : memref<1x16x256xf32, #tpu.memory_space<vmem>>, vector<1x16x256xf32>
    %1 = vector.shape_cast %0 : vector<1x16x256xf32> to vector<16x256xf32>
    %c0_2 = arith.constant 0 : index
    %c0_3 = arith.constant 0 : index
    %c0_4 = arith.constant 0 : index
    %2 = vector.load %arg2[%c0_2, %c0_3, %c0_4] : memref<1x8x256xf32, #tpu.memory_space<vmem>>, vector<1x8x256xf32>
    %3 = vector.shape_cast %2 : vector<1x8x256xf32> to vector<8x256xf32>
    %c0_5 = arith.constant 0 : index
    %c0_6 = arith.constant 0 : index
    %4 = vector.load %arg3[%c0_5, %c0_6] : memref<256x768xbf16, #tpu.memory_space<vmem>>, vector<256x768xbf16>
    %5 = arith.truncf %3 : vector<8x256xf32> to vector<8x256xbf16>
    %cst = arith.constant dense<0.000000e+00> : vector<8x768xf32>
    %6 = tpu.matmul %5, %4, %cst {dimension_numbers = #tpu.dot_dimension_numbers<[1], [0], [0], [1], [0, 0, 1, 1], [], []>} : vector<8x256xbf16>, vector<256x768xbf16>, vector<8x768xf32> -> vector<8x768xf32>
    %c0_7 = arith.constant 0 : index
    %c0_8 = arith.constant 0 : index
    %7 = vector.load %arg4[%c0_7, %c0_8] : memref<1x768xf32, #tpu.memory_space<vmem>>, vector<1x768xf32>
    %8 = vector.broadcast %7 : vector<1x768xf32> to vector<8x768xf32>
    %9 = arith.addf %6, %8 : vector<8x768xf32>
    %10 = vector.extract_strided_slice %9 {offsets = [0, 0], sizes = [8, 256], strides = [1, 1]} : vector<8x768xf32> to vector<8x256xf32>
    %11 = vector.extract_strided_slice %9 {offsets = [0, 256], sizes = [8, 256], strides = [1, 1]} : vector<8x768xf32> to vector<8x256xf32>
    %12 = vector.extract_strided_slice %9 {offsets = [0, 512], sizes = [8, 256], strides = [1, 1]} : vector<8x768xf32> to vector<8x256xf32>
    %13 = vector.extract_strided_slice %10 {offsets = [0, 0], sizes = [8, 64], strides = [1, 1]} : vector<8x256xf32> to vector<8x64xf32>
    %14 = vector.extract_strided_slice %11 {offsets = [0, 0], sizes = [8, 64], strides = [1, 1]} : vector<8x256xf32> to vector<8x64xf32>
    %15 = vector.extract_strided_slice %12 {offsets = [0, 0], sizes = [8, 64], strides = [1, 1]} : vector<8x256xf32> to vector<8x64xf32>
    %cst_9 = arith.constant dense<0.000000e+00> : vector<8x8xf32>
    %16 = tpu.matmul %13, %14, %cst_9 {dimension_numbers = #tpu.dot_dimension_numbers<[1], [1], [0], [0], [0, 0, 1, 0], [], []>} : vector<8x64xf32>, vector<8x64xf32>, vector<8x8xf32> -> vector<8x8xf32>
    %cst_10 = arith.constant 1.250000e-01 : f32
    %17 = vector.broadcast %cst_10 : f32 to vector<8x8xf32>
    %18 = arith.mulf %16, %17 : vector<8x8xf32>
    %19 = tpu.iota {dimensions = array<i32: 0>} : vector<8x8xi32>
    %20 = tpu.iota {dimensions = array<i32: 1>} : vector<8x8xi32>
    %21 = arith.cmpi sgt, %20, %19 : vector<8x8xi32>
    %cst_11 = arith.constant -1.000000e+30 : f32
    %22 = vector.broadcast %cst_11 : f32 to vector<8x8xf32>
    %23 = arith.select %21, %22, %18 : vector<8x8xi1>, vector<8x8xf32>
    %cst_12 = arith.constant dense<0xFF800000> : vector<8xf32>
    %24 = vector.multi_reduction <maximumf>, %23, %cst_12 [1] : vector<8x8xf32> to vector<8xf32>
    %25 = vector.shape_cast %24 : vector<8xf32> to vector<8x1xf32>
    %26 = vector.broadcast %25 : vector<8x1xf32> to vector<8x8xf32>
    %27 = arith.subf %23, %26 : vector<8x8xf32>
    %28 = math.exp %27 : vector<8x8xf32>
    %cst_13 = arith.constant dense<0.000000e+00> : vector<8xf32>
    %29 = vector.multi_reduction <add>, %28, %cst_13 [1] : vector<8x8xf32> to vector<8xf32>
    %30 = vector.shape_cast %29 : vector<8xf32> to vector<8x1xf32>
    %31 = tpu.reciprocal %30 {approx = true} : vector<8x1xf32> -> vector<8x1xf32>
    %32 = vector.broadcast %31 : vector<8x1xf32> to vector<8x8xf32>
    %33 = arith.mulf %28, %32 : vector<8x8xf32>
    %cst_14 = arith.constant dense<0.000000e+00> : vector<8x64xf32>
    %34 = tpu.matmul %33, %15, %cst_14 {dimension_numbers = #tpu.dot_dimension_numbers<[1], [0], [0], [1], [0, 0, 1, 1], [], []>} : vector<8x8xf32>, vector<8x64xf32>, vector<8x64xf32> -> vector<8x64xf32>
    %35 = vector.extract_strided_slice %10 {offsets = [0, 64], sizes = [8, 64], strides = [1, 1]} : vector<8x256xf32> to vector<8x64xf32>
    %36 = vector.extract_strided_slice %11 {offsets = [0, 64], sizes = [8, 64], strides = [1, 1]} : vector<8x256xf32> to vector<8x64xf32>
    %37 = vector.extract_strided_slice %12 {offsets = [0, 64], sizes = [8, 64], strides = [1, 1]} : vector<8x256xf32> to vector<8x64xf32>
    %cst_15 = arith.constant dense<0.000000e+00> : vector<8x8xf32>
    %38 = tpu.matmul %35, %36, %cst_15 {dimension_numbers = #tpu.dot_dimension_numbers<[1], [1], [0], [0], [0, 0, 1, 0], [], []>} : vector<8x64xf32>, vector<8x64xf32>, vector<8x8xf32> -> vector<8x8xf32>
    %cst_16 = arith.constant 1.250000e-01 : f32
    %39 = vector.broadcast %cst_16 : f32 to vector<8x8xf32>
    %40 = arith.mulf %38, %39 : vector<8x8xf32>
    %41 = tpu.iota {dimensions = array<i32: 0>} : vector<8x8xi32>
    %42 = tpu.iota {dimensions = array<i32: 1>} : vector<8x8xi32>
    %43 = arith.cmpi sgt, %42, %41 : vector<8x8xi32>
    %cst_17 = arith.constant -1.000000e+30 : f32
    %44 = vector.broadcast %cst_17 : f32 to vector<8x8xf32>
    %45 = arith.select %43, %44, %40 : vector<8x8xi1>, vector<8x8xf32>
    %cst_18 = arith.constant dense<0xFF800000> : vector<8xf32>
    %46 = vector.multi_reduction <maximumf>, %45, %cst_18 [1] : vector<8x8xf32> to vector<8xf32>
    %47 = vector.shape_cast %46 : vector<8xf32> to vector<8x1xf32>
    %48 = vector.broadcast %47 : vector<8x1xf32> to vector<8x8xf32>
    %49 = arith.subf %45, %48 : vector<8x8xf32>
    %50 = math.exp %49 : vector<8x8xf32>
    %cst_19 = arith.constant dense<0.000000e+00> : vector<8xf32>
    %51 = vector.multi_reduction <add>, %50, %cst_19 [1] : vector<8x8xf32> to vector<8xf32>
    %52 = vector.shape_cast %51 : vector<8xf32> to vector<8x1xf32>
    %53 = tpu.reciprocal %52 {approx = true} : vector<8x1xf32> -> vector<8x1xf32>
    %54 = vector.broadcast %53 : vector<8x1xf32> to vector<8x8xf32>
    %55 = arith.mulf %50, %54 : vector<8x8xf32>
    %cst_20 = arith.constant dense<0.000000e+00> : vector<8x64xf32>
    %56 = tpu.matmul %55, %37, %cst_20 {dimension_numbers = #tpu.dot_dimension_numbers<[1], [0], [0], [1], [0, 0, 1, 1], [], []>} : vector<8x8xf32>, vector<8x64xf32>, vector<8x64xf32> -> vector<8x64xf32>
    %57 = vector.extract_strided_slice %10 {offsets = [0, 128], sizes = [8, 64], strides = [1, 1]} : vector<8x256xf32> to vector<8x64xf32>
    %58 = vector.extract_strided_slice %11 {offsets = [0, 128], sizes = [8, 64], strides = [1, 1]} : vector<8x256xf32> to vector<8x64xf32>
    %59 = vector.extract_strided_slice %12 {offsets = [0, 128], sizes = [8, 64], strides = [1, 1]} : vector<8x256xf32> to vector<8x64xf32>
    %cst_21 = arith.constant dense<0.000000e+00> : vector<8x8xf32>
    %60 = tpu.matmul %57, %58, %cst_21 {dimension_numbers = #tpu.dot_dimension_numbers<[1], [1], [0], [0], [0, 0, 1, 0], [], []>} : vector<8x64xf32>, vector<8x64xf32>, vector<8x8xf32> -> vector<8x8xf32>
    %cst_22 = arith.constant 1.250000e-01 : f32
    %61 = vector.broadcast %cst_22 : f32 to vector<8x8xf32>
    %62 = arith.mulf %60, %61 : vector<8x8xf32>
    %63 = tpu.iota {dimensions = array<i32: 0>} : vector<8x8xi32>
    %64 = tpu.iota {dimensions = array<i32: 1>} : vector<8x8xi32>
    %65 = arith.cmpi sgt, %64, %63 : vector<8x8xi32>
    %cst_23 = arith.constant -1.000000e+30 : f32
    %66 = vector.broadcast %cst_23 : f32 to vector<8x8xf32>
    %67 = arith.select %65, %66, %62 : vector<8x8xi1>, vector<8x8xf32>
    %cst_24 = arith.constant dense<0xFF800000> : vector<8xf32>
    %68 = vector.multi_reduction <maximumf>, %67, %cst_24 [1] : vector<8x8xf32> to vector<8xf32>
    %69 = vector.shape_cast %68 : vector<8xf32> to vector<8x1xf32>
    %70 = vector.broadcast %69 : vector<8x1xf32> to vector<8x8xf32>
    %71 = arith.subf %67, %70 : vector<8x8xf32>
    %72 = math.exp %71 : vector<8x8xf32>
    %cst_25 = arith.constant dense<0.000000e+00> : vector<8xf32>
    %73 = vector.multi_reduction <add>, %72, %cst_25 [1] : vector<8x8xf32> to vector<8xf32>
    %74 = vector.shape_cast %73 : vector<8xf32> to vector<8x1xf32>
    %75 = tpu.reciprocal %74 {approx = true} : vector<8x1xf32> -> vector<8x1xf32>
    %76 = vector.broadcast %75 : vector<8x1xf32> to vector<8x8xf32>
    %77 = arith.mulf %72, %76 : vector<8x8xf32>
    %cst_26 = arith.constant dense<0.000000e+00> : vector<8x64xf32>
    %78 = tpu.matmul %77, %59, %cst_26 {dimension_numbers = #tpu.dot_dimension_numbers<[1], [0], [0], [1], [0, 0, 1, 1], [], []>} : vector<8x8xf32>, vector<8x64xf32>, vector<8x64xf32> -> vector<8x64xf32>
    %79 = vector.extract_strided_slice %10 {offsets = [0, 192], sizes = [8, 64], strides = [1, 1]} : vector<8x256xf32> to vector<8x64xf32>
    %80 = vector.extract_strided_slice %11 {offsets = [0, 192], sizes = [8, 64], strides = [1, 1]} : vector<8x256xf32> to vector<8x64xf32>
    %81 = vector.extract_strided_slice %12 {offsets = [0, 192], sizes = [8, 64], strides = [1, 1]} : vector<8x256xf32> to vector<8x64xf32>
    %cst_27 = arith.constant dense<0.000000e+00> : vector<8x8xf32>
    %82 = tpu.matmul %79, %80, %cst_27 {dimension_numbers = #tpu.dot_dimension_numbers<[1], [1], [0], [0], [0, 0, 1, 0], [], []>} : vector<8x64xf32>, vector<8x64xf32>, vector<8x8xf32> -> vector<8x8xf32>
    %cst_28 = arith.constant 1.250000e-01 : f32
    %83 = vector.broadcast %cst_28 : f32 to vector<8x8xf32>
    %84 = arith.mulf %82, %83 : vector<8x8xf32>
    %85 = tpu.iota {dimensions = array<i32: 0>} : vector<8x8xi32>
    %86 = tpu.iota {dimensions = array<i32: 1>} : vector<8x8xi32>
    %87 = arith.cmpi sgt, %86, %85 : vector<8x8xi32>
    %cst_29 = arith.constant -1.000000e+30 : f32
    %88 = vector.broadcast %cst_29 : f32 to vector<8x8xf32>
    %89 = arith.select %87, %88, %84 : vector<8x8xi1>, vector<8x8xf32>
    %cst_30 = arith.constant dense<0xFF800000> : vector<8xf32>
    %90 = vector.multi_reduction <maximumf>, %89, %cst_30 [1] : vector<8x8xf32> to vector<8xf32>
    %91 = vector.shape_cast %90 : vector<8xf32> to vector<8x1xf32>
    %92 = vector.broadcast %91 : vector<8x1xf32> to vector<8x8xf32>
    %93 = arith.subf %89, %92 : vector<8x8xf32>
    %94 = math.exp %93 : vector<8x8xf32>
    %cst_31 = arith.constant dense<0.000000e+00> : vector<8xf32>
    %95 = vector.multi_reduction <add>, %94, %cst_31 [1] : vector<8x8xf32> to vector<8xf32>
    %96 = vector.shape_cast %95 : vector<8xf32> to vector<8x1xf32>
    %97 = tpu.reciprocal %96 {approx = true} : vector<8x1xf32> -> vector<8x1xf32>
    %98 = vector.broadcast %97 : vector<8x1xf32> to vector<8x8xf32>
    %99 = arith.mulf %94, %98 : vector<8x8xf32>
    %cst_32 = arith.constant dense<0.000000e+00> : vector<8x64xf32>
    %100 = tpu.matmul %99, %81, %cst_32 {dimension_numbers = #tpu.dot_dimension_numbers<[1], [0], [0], [1], [0, 0, 1, 1], [], []>} : vector<8x8xf32>, vector<8x64xf32>, vector<8x64xf32> -> vector<8x64xf32>
    %101 = tpu.concatenate %34, %56, %78, %100 in 1 : vector<8x64xf32>, vector<8x64xf32>, vector<8x64xf32>, vector<8x64xf32> -> vector<8x256xf32>
    %c0_33 = arith.constant 0 : index
    %c0_34 = arith.constant 0 : index
    %102 = vector.load %arg5[%c0_33, %c0_34] : memref<256x256xbf16, #tpu.memory_space<vmem>>, vector<256x256xbf16>
    %103 = arith.truncf %101 : vector<8x256xf32> to vector<8x256xbf16>
    %cst_35 = arith.constant dense<0.000000e+00> : vector<8x256xf32>
    %104 = tpu.matmul %103, %102, %cst_35 {dimension_numbers = #tpu.dot_dimension_numbers<[1], [0], [0], [1], [0, 0, 1, 1], [], []>} : vector<8x256xbf16>, vector<256x256xbf16>, vector<8x256xf32> -> vector<8x256xf32>
    %c0_36 = arith.constant 0 : index
    %c0_37 = arith.constant 0 : index
    %105 = vector.load %arg6[%c0_36, %c0_37] : memref<1x256xf32, #tpu.memory_space<vmem>>, vector<1x256xf32>
    %106 = vector.broadcast %105 : vector<1x256xf32> to vector<8x256xf32>
    %107 = arith.addf %104, %106 : vector<8x256xf32>
    %108 = arith.addf %3, %107 : vector<8x256xf32>
    %c0_38 = arith.constant 0 : index
    %c0_39 = arith.constant 0 : index
    %109 = vector.load %arg7[%c0_38, %c0_39] : memref<256x256xbf16, #tpu.memory_space<vmem>>, vector<256x256xbf16>
    %110 = arith.truncf %108 : vector<8x256xf32> to vector<8x256xbf16>
    %cst_40 = arith.constant dense<0.000000e+00> : vector<8x256xf32>
    %111 = tpu.matmul %110, %109, %cst_40 {dimension_numbers = #tpu.dot_dimension_numbers<[1], [0], [0], [1], [0, 0, 1, 1], [], []>} : vector<8x256xbf16>, vector<256x256xbf16>, vector<8x256xf32> -> vector<8x256xf32>
    %c0_41 = arith.constant 0 : index
    %c0_42 = arith.constant 0 : index
    %112 = vector.load %arg8[%c0_41, %c0_42] : memref<1x256xf32, #tpu.memory_space<vmem>>, vector<1x256xf32>
    %113 = vector.broadcast %112 : vector<1x256xf32> to vector<8x256xf32>
    %114 = arith.addf %111, %113 : vector<8x256xf32>
    %c0_43 = arith.constant 0 : index
    %c0_44 = arith.constant 0 : index
    %115 = vector.load %arg9[%c0_43, %c0_44] : memref<256x512xbf16, #tpu.memory_space<vmem>>, vector<256x512xbf16>
    %116 = arith.truncf %1 : vector<16x256xf32> to vector<16x256xbf16>
    %cst_45 = arith.constant dense<0.000000e+00> : vector<16x512xf32>
    %117 = tpu.matmul %116, %115, %cst_45 {dimension_numbers = #tpu.dot_dimension_numbers<[1], [0], [0], [1], [0, 0, 1, 1], [], []>} : vector<16x256xbf16>, vector<256x512xbf16>, vector<16x512xf32> -> vector<16x512xf32>
    %c0_46 = arith.constant 0 : index
    %c0_47 = arith.constant 0 : index
    %118 = vector.load %arg10[%c0_46, %c0_47] : memref<1x512xf32, #tpu.memory_space<vmem>>, vector<1x512xf32>
    %119 = vector.broadcast %118 : vector<1x512xf32> to vector<16x512xf32>
    %120 = arith.addf %117, %119 : vector<16x512xf32>
    %121 = vector.extract_strided_slice %120 {offsets = [0, 0], sizes = [16, 256], strides = [1, 1]} : vector<16x512xf32> to vector<16x256xf32>
    %122 = vector.extract_strided_slice %120 {offsets = [0, 256], sizes = [16, 256], strides = [1, 1]} : vector<16x512xf32> to vector<16x256xf32>
    %123 = vector.extract_strided_slice %114 {offsets = [0, 0], sizes = [8, 64], strides = [1, 1]} : vector<8x256xf32> to vector<8x64xf32>
    %124 = vector.extract_strided_slice %121 {offsets = [0, 0], sizes = [16, 64], strides = [1, 1]} : vector<16x256xf32> to vector<16x64xf32>
    %125 = vector.extract_strided_slice %122 {offsets = [0, 0], sizes = [16, 64], strides = [1, 1]} : vector<16x256xf32> to vector<16x64xf32>
    %cst_48 = arith.constant dense<0.000000e+00> : vector<8x16xf32>
    %126 = tpu.matmul %123, %124, %cst_48 {dimension_numbers = #tpu.dot_dimension_numbers<[1], [1], [0], [0], [0, 0, 1, 0], [], []>} : vector<8x64xf32>, vector<16x64xf32>, vector<8x16xf32> -> vector<8x16xf32>
    %cst_49 = arith.constant 1.250000e-01 : f32
    %127 = vector.broadcast %cst_49 : f32 to vector<8x16xf32>
    %128 = arith.mulf %126, %127 : vector<8x16xf32>
    %cst_50 = arith.constant dense<0xFF800000> : vector<8xf32>
    %129 = vector.multi_reduction <maximumf>, %128, %cst_50 [1] : vector<8x16xf32> to vector<8xf32>
    %130 = vector.shape_cast %129 : vector<8xf32> to vector<8x1xf32>
    %131 = vector.broadcast %130 : vector<8x1xf32> to vector<8x16xf32>
    %132 = arith.subf %128, %131 : vector<8x16xf32>
    %133 = math.exp %132 : vector<8x16xf32>
    %cst_51 = arith.constant dense<0.000000e+00> : vector<8xf32>
    %134 = vector.multi_reduction <add>, %133, %cst_51 [1] : vector<8x16xf32> to vector<8xf32>
    %135 = vector.shape_cast %134 : vector<8xf32> to vector<8x1xf32>
    %136 = tpu.reciprocal %135 {approx = true} : vector<8x1xf32> -> vector<8x1xf32>
    %137 = vector.broadcast %136 : vector<8x1xf32> to vector<8x16xf32>
    %138 = arith.mulf %133, %137 : vector<8x16xf32>
    %cst_52 = arith.constant dense<0.000000e+00> : vector<8x64xf32>
    %139 = tpu.matmul %138, %125, %cst_52 {dimension_numbers = #tpu.dot_dimension_numbers<[1], [0], [0], [1], [0, 0, 1, 1], [], []>} : vector<8x16xf32>, vector<16x64xf32>, vector<8x64xf32> -> vector<8x64xf32>
    %140 = vector.extract_strided_slice %114 {offsets = [0, 64], sizes = [8, 64], strides = [1, 1]} : vector<8x256xf32> to vector<8x64xf32>
    %141 = vector.extract_strided_slice %121 {offsets = [0, 64], sizes = [16, 64], strides = [1, 1]} : vector<16x256xf32> to vector<16x64xf32>
    %142 = vector.extract_strided_slice %122 {offsets = [0, 64], sizes = [16, 64], strides = [1, 1]} : vector<16x256xf32> to vector<16x64xf32>
    %cst_53 = arith.constant dense<0.000000e+00> : vector<8x16xf32>
    %143 = tpu.matmul %140, %141, %cst_53 {dimension_numbers = #tpu.dot_dimension_numbers<[1], [1], [0], [0], [0, 0, 1, 0], [], []>} : vector<8x64xf32>, vector<16x64xf32>, vector<8x16xf32> -> vector<8x16xf32>
    %cst_54 = arith.constant 1.250000e-01 : f32
    %144 = vector.broadcast %cst_54 : f32 to vector<8x16xf32>
    %145 = arith.mulf %143, %144 : vector<8x16xf32>
    %cst_55 = arith.constant dense<0xFF800000> : vector<8xf32>
    %146 = vector.multi_reduction <maximumf>, %145, %cst_55 [1] : vector<8x16xf32> to vector<8xf32>
    %147 = vector.shape_cast %146 : vector<8xf32> to vector<8x1xf32>
    %148 = vector.broadcast %147 : vector<8x1xf32> to vector<8x16xf32>
    %149 = arith.subf %145, %148 : vector<8x16xf32>
    %150 = math.exp %149 : vector<8x16xf32>
    %cst_56 = arith.constant dense<0.000000e+00> : vector<8xf32>
    %151 = vector.multi_reduction <add>, %150, %cst_56 [1] : vector<8x16xf32> to vector<8xf32>
    %152 = vector.shape_cast %151 : vector<8xf32> to vector<8x1xf32>
    %153 = tpu.reciprocal %152 {approx = true} : vector<8x1xf32> -> vector<8x1xf32>
    %154 = vector.broadcast %153 : vector<8x1xf32> to vector<8x16xf32>
    %155 = arith.mulf %150, %154 : vector<8x16xf32>
    %cst_57 = arith.constant dense<0.000000e+00> : vector<8x64xf32>
    %156 = tpu.matmul %155, %142, %cst_57 {dimension_numbers = #tpu.dot_dimension_numbers<[1], [0], [0], [1], [0, 0, 1, 1], [], []>} : vector<8x16xf32>, vector<16x64xf32>, vector<8x64xf32> -> vector<8x64xf32>
    %157 = vector.extract_strided_slice %114 {offsets = [0, 128], sizes = [8, 64], strides = [1, 1]} : vector<8x256xf32> to vector<8x64xf32>
    %158 = vector.extract_strided_slice %121 {offsets = [0, 128], sizes = [16, 64], strides = [1, 1]} : vector<16x256xf32> to vector<16x64xf32>
    %159 = vector.extract_strided_slice %122 {offsets = [0, 128], sizes = [16, 64], strides = [1, 1]} : vector<16x256xf32> to vector<16x64xf32>
    %cst_58 = arith.constant dense<0.000000e+00> : vector<8x16xf32>
    %160 = tpu.matmul %157, %158, %cst_58 {dimension_numbers = #tpu.dot_dimension_numbers<[1], [1], [0], [0], [0, 0, 1, 0], [], []>} : vector<8x64xf32>, vector<16x64xf32>, vector<8x16xf32> -> vector<8x16xf32>
    %cst_59 = arith.constant 1.250000e-01 : f32
    %161 = vector.broadcast %cst_59 : f32 to vector<8x16xf32>
    %162 = arith.mulf %160, %161 : vector<8x16xf32>
    %cst_60 = arith.constant dense<0xFF800000> : vector<8xf32>
    %163 = vector.multi_reduction <maximumf>, %162, %cst_60 [1] : vector<8x16xf32> to vector<8xf32>
    %164 = vector.shape_cast %163 : vector<8xf32> to vector<8x1xf32>
    %165 = vector.broadcast %164 : vector<8x1xf32> to vector<8x16xf32>
    %166 = arith.subf %162, %165 : vector<8x16xf32>
    %167 = math.exp %166 : vector<8x16xf32>
    %cst_61 = arith.constant dense<0.000000e+00> : vector<8xf32>
    %168 = vector.multi_reduction <add>, %167, %cst_61 [1] : vector<8x16xf32> to vector<8xf32>
    %169 = vector.shape_cast %168 : vector<8xf32> to vector<8x1xf32>
    %170 = tpu.reciprocal %169 {approx = true} : vector<8x1xf32> -> vector<8x1xf32>
    %171 = vector.broadcast %170 : vector<8x1xf32> to vector<8x16xf32>
    %172 = arith.mulf %167, %171 : vector<8x16xf32>
    %cst_62 = arith.constant dense<0.000000e+00> : vector<8x64xf32>
    %173 = tpu.matmul %172, %159, %cst_62 {dimension_numbers = #tpu.dot_dimension_numbers<[1], [0], [0], [1], [0, 0, 1, 1], [], []>} : vector<8x16xf32>, vector<16x64xf32>, vector<8x64xf32> -> vector<8x64xf32>
    %174 = vector.extract_strided_slice %114 {offsets = [0, 192], sizes = [8, 64], strides = [1, 1]} : vector<8x256xf32> to vector<8x64xf32>
    %175 = vector.extract_strided_slice %121 {offsets = [0, 192], sizes = [16, 64], strides = [1, 1]} : vector<16x256xf32> to vector<16x64xf32>
    %176 = vector.extract_strided_slice %122 {offsets = [0, 192], sizes = [16, 64], strides = [1, 1]} : vector<16x256xf32> to vector<16x64xf32>
    %cst_63 = arith.constant dense<0.000000e+00> : vector<8x16xf32>
    %177 = tpu.matmul %174, %175, %cst_63 {dimension_numbers = #tpu.dot_dimension_numbers<[1], [1], [0], [0], [0, 0, 1, 0], [], []>} : vector<8x64xf32>, vector<16x64xf32>, vector<8x16xf32> -> vector<8x16xf32>
    %cst_64 = arith.constant 1.250000e-01 : f32
    %178 = vector.broadcast %cst_64 : f32 to vector<8x16xf32>
    %179 = arith.mulf %177, %178 : vector<8x16xf32>
    %cst_65 = arith.constant dense<0xFF800000> : vector<8xf32>
    %180 = vector.multi_reduction <maximumf>, %179, %cst_65 [1] : vector<8x16xf32> to vector<8xf32>
    %181 = vector.shape_cast %180 : vector<8xf32> to vector<8x1xf32>
    %182 = vector.broadcast %181 : vector<8x1xf32> to vector<8x16xf32>
    %183 = arith.subf %179, %182 : vector<8x16xf32>
    %184 = math.exp %183 : vector<8x16xf32>
    %cst_66 = arith.constant dense<0.000000e+00> : vector<8xf32>
    %185 = vector.multi_reduction <add>, %184, %cst_66 [1] : vector<8x16xf32> to vector<8xf32>
    %186 = vector.shape_cast %185 : vector<8xf32> to vector<8x1xf32>
    %187 = tpu.reciprocal %186 {approx = true} : vector<8x1xf32> -> vector<8x1xf32>
    %188 = vector.broadcast %187 : vector<8x1xf32> to vector<8x16xf32>
    %189 = arith.mulf %184, %188 : vector<8x16xf32>
    %cst_67 = arith.constant dense<0.000000e+00> : vector<8x64xf32>
    %190 = tpu.matmul %189, %176, %cst_67 {dimension_numbers = #tpu.dot_dimension_numbers<[1], [0], [0], [1], [0, 0, 1, 1], [], []>} : vector<8x16xf32>, vector<16x64xf32>, vector<8x64xf32> -> vector<8x64xf32>
    %191 = tpu.concatenate %139, %156, %173, %190 in 1 : vector<8x64xf32>, vector<8x64xf32>, vector<8x64xf32>, vector<8x64xf32> -> vector<8x256xf32>
    %c0_68 = arith.constant 0 : index
    %c0_69 = arith.constant 0 : index
    %192 = vector.load %arg11[%c0_68, %c0_69] : memref<256x256xbf16, #tpu.memory_space<vmem>>, vector<256x256xbf16>
    %193 = arith.truncf %191 : vector<8x256xf32> to vector<8x256xbf16>
    %cst_70 = arith.constant dense<0.000000e+00> : vector<8x256xf32>
    %194 = tpu.matmul %193, %192, %cst_70 {dimension_numbers = #tpu.dot_dimension_numbers<[1], [0], [0], [1], [0, 0, 1, 1], [], []>} : vector<8x256xbf16>, vector<256x256xbf16>, vector<8x256xf32> -> vector<8x256xf32>
    %c0_71 = arith.constant 0 : index
    %c0_72 = arith.constant 0 : index
    %195 = vector.load %arg12[%c0_71, %c0_72] : memref<1x256xf32, #tpu.memory_space<vmem>>, vector<1x256xf32>
    %196 = vector.broadcast %195 : vector<1x256xf32> to vector<8x256xf32>
    %197 = arith.addf %194, %196 : vector<8x256xf32>
    %198 = arith.addf %108, %197 : vector<8x256xf32>
    %c0_73 = arith.constant 0 : index
    %c0_74 = arith.constant 0 : index
    %199 = vector.load %arg13[%c0_73, %c0_74] : memref<256x1024xbf16, #tpu.memory_space<vmem>>, vector<256x1024xbf16>
    %200 = arith.truncf %198 : vector<8x256xf32> to vector<8x256xbf16>
    %cst_75 = arith.constant dense<0.000000e+00> : vector<8x1024xf32>
    %201 = tpu.matmul %200, %199, %cst_75 {dimension_numbers = #tpu.dot_dimension_numbers<[1], [0], [0], [1], [0, 0, 1, 1], [], []>} : vector<8x256xbf16>, vector<256x1024xbf16>, vector<8x1024xf32> -> vector<8x1024xf32>
    %c0_76 = arith.constant 0 : index
    %c0_77 = arith.constant 0 : index
    %202 = vector.load %arg14[%c0_76, %c0_77] : memref<1x1024xf32, #tpu.memory_space<vmem>>, vector<1x1024xf32>
    %203 = vector.broadcast %202 : vector<1x1024xf32> to vector<8x1024xf32>
    %204 = arith.addf %201, %203 : vector<8x1024xf32>
    %cst_78 = arith.constant 0.000000e+00 : f32
    %205 = vector.broadcast %cst_78 : f32 to vector<8x1024xf32>
    %206 = arith.maximumf %204, %205 : vector<8x1024xf32>
    %c0_79 = arith.constant 0 : index
    %c0_80 = arith.constant 0 : index
    %207 = vector.load %arg15[%c0_79, %c0_80] : memref<1024x256xbf16, #tpu.memory_space<vmem>>, vector<1024x256xbf16>
    %208 = arith.truncf %206 : vector<8x1024xf32> to vector<8x1024xbf16>
    %cst_81 = arith.constant dense<0.000000e+00> : vector<8x256xf32>
    %209 = tpu.matmul %208, %207, %cst_81 {dimension_numbers = #tpu.dot_dimension_numbers<[1], [0], [0], [1], [0, 0, 1, 1], [], []>} : vector<8x1024xbf16>, vector<1024x256xbf16>, vector<8x256xf32> -> vector<8x256xf32>
    %c0_82 = arith.constant 0 : index
    %c0_83 = arith.constant 0 : index
    %210 = vector.load %arg16[%c0_82, %c0_83] : memref<1x256xf32, #tpu.memory_space<vmem>>, vector<1x256xf32>
    %211 = vector.broadcast %210 : vector<1x256xf32> to vector<8x256xf32>
    %212 = arith.addf %209, %211 : vector<8x256xf32>
    %213 = arith.addf %198, %212 : vector<8x256xf32>
    %c0_84 = arith.constant 0 : index
    %c0_85 = arith.constant 0 : index
    %c0_86 = arith.constant 0 : index
    %214 = vector.load %arg17[%c0_84, %c0_85, %c0_86] : memref<1x8x256xf32, #tpu.memory_space<vmem>>, vector<1x8x256xf32>
    %215 = vector.shape_cast %214 : vector<1x8x256xf32> to vector<8x256xf32>
    %216 = vector.shape_cast %213 : vector<8x256xf32> to vector<1x8x256xf32>
    tpu.vector_store %arg17[%c0_84, %c0_85, %c0_86], %216 {strides = array<i32>} : memref<1x8x256xf32, #tpu.memory_space<vmem>>, vector<1x8x256xf32>,
    return
  }
  func.func @transform_0(%arg0: i32) -> (i32, i32, i32) {
    %c0_i32 = arith.constant 0 : i32
    %c0_i32_0 = arith.constant 0 : i32
    %c0_i32_1 = arith.constant 0 : i32
    return %arg0, %c0_i32, %c0_i32_0 : i32, i32, i32
  }
  func.func @transform_1(%arg0: i32) -> (i32, i32, i32) {
    %c0_i32 = arith.constant 0 : i32
    %c0_i32_0 = arith.constant 0 : i32
    %c0_i32_1 = arith.constant 0 : i32
    return %arg0, %c0_i32, %c0_i32_0 : i32, i32, i32
  }
  func.func @transform_2(%arg0: i32) -> (i32, i32) {
    %c0_i32 = arith.constant 0 : i32
    %c0_i32_0 = arith.constant 0 : i32
    %c0_i32_1 = arith.constant 0 : i32
    return %c0_i32, %c0_i32_0 : i32, i32
  }
  func.func @transform_3(%arg0: i32) -> (i32, i32) {
    %c0_i32 = arith.constant 0 : i32
    %c0_i32_0 = arith.constant 0 : i32
    %c0_i32_1 = arith.constant 0 : i32
    return %c0_i32, %c0_i32_0 : i32, i32
  }
  func.func @transform_4(%arg0: i32) -> (i32, i32) {
    %c0_i32 = arith.constant 0 : i32
    %c0_i32_0 = arith.constant 0 : i32
    %c0_i32_1 = arith.constant 0 : i32
    return %c0_i32, %c0_i32_0 : i32, i32
  }
  func.func @transform_5(%arg0: i32) -> (i32, i32) {
    %c0_i32 = arith.constant 0 : i32
    %c0_i32_0 = arith.constant 0 : i32
    %c0_i32_1 = arith.constant 0 : i32
    return %c0_i32, %c0_i32_0 : i32, i32
  }
  func.func @transform_6(%arg0: i32) -> (i32, i32) {
    %c0_i32 = arith.constant 0 : i32
    %c0_i32_0 = arith.constant 0 : i32
    %c0_i32_1 = arith.constant 0 : i32
    return %c0_i32, %c0_i32_0 : i32, i32
  }
  func.func @transform_7(%arg0: i32) -> (i32, i32) {
    %c0_i32 = arith.constant 0 : i32
    %c0_i32_0 = arith.constant 0 : i32
    %c0_i32_1 = arith.constant 0 : i32
    return %c0_i32, %c0_i32_0 : i32, i32
  }
  func.func @transform_8(%arg0: i32) -> (i32, i32) {
    %c0_i32 = arith.constant 0 : i32
    %c0_i32_0 = arith.constant 0 : i32
    %c0_i32_1 = arith.constant 0 : i32
    return %c0_i32, %c0_i32_0 : i32, i32
  }
  func.func @transform_9(%arg0: i32) -> (i32, i32) {
    %c0_i32 = arith.constant 0 : i32
    %c0_i32_0 = arith.constant 0 : i32
    %c0_i32_1 = arith.constant 0 : i32
    return %c0_i32, %c0_i32_0 : i32, i32
  }
  func.func @transform_10(%arg0: i32) -> (i32, i32) {
    %c0_i32 = arith.constant 0 : i32
    %c0_i32_0 = arith.constant 0 : i32
    %c0_i32_1 = arith.constant 0 : i32
    return %c0_i32, %c0_i32_0 : i32, i32
  }
  func.func @transform_11(%arg0: i32) -> (i32, i32) {
    %c0_i32 = arith.constant 0 : i32
    %c0_i32_0 = arith.constant 0 : i32
    %c0_i32_1 = arith.constant 0 : i32
    return %c0_i32, %c0_i32_0 : i32, i32
  }
  func.func @transform_12(%arg0: i32) -> (i32, i32) {
    %c0_i32 = arith.constant 0 : i32
    %c0_i32_0 = arith.constant 0 : i32
    %c0_i32_1 = arith.constant 0 : i32
    return %c0_i32, %c0_i32_0 : i32, i32
  }
  func.func @transform_13(%arg0: i32) -> (i32, i32) {
    %c0_i32 = arith.constant 0 : i32
    %c0_i32_0 = arith.constant 0 : i32
    %c0_i32_1 = arith.constant 0 : i32
    return %c0_i32, %c0_i32_0 : i32, i32
  }
  func.func @transform_14(%arg0: i32) -> (i32, i32) {
    %c0_i32 = arith.constant 0 : i32
    %c0_i32_0 = arith.constant 0 : i32
    %c0_i32_1 = arith.constant 0 : i32
    return %c0_i32, %c0_i32_0 : i32, i32
  }
  func.func @transform_15(%arg0: i32) -> (i32, i32) {
    %c0_i32 = arith.constant 0 : i32
    %c0_i32_0 = arith.constant 0 : i32
    %c0_i32_1 = arith.constant 0 : i32
    return %c0_i32, %c0_i32_0 : i32, i32
  }
  func.func @transform_16(%arg0: i32) -> (i32, i32, i32) {
    %c0_i32 = arith.constant 0 : i32
    %c0_i32_0 = arith.constant 0 : i32
    %c0_i32_1 = arith.constant 0 : i32
    return %arg0, %c0_i32, %c0_i32_0 : i32, i32, i32
  }
}

</mosaic_0001>

<bundles_post_ra>
// kernel: decoder_block.1
= control target key start
LH: loop header
LB: loop body
LE: loop exit
PB: predicated region body
PF: predicated region fallthrough
CT: control target
= control target key end

     0   :  { %s8917_s0 = inlined_call_operand.hbm [shape: f32[2,16,256], index: 0, kind: input, shape index: {}]   ;;  %s8918_s1 = inlined_call_operand.vmem [shape: f32[2,8,256], index: 1, kind: input, shape index: {}]   ;;  %s8919_s2 = inlined_call_operand.hbm [shape: bf16[256,768], index: 2, kind: input, shape index: {}]   ;;  %s8920_s3 = inlined_call_operand.vmem [shape: f32[1,768], index: 3, kind: input, shape index: {}]   ;;  %s8921_s4 = inlined_call_operand.hbm [shape: bf16[256,256], index: 4, kind: input, shape index: {}]   ;;  %s8922_s5 = inlined_call_operand.hbm [shape: f32[1,256], index: 5, kind: input, shape index: {}]   ;;  %s8923_s6 = inlined_call_operand.hbm [shape: bf16[256,256], index: 6, kind: input, shape index: {}]   ;;  %s8924_s7 = inlined_call_operand.vmem [shape: f32[1,256], index: 7, kind: input, shape index: {}]   ;;  %s8925_s8 = inlined_call_operand.hbm [shape: bf16[256,512], index: 8, kind: input, shape index: {}]   ;;  %s8926_s9 = inlined_call_operand.vmem [shape: f32[1,512], index: 9, kind: input, shape index: {}]   ;;  %s8927_s10 = inlined_call_operand.hbm [shape: bf16[256,256], index: 10, kind: input, shape index: {}]   ;;  %s8928_s11 = inlined_call_operand.vmem [shape: f32[1,256], index: 11, kind: input, shape index: {}]   ;;  %s8929_s12 = inlined_call_operand.hbm [shape: bf16[256,1024], index: 12, kind: input, shape index: {}]   ;;  %s8930_s13 = inlined_call_operand.hbm [shape: f32[1,1024], index: 13, kind: input, shape index: {}]   ;;  %s8931_s14 = inlined_call_operand.hbm [shape: bf16[1024,256], index: 14, kind: input, shape index: {}]   ;;  %s8932_s15 = inlined_call_operand.vmem [shape: f32[1,256], index: 15, kind: input, shape index: {}]   ;;  %s8933_s16 = inlined_call_operand.hbm [shape: f32[2,8,256], index: 16, kind: output, shape index: {}]  }
   0x1   :  { %8941 = sst [smem:[#allocation27_spill]] %s8917_s0 }
   0x2   :  { %8942 = sst [smem:[#allocation28_spill]] %s8918_s1 }
   0x3   :  { %8943 = sst [smem:[#allocation29_spill]] %s8919_s2 }
   0x4   :  { %8944 = sst [smem:[#allocation30_spill]] %s8920_s3 }
   0x5   :  { %8945 = sst [smem:[#allocation31_spill]] %s8922_s5 }
   0x6   :  { %8946 = sst [smem:[#allocation32_spill]] %s8924_s7 }
   0x7   :  { %8947 = sst [smem:[#allocation33_spill]] %s8926_s9 }
   0x8   :  { %8948 = sst [smem:[#allocation34_spill]] %s8928_s11 }
   0x9   :  { %8949 = sst [smem:[#allocation35_spill]] %s8932_s15 }
   0xa   :  { %8950 = sst [smem:[#allocation36_spill]] %s8933_s16 }
   0xb   :  { %21 = vsyncpa [#allocation3], 0 }
   0xc   :  { %23 = vsyncpa [#allocation3 + $0x1], 0 }
   0xd   :  { %24 = vsyncpa [#allocation6], 0 }
   0xe   :  { %25 = vsyncpa [#allocation9], 0 }
   0xf   :  { %26 = vsyncpa [#allocation12], 0 }
  0x10   :  { %27 = vsyncpa [#allocation15], 0 }
  0x11   :  { %28 = vsyncpa [#allocation18], 0 }
  0x12   :  { %29 = vsyncpa [#allocation4], 0 }
  0x13   :  { %31 = vsyncpa [#allocation4 + $0x1], 0  ;;  %s8162_s21 = smov 0   ;;  %s8164_s22 = smov 0  }
  0x14   :  { %s8166_s23 = smov 0   ;;  %s8168_s24 = smov 0  }
  0x15 LB: > { %s8054_s25 = smov [#allocation5]   ;;  %s8183_s27 = sadd.s32 4294967295, %s8052_s24   ;;  %s8052_s24 = sphi %s8168_s24, %s8990_s24   ;;  %s8048_s23 = sphi %s8166_s23, %s8989_s23   ;;  %s8044_s22 = sphi %s8164_s22, %s8988_s22   ;;  %s8040_s21 = sphi %s8162_s21, %s8987_s21  }
  0x16   : > { %s426_s26 = sshll.u32 %s8054_s25, 4  ;;  %p6155_p0 = scmp.ge.s32.totalorder %s8052_s24, 1  ;;  %s8188_s26 = int_to_ptr.vmem [resolvable:$true] %s426_s26 }
  0x17   : > { %p8936_p1 = scmp.eq.s32.totalorder %s8183_s27, 0  ;;  %p414_p2 = scmp.lt.s32.totalorder %s8052_s24, 3 }
  0x18   : > { %s8055_s29 = smov [#allocation8]   ;;  %s8056_s17 = smov [#allocation11]  }
  0x19   : > { %p8190_p3 = pnand %p6155_p0, %p414_p2  ;;  %s456_s30 = sshll.u32 %s8055_s29, 4  ;;  %s8203_s30 = int_to_ptr.vmem [resolvable:$true] %s456_s30 }
  0x1a   : > { %s482_s18 = sshll.u32 %s8056_s17, 4  ;;  %s8953_s2 = sld [smem:[#allocation29_spill]]  ;;  %s8205_s18 = int_to_ptr.vmem [resolvable:$true] %s482_s18 }
  0x1b   : > { %s8951_s28 = scalar_select %p8190_p3, 1, 0 }
  0x1c   : > { %p6935_p5 = pneg %p8190_p3 }
  0x1e   : > { %p8199_p6 = pnand %p6935_p5, %p8936_p1 }
  0x20   : > { %s7684_s25 = scalar_lea.hbm %s8953_s2, 12288  ;;  %p8215_p8 = pneg %p8199_p6 }
  0x21   : > { %p7685_p7 = scmp.ne.s32.totalorder %s8953_s2, %s7684_s25  ;;  %p7691_p11 = scmp.lt.u32.totalorder %s7684_s25, %s8953_s2 }
  0x23   : > { %p7687_p9 = pnand %p8215_p8, %p7685_p7 }
  0x25   : > { %p7688_p10 = pneg %p7687_p9 }
  0x27   : > { %p7693_p12 = pnand %p7691_p11, %p7688_p10 }
  0x29   : > { %7696 = shalt.err (!%p7693_p12)
}
  0x2a   : > { %s7697_s15 = scalar_lea.vmem %s8188_s26, 12288  ;;  %p7705_p5 = scmp.lt.s32.totalorder %s8188_s26, %s8188_s26 }
  0x2b   : > { %p7698_p13 = scmp.ne.s32.totalorder %s8188_s26, %s7697_s15  ;;  %p7706_p4 = scmp.lt.s32.totalorder %s7697_s15, %s7697_s15 }
  0x2d   : > { %p7700_p0 = pnand %p7698_p13, %p8215_p8  ;;  %p7707_p7 = por %p7706_p4, %p7705_p5 }
  0x2f   : > { %p7701_p2 = pneg %p7700_p0 }
  0x31   : > { %p7708_p9 = pnand %p7707_p7, %p7701_p2 }
  0x33   : > { %7711 = shalt.err (!%p7708_p9)
}
  0x34   : > { %s8057_s16 = smov 384   ;;  %s8058_s11 = smov 24  }
  0x35   : > { %6938 = dma.hbm_to_vmem [thread:$0]  (!%p8199_p6), %s8953_s2, 12288, %s8188_s26, [#allocation6], %s8057_s16, %s8057_s16, %s8058_s11  }
  0x36   : > { %s8955_s5 = sld [smem:[#allocation31_spill]] }
  0x3c   : > { %s7712_s7 = scalar_lea.hbm %s8955_s5, 32 }
  0x3d   : > { %p7713_p4 = scmp.ne.s32.totalorder %s8955_s5, %s7712_s7  ;;  %p7719_p12 = scmp.lt.u32.totalorder %s7712_s7, %s8955_s5 }
  0x3f   : > { %p7715_p10 = pnand %p7713_p4, %p8215_p8 }
  0x41   : > { %p7716_p11 = pneg %p7715_p10 }
  0x43   : > { %p7721_p13 = pnand %p7719_p12, %p7716_p11 }
  0x45   : > { %7724 = shalt.err (!%p7721_p13)
}
  0x46   : > { %s7725_s26 = scalar_lea.vmem %s8203_s30, 32  ;;  %p7733_p7 = scmp.lt.s32.totalorder %s8203_s30, %s8203_s30 }
  0x47   : > { %p7726_p0 = scmp.ne.s32.totalorder %s8203_s30, %s7725_s26  ;;  %p7734_p9 = scmp.lt.s32.totalorder %s7725_s26, %s7725_s26 }
  0x49   : > { %p7728_p2 = pnand %p7726_p0, %p8215_p8  ;;  %p7735_p4 = por %p7734_p9, %p7733_p7 }
  0x4b   : > { %p7729_p5 = pneg %p7728_p2 }
  0x4d   : > { %p7736_p10 = pnand %p7735_p4, %p7729_p5 }
  0x4f   : > { %7739 = shalt.err (!%p7736_p10)
}
  0x50   : > { %6944 = dma.hbm_to_vmem [thread:$0]  (!%p8199_p6), %s8955_s5, 32, %s8203_s30, [#allocation9]  }
  0x51   : > { %s7740_s16 = scalar_lea.hbm %s8925_s8, 8192 }
  0x52   : > { %p7741_p11 = scmp.ne.s32.totalorder %s8925_s8, %s7740_s16  ;;  %p7747_p0 = scmp.lt.u32.totalorder %s7740_s16, %s8925_s8 }
  0x54   : > { %p7743_p12 = pnand %p7741_p11, %p8215_p8 }
  0x56   : > { %p7744_p13 = pneg %p7743_p12 }
  0x58   : > { %p7749_p2 = pnand %p7747_p0, %p7744_p13 }
  0x5a   : > { %7752 = shalt.err (!%p7749_p2)
}
  0x5b   : > { %s7753_s30 = scalar_lea.vmem %s8205_s18, 8192  ;;  %p7761_p4 = scmp.lt.s32.totalorder %s8205_s18, %s8205_s18 }
  0x5c   : > { %p7754_p5 = scmp.ne.s32.totalorder %s8205_s18, %s7753_s30  ;;  %p7762_p10 = scmp.lt.s32.totalorder %s7753_s30, %s7753_s30 }
  0x5e   : > { %p7756_p7 = pnand %p7754_p5, %p8215_p8  ;;  %p7763_p11 = por %p7762_p10, %p7761_p4 }
  0x60   : > { %p7757_p9 = pneg %p7756_p7 }
  0x62   : > { %p7764_p12 = pnand %p7763_p11, %p7757_p9 }
  0x64   : > { %7767 = shalt.err (!%p7764_p12)
}
  0x65   : > { %s8938_s17 = smov 256   ;;  %s8939_s15 = smov 16  }
  0x66   : > { %6950 = dma.hbm_to_vmem [thread:$0]  (!%p8199_p6), %s8925_s8, 8192, %s8205_s18, [#allocation12], %s8938_s17, %s8938_s17, %s8939_s15  }
  0x67   : > { %s8061_s3 = smov [#allocation14]   ;;  %s7768_s11 = scalar_lea.hbm %s8929_s12, 16384 }
  0x68   : > { %s514_s7 = sshll.u32 %s8061_s3, 4  ;;  %p7769_p13 = scmp.ne.s32.totalorder %s8929_s12, %s7768_s11  ;;  %s515_s7 = int_to_ptr.vmem [resolvable:$true] %s514_s7 }
  0x69   : > { %p7775_p5 = scmp.lt.u32.totalorder %s7768_s11, %s8929_s12 }
  0x6a   : > { %p7771_p0 = pnand %p7769_p13, %p8215_p8 }
  0x6c   : > { %p7772_p2 = pneg %p7771_p0 }
  0x6e   : > { %p7777_p7 = pnand %p7775_p5, %p7772_p2 }
  0x70   : > { %7780 = shalt.err (!%p7777_p7)
}
  0x71   : > { %s7781_s18 = scalar_lea.vmem %s515_s7, 16384  ;;  %p7789_p11 = scmp.lt.s32.totalorder %s515_s7, %s515_s7 }
  0x72   : > { %p7782_p9 = scmp.ne.s32.totalorder %s515_s7, %s7781_s18  ;;  %p7790_p12 = scmp.lt.s32.totalorder %s7781_s18, %s7781_s18 }
  0x74   : > { %p7784_p4 = pnand %p7782_p9, %p8215_p8  ;;  %p7791_p1 = por %p7790_p12, %p7789_p11 }
  0x76   : > { %p7785_p10 = pneg %p7784_p4 }
  0x78   : > { %p7792_p3 = pnand %p7791_p1, %p7785_p10 }
  0x7a   : > { %7795 = shalt.err (!%p7792_p3)
}
  0x7b   : > { %s8062_s26 = smov 512   ;;  %s8063_s1 = smov 32  }
  0x7c   : > { %6956 = dma.hbm_to_vmem [thread:$0]  (!%p8199_p6), %s8929_s12, 16384, %s515_s7, [#allocation15], %s8062_s26, %s8062_s26, %s8063_s1  }
  0x7d   : > { %s8064_s16 = smov [#allocation7]   ;;  %s7796_s25 = scalar_lea.hbm %s8921_s4, 4096 }
  0x7e   : > { %s442_s11 = sshll.u32 %s8064_s16, 4  ;;  %p7797_p1 = scmp.ne.s32.totalorder %s8921_s4, %s7796_s25  ;;  %s443_s11 = int_to_ptr.vmem [resolvable:$true] %s442_s11 }
  0x7f   : > { %p7803_p0 = scmp.lt.u32.totalorder %s7796_s25, %s8921_s4 }
  0x80   : > { %p7799_p3 = pnand %p7797_p1, %p8215_p8 }
  0x82   : > { %p7800_p13 = pneg %p7799_p3 }
  0x84   : > { %p7805_p2 = pnand %p7803_p0, %p7800_p13 }
  0x86   : > { %7808 = shalt.err (!%p7805_p2)
}
  0x87   : > { %s7809_s7 = scalar_lea.vmem %s443_s11, 4096  ;;  %p7817_p4 = scmp.lt.s32.totalorder %s443_s11, %s443_s11 }
  0x88   : > { %p7810_p5 = scmp.ne.s32.totalorder %s443_s11, %s7809_s7  ;;  %p7818_p10 = scmp.lt.s32.totalorder %s7809_s7, %s7809_s7 }
  0x8a   : > { %p7812_p7 = pnand %p7810_p5, %p8215_p8  ;;  %p7819_p11 = por %p7818_p10, %p7817_p4 }
  0x8c   : > { %p7813_p9 = pneg %p7812_p7 }
  0x8e   : > { %p7820_p12 = pnand %p7819_p11, %p7813_p9 }
  0x90   : > { %7823 = shalt.err (!%p7820_p12)
}
  0x91   : > { %s8065_s26 = smov 128   ;;  %s8066_s1 = smov 8  }
  0x92   : > { %6941 = dma.hbm_to_vmem [thread:$0]  (!%p8199_p6), %s8921_s4, 4096, %s443_s11, [#allocation6], %s8065_s26, %s8065_s26, %s8066_s1  }
  0x93   : > { %s8067_s3 = smov [#allocation10]   ;;  %s8068_s16 = smov [#allocation13]  }
  0x94   : > { %s466_s9 = sshll.u32 %s8067_s3, 4  ;;  %s498_s19 = sshll.u32 %s8068_s16, 4  ;;  %s467_s9 = int_to_ptr.vmem [resolvable:$true] %s466_s9  ;;  %s499_s19 = int_to_ptr.vmem [resolvable:$true] %s498_s19 }
  0x95   : > { %s7824_s30 = scalar_lea.hbm %s8923_s6, 4096 }
  0x96   : > { %p7825_p1 = scmp.ne.s32.totalorder %s8923_s6, %s7824_s30  ;;  %p7831_p0 = scmp.lt.u32.totalorder %s7824_s30, %s8923_s6 }
  0x98   : > { %p7827_p3 = pnand %p7825_p1, %p8215_p8 }
  0x9a   : > { %p7828_p13 = pneg %p7827_p3 }
  0x9c   : > { %p7833_p2 = pnand %p7831_p0, %p7828_p13 }
  0x9e   : > { %7836 = shalt.err (!%p7833_p2)
}
  0x9f   : > { %s7837_s11 = scalar_lea.vmem %s467_s9, 4096  ;;  %p7845_p4 = scmp.lt.s32.totalorder %s467_s9, %s467_s9 }
  0xa0   : > { %p7838_p5 = scmp.ne.s32.totalorder %s467_s9, %s7837_s11  ;;  %p7846_p10 = scmp.lt.s32.totalorder %s7837_s11, %s7837_s11 }
  0xa2   : > { %p7840_p7 = pnand %p7838_p5, %p8215_p8  ;;  %p7847_p11 = por %p7846_p10, %p7845_p4 }
  0xa4   : > { %p7841_p9 = pneg %p7840_p7 }
  0xa6   : > { %p7848_p12 = pnand %p7847_p11, %p7841_p9 }
  0xa8   : > { %7851 = shalt.err (!%p7848_p12)
}
  0xa9   : > { %6947 = dma.hbm_to_vmem [thread:$0]  (!%p8199_p6), %s8923_s6, 4096, %s467_s9, [#allocation9], %s8065_s26, %s8065_s26, %s8066_s1  }
  0xaa   : > { %s7852_s3 = scalar_lea.hbm %s8927_s10, 4096 }
  0xab   : > { %p7853_p1 = scmp.ne.s32.totalorder %s8927_s10, %s7852_s3  ;;  %p7859_p0 = scmp.lt.u32.totalorder %s7852_s3, %s8927_s10 }
  0xad   : > { %p7855_p3 = pnand %p7853_p1, %p8215_p8 }
  0xaf   : > { %p7856_p13 = pneg %p7855_p3 }
  0xb1   : > { %p7861_p2 = pnand %p7859_p0, %p7856_p13 }
  0xb3   : > { %7864 = shalt.err (!%p7861_p2)
}
  0xb4   : > { %s7865_s18 = scalar_lea.vmem %s499_s19, 4096  ;;  %p7873_p4 = scmp.lt.s32.totalorder %s499_s19, %s499_s19 }
  0xb5   : > { %p7866_p5 = scmp.ne.s32.totalorder %s499_s19, %s7865_s18  ;;  %p7874_p10 = scmp.lt.s32.totalorder %s7865_s18, %s7865_s18 }
  0xb7   : > { %p7868_p7 = pnand %p7866_p5, %p8215_p8  ;;  %p7875_p11 = por %p7874_p10, %p7873_p4 }
  0xb9   : > { %p7869_p9 = pneg %p7868_p7 }
  0xbb   : > { %p7876_p12 = pnand %p7875_p11, %p7869_p9 }
  0xbd   : > { %7879 = shalt.err (!%p7876_p12)
}
  0xbe   : > { %6953 = dma.hbm_to_vmem [thread:$0]  (!%p8199_p6), %s8927_s10, 4096, %s499_s19, [#allocation12], %s8065_s26, %s8065_s26, %s8066_s1  }
  0xbf   : > { %s8069_s11 = smov [#allocation16]   ;;  %s8070_s5 = smov [#allocation17]  }
  0xc0   : > { %s528_s2 = sshll.u32 %s8069_s11, 4  ;;  %s538_s17 = sshll.u32 %s8070_s5, 4  ;;  %s529_s2 = int_to_ptr.vmem [resolvable:$true] %s528_s2  ;;  %s539_s17 = int_to_ptr.vmem [resolvable:$true] %s538_s17 }
  0xc1   : > { %s7880_s16 = scalar_lea.hbm %s8930_s13, 128 }
  0xc2   : > { %p7881_p1 = scmp.ne.s32.totalorder %s8930_s13, %s7880_s16  ;;  %p7887_p0 = scmp.lt.u32.totalorder %s7880_s16, %s8930_s13 }
  0xc4   : > { %p7883_p3 = pnand %p7881_p1, %p8215_p8 }
  0xc6   : > { %p7884_p13 = pneg %p7883_p3 }
  0xc8   : > { %p7889_p2 = pnand %p7887_p0, %p7884_p13 }
  0xca   : > { %7892 = shalt.err (!%p7889_p2)
}
  0xcb   : > { %s7893_s19 = scalar_lea.vmem %s529_s2, 128  ;;  %p7901_p4 = scmp.lt.s32.totalorder %s529_s2, %s529_s2 }
  0xcc   : > { %p7894_p5 = scmp.ne.s32.totalorder %s529_s2, %s7893_s19  ;;  %p7902_p10 = scmp.lt.s32.totalorder %s7893_s19, %s7893_s19 }
  0xce   : > { %p7896_p7 = pnand %p7894_p5, %p8215_p8  ;;  %p7903_p11 = por %p7902_p10, %p7901_p4 }
  0xd0   : > { %p7897_p9 = pneg %p7896_p7 }
  0xd2   : > { %p7904_p12 = pnand %p7903_p11, %p7897_p9 }
  0xd4   : > { %7907 = shalt.err (!%p7904_p12)
}
  0xd5   : > { %6959 = dma.hbm_to_vmem [thread:$0]  (!%p8199_p6), %s8930_s13, 128, %s529_s2, [#allocation15]  }
  0xd6   : > { %s7908_s15 = scalar_lea.hbm %s8931_s14, 16384 }
  0xd7   : > { %p7909_p1 = scmp.ne.s32.totalorder %s8931_s14, %s7908_s15  ;;  %p7915_p0 = scmp.lt.u32.totalorder %s7908_s15, %s8931_s14 }
  0xd9   : > { %p7911_p3 = pnand %p7909_p1, %p8215_p8 }
  0xdb   : > { %p7912_p13 = pneg %p7911_p3 }
  0xdd   : > { %p7917_p2 = pnand %p7915_p0, %p7912_p13 }
  0xdf   : > { %7920 = shalt.err (!%p7917_p2)
}
  0xe0   : > { %s7921_s30 = scalar_lea.vmem %s539_s17, 16384  ;;  %p7929_p4 = scmp.lt.s32.totalorder %s539_s17, %s539_s17 }
  0xe1   : > { %p7922_p5 = scmp.ne.s32.totalorder %s539_s17, %s7921_s30  ;;  %p7930_p10 = scmp.lt.s32.totalorder %s7921_s30, %s7921_s30 }
  0xe3   : > { %p7924_p7 = pnand %p7922_p5, %p8215_p8  ;;  %p7931_p11 = por %p7930_p10, %p7929_p4 }
  0xe5   : > { %p7925_p9 = pneg %p7924_p7 }
  0xe7   : > { %p7932_p12 = pnand %p7931_p11, %p7925_p9 }
  0xe9   : > { %7935 = shalt.err (!%p7932_p12)
}
  0xea   : > { %6962 = dma.hbm_to_vmem [thread:$0]  (!%p8199_p6), %s8931_s14, 16384, %s539_s17, [#allocation18], %s8065_s26, %s8065_s26, %s8066_s1  }
  0xeb   : > { %s6154_s0 = sadd.s32 4294967294, %s8052_s24   ;;  %s8407_s29 = sadd.s32 1, %s8052_s24  }
  0xec   : > { %s44_s19 = sadd.s32 1, %s8048_s23  ;;  %s41_s9 = ssub.s32 %s8052_s24, %s8407_s29 }
  0xed   : > { %p51_p8 = scmp.ne.s32.totalorder %s8048_s23, %s8044_s22  ;;  %p42_p1 = scmp.eq.s32.totalorder %s41_s9, 0 }
  0xee   : > { %p52_p3 = scmp.eq.s32.totalorder %s8052_s24, 0  ;;  %p57_p13 = scmp.ne.s32.totalorder %s8044_s22, %s8040_s21 }
  0xef   : > { %p401_p0 = scmp.eq.s32.totalorder %s8183_s27, 1  ;;  %p8956_p5 = scmp.eq.s32.totalorder %s8183_s27, 0 }
  0xf0   : > { %s8419_s7 = scalar_select %p42_p1, %s8048_s23, %s44_s19  }
  0xf1   : > { %p53_p2 = por %p52_p3, %p51_p8  ;;  %p8423_p7 = por %p8956_p5, %p57_p13 }
  0xf2   : > { %p8427_p6 = por %p401_p0, %p51_p8  ;;  %p407_p9 = scmp.eq.s32.totalorder %s6154_s0, 1 }
  0xf3   : > { %p6980_p4 = scmp.lt.s32.totalorder %s8052_s24, 2  ;;  %s555_s1 = sand.u32 1, %s8048_s23  }
  0xf4   : > { %s8958_s26 = scalar_select %p8427_p6, 1, 0 }
  0xf5   : > { %p8433_p10 = por %p407_p9, %p57_p13  ;;  %s6166_s5 = sshll.u32 %s555_s1, 5 }
  0xf6   : > { %s6728_s15 = sshll.u32 %s8052_s24, 9  ;;  %s8960_s20 = sld [smem:[#allocation27_spill]] }
  0xf7   : > { %s8959_s17 = scalar_select %p8433_p10, 1, 0 }
  0xf8   : > { %s559_s30 = scalar_lea.vmem [#allocation2], %s6166_s5  ;;  %p8443_p11 = pnand %p6980_p4, %p53_p2 }
  0xf9   : > { %s566_s2 = sshll.u32 %s559_s30, 4  ;;  %s8449_s0 = scalar_lea.sflag [#allocation3], %s555_s1  ;;  %s8447_s2 = int_to_ptr.vmem [resolvable:$true] %s566_s2 }
  0xfa   : > { %p7938_p8 = pneg %p8443_p11 }
  0xfc   : > { %s8441_s25 = scalar_lea.hbm %s8960_s20, %s6728_s15  ;;  %s7941_s15 = scalar_lea.hbm %s8960_s20, 1024 }
  0xfd   : > { %s7936_s19 = scalar_lea.hbm %s8441_s25, 512  ;;  %p7942_p13 = scmp.lt.u32.totalorder %s8441_s25, %s8960_s20 }
  0xfe   : > { %p7937_p12 = scmp.ne.s32.totalorder %s8441_s25, %s7936_s19  ;;  %p7943_p0 = scmp.lt.u32.totalorder %s7941_s15, %s7936_s19 }
  0xff   : > { %p7945_p5 = scmp.lt.u32.totalorder %s7936_s19, %s8441_s25 }
 0x100   : > { %p7939_p1 = pnand %p7938_p8, %p7937_p12  ;;  %p7944_p2 = por %p7943_p0, %p7942_p13 }
 0x102   : > { %p7940_p3 = pneg %p7939_p1  ;;  %p7946_p9 = por %p7945_p5, %p7944_p2 }
 0x104   : > { %p7947_p4 = pnand %p7946_p9, %p7940_p3 }
 0x106   : > { %7950 = shalt.err (!%p7947_p4)
}
 0x107   : > { %s7951_s1 = scalar_lea.vmem %s8447_s2, 512  ;;  %s8071_s30 = smov [#allocation2]  }
 0x108   : > { %p7952_p12 = scmp.ne.s32.totalorder %s8447_s2, %s7951_s1  ;;  %s7956_s9 = sshll.u32 %s8071_s30, 4  ;;  %s7957_s9 = int_to_ptr.vmem [resolvable:$false] %s7956_s9 }
 0x109   : > { %s7958_s5 = scalar_lea.vmem %s7957_s9, 1024  ;;  %p7959_p6 = scmp.lt.s32.totalorder %s8447_s2, %s7957_s9 }
 0x10a   : > { %p7954_p1 = pnand %p7952_p12, %p7938_p8  ;;  %p7960_p13 = scmp.lt.s32.totalorder %s7958_s5, %s7951_s1 }
 0x10c   : > { %p7955_p10 = pneg %p7954_p1  ;;  %p7961_p0 = por %p7960_p13, %p7959_p6 }
 0x10e   : > { %p7962_p2 = pnand %p7961_p0, %p7955_p10 }
 0x110   : > { %7965 = shalt.err (!%p7962_p2)
}
 0x111   : > { %s8962_s19 = smov 16   ;;  %s8963_s15 = smov 256  }
 0x112   : > { %6966 = dma.hbm_to_vmem [thread:$0]  (!%p8443_p11), %s8441_s25, 512, %s8447_s2, %s8449_s0, %s8963_s15, %s8963_s15, %s8962_s19  }
 0x113   : > { %p8964_p8 = scmp.ne.s32.totalorder %s8951_s28, 0 }
 0x114   : > { %s8483_s3 = sand.u32 (!%p8964_p8), 1, %s8044_s22  }
 0x115   : > { %586 = sbr.rel (%p8964_p8) target bundleno = 6688 (0x1a20), region = 84  ;;  %s6170_s16 = sshll.u32 (!%p8964_p8), %s8483_s3, 5 }
 0x116   : > { %s589_s1 = scalar_lea.sflag (!%p8964_p8), [#allocation3], %s8483_s3  ;;  %s8487_s30 = scalar_lea.vmem (!%p8964_p8), [#allocation2], %s6170_s16 }
 0x11c   : > { %8011 = dma.done.wait (%p8423_p7), %s589_s1, 512  }
 0x11d   : > { %8013 = vsyncadd (%p8423_p7), %s589_s1, 4294966784  ;;  %p8965_p6 = scmp.eq.s32.totalorder %s8183_s27, 0 }
 0x11f   : > { %8015 = dma.done.wait (%p8965_p6), [#allocation6], 16384   ;;  %p8966_p10 = pmov %p8965_p6 }
 0x120   : > { %p8967_p11 = pmov %p8965_p6 }
 0x121   : > { %8017 = vsyncadd (%p8966_p10), [#allocation6], 4294950912 }
 0x122   : > { %8019 = dma.done.wait (%p8967_p11), [#allocation9], 4128   ;;  %p8968_p3 = pmov %p8965_p6 }
 0x124   : > { %8021 = vsyncadd (%p8968_p3), [#allocation9], 4294963168  ;;  %p8969_p5 = pmov %p8968_p3 }
 0x125   : > { %p8970_p9 = pmov %p8968_p3 }
 0x126   : > { %8023 = dma.done.wait (%p8969_p5), [#allocation12], 12288  }
 0x127   : > { %8025 = vsyncadd (%p8970_p9), [#allocation12], 4294955008  ;;  %p8971_p7 = pmov %p8968_p3 }
 0x128   : > { %p8972_p4 = pmov %p8968_p3 }
 0x129   : > { %8027 = dma.done.wait (%p8971_p7), [#allocation15], 16512  }
 0x12a   : > { %8029 = vsyncadd (%p8972_p4), [#allocation15], 4294950784  ;;  %p8973_p12 = pmov %p8968_p3 }
 0x12b   : > { %p8974_p1 = pmov %p8968_p3 }
 0x12c   : > { %8031 = dma.done.wait (%p8973_p12), [#allocation18], 16384  }
 0x12d   : > { %8033 = vsyncadd (%p8974_p1), [#allocation18], 4294950912  ;;  %v7074_v0 = vld [vmem:[#allocation5 + $0xc] ss:$24 sps:$4 sm:$0xff]   ;;  %v7076_v1 = vld [vmem:[#allocation5 + $0x8] ss:$24 sps:$4 sm:$0xff]  }
 0x12e   : > { %1344 = vmatprep.subr.bf16.mxu1 %v7074_v0  ;;  %v7077_v2 = vld [vmem:[#allocation5 + $0x4] ss:$24 sps:$4 sm:$0xff]   ;;  %v7079_v3 = vld [vmem:[#allocation5] ss:$24 sps:$4 sm:$0xff]   ;;  %v7083_v6 = vld [vmem:[#allocation5 + $0x34] ss:$24 sps:$4 sm:$0xff]  }
 0x12f   : > { %1345 = vmatpush1.bf16.msra.mxu1 %v7076_v1  ;;  %v7080_v4 = vld [vmem:[#allocation5 + $0x3c] ss:$24 sps:$4 sm:$0xff]   ;;  %v7082_v5 = vld [vmem:[#allocation5 + $0x38] ss:$24 sps:$4 sm:$0xff]   ;;  %1303 = vmatprep.subr.bf16.mxu0 %v7077_v2  ;;  %v7086_v8 = vld [vmem:[#allocation5 + $0x6c] ss:$24 sps:$4 sm:$0xff]  }
 0x130   : > { %1304 = vmatpush1.bf16.msra.mxu0 %v7079_v3  ;;  %1346 = vmatprep.subr.bf16.mxu1 %v7080_v4  ;;  %v7085_v7 = vld [vmem:[#allocation5 + $0x30] ss:$24 sps:$4 sm:$0xff]   ;;  %v7089_v10 = vld [vmem:[#allocation5 + $0x64] ss:$24 sps:$4 sm:$0xff]   ;;  %v7091_v12 = vld [vmem:[#allocation5 + $0x60] ss:$24 sps:$4 sm:$0xff]  }
 0x131   : > { %1305 = vmatprep.subr.bf16.mxu0 %v7083_v6  ;;  %v7088_v9 = vld [vmem:[#allocation5 + $0x68] ss:$24 sps:$4 sm:$0xff]   ;;  %v7092_v11 = vld [vmem:[#allocation5 + $0x9c] ss:$24 sps:$4 sm:$0xff]   ;;  %v7094_v14 = vld [vmem:[#allocation5 + $0x98] ss:$24 sps:$4 sm:$0xff]  }
 0x132   : > { %v7095_v13 = vld [vmem:[#allocation5 + $0x94] ss:$24 sps:$4 sm:$0xff]   ;;  %v7097_v16 = vld [vmem:[#allocation5 + $0x90] ss:$24 sps:$4 sm:$0xff]   ;;  %v7101_v17 = vld [vmem:[#allocation5 + $0xc4] ss:$24 sps:$4 sm:$0xff]  }
 0x133   : > { %1347 = vmatpush1.bf16.msra.mxu1 %v7082_v5  ;;  %v7098_v15 = vld [vmem:[#allocation5 + $0xcc] ss:$24 sps:$4 sm:$0xff]   ;;  %v7100_v18 = vld [vmem:[#allocation5 + $0xc8] ss:$24 sps:$4 sm:$0xff]   ;;  %v7104_v19 = vld [vmem:[#allocation5 + $0xfc] ss:$24 sps:$4 sm:$0xff]   ;;  %v793_v5 = vlaneseq }
 0x134   : > { %1348 = vmatprep.subr.bf16.mxu1 %v7086_v8  ;;  %1306 = vmatpush1.bf16.msra.mxu0 %v7085_v7  ;;  %v7103_v20 = vld [vmem:[#allocation5 + $0xc0] ss:$24 sps:$4 sm:$0xff]   ;;  %v7107_v21 = vld [vmem:[#allocation5 + $0xf4] ss:$24 sps:$4 sm:$0xff]   ;;  %v7109_v24 = vld [vmem:[#allocation5 + $0xf0] ss:$24 sps:$4 sm:$0xff]  }
 0x135   : > { %1307 = vmatprep.subr.bf16.mxu0 %v7089_v10  ;;  %v7106_v22 = vld [vmem:[#allocation5 + $0xf8] ss:$24 sps:$4 sm:$0xff]   ;;  %v7110_v23 = vld [vmem:[#allocation5 + $0x12c] ss:$24 sps:$4 sm:$0xff]   ;;  %v7112_v26 = vld [vmem:[#allocation5 + $0x128] ss:$24 sps:$4 sm:$0xff]  }
 0x136   : > { %v7113_v25 = vld [vmem:[#allocation5 + $0x124] ss:$24 sps:$4 sm:$0xff]   ;;  %v7115_v28 = vld [vmem:[#allocation5 + $0x120] ss:$24 sps:$4 sm:$0xff]   ;;  %v7119_v29 = vld [vmem:[#allocation5 + $0x154] ss:$24 sps:$4 sm:$0xff]  }
 0x137   : > { %1349 = vmatpush1.bf16.msra.mxu1 %v7088_v9  ;;  %v7116_v27 = vld [vmem:[#allocation5 + $0x15c] ss:$24 sps:$4 sm:$0xff]   ;;  %v7118_v30 = vld [vmem:[#allocation5 + $0x158] ss:$24 sps:$4 sm:$0xff]   ;;  %v7122_v31 = vld [vmem:[#allocation5 + $0x18c] ss:$24 sps:$4 sm:$0xff]  }
 0x138   : > { %1350 = vmatprep.subr.bf16.mxu1 %v7092_v11  ;;  %1308 = vmatpush1.bf16.msra.mxu0 %v7091_v12  ;;  %p682_p13 = scmp.lt.s32.totalorder %s8183_s27, 1  ;;  %v7121_v32 = vld [vmem:[#allocation5 + $0x150] ss:$24 sps:$4 sm:$0xff]   ;;  %v7125_v33 = vld [vmem:[#allocation5 + $0x184] ss:$24 sps:$4 sm:$0xff]   ;;  %s8975_s18 = sld [smem:[#allocation28_spill]] }
 0x139   : > { %1309 = vmatprep.subr.bf16.mxu0 %v7095_v13  ;;  %v7124_v34 = vld [vmem:[#allocation5 + $0x188] ss:$24 sps:$4 sm:$0xff]   ;;  %v7128_v35 = vld [vmem:[#allocation5 + $0x1bc] ss:$24 sps:$4 sm:$0xff]   ;;  %v7130_v38 = vld [vmem:[#allocation5 + $0x1b8] ss:$24 sps:$4 sm:$0xff]  }
 0x13a   : > { %s683_s28 = scalar_select %p682_p13, %s8183_s27, 1  ;;  %v7127_v36 = vld [vmem:[#allocation5 + $0x180] ss:$24 sps:$4 sm:$0xff]   ;;  %v7131_v37 = vld [vmem:[#allocation5 + $0x1b4] ss:$24 sps:$4 sm:$0xff]   ;;  %v8072_v4 = vmov 0.0  }
 0x13b   : > { %1351 = vmatpush1.bf16.msra.mxu1 %v7094_v14  ;;  %v7134_v39 = vld [vmem:[#allocation5 + $0x1ec] ss:$24 sps:$4 sm:$0xff]   ;;  %v7133_v40 = vld [vmem:[#allocation5 + $0x1b0] ss:$24 sps:$4 sm:$0xff]   ;;  %v7140_v43 = vld [vmem:[#allocation5 + $0x21c] ss:$24 sps:$4 sm:$0xff]  }
 0x13c   : > { %1352 = vmatprep.subr.bf16.mxu1 %v7098_v15  ;;  %1310 = vmatpush1.bf16.msra.mxu0 %v7097_v16  ;;  %s6729_s11 = sshll.u32 %s683_s28, 4  ;;  %v7137_v41 = vld [vmem:[#allocation5 + $0x1e4] ss:$24 sps:$4 sm:$0xff]   ;;  %v7136_v42 = vld [vmem:[#allocation5 + $0x1e8] ss:$24 sps:$4 sm:$0xff]   ;;  %vm8073_vm0 = vmmov 0  }
 0x13d   : > { %1311 = vmatprep.subr.bf16.mxu0 %v7101_v17  ;;  %v7139_v44 = vld [vmem:[#allocation5 + $0x1e0] ss:$24 sps:$4 sm:$0xff]   ;;  %v7143_v46 = vld [vmem:[#allocation5 + $0x214] ss:$24 sps:$4 sm:$0xff]   ;;  %v7145_v48 = vld [vmem:[#allocation5 + $0x210] ss:$24 sps:$4 sm:$0xff]  }
 0x13e   : > { %s8518_s0 = scalar_lea.vmem %s8975_s18, %s6729_s11  ;;  %v7142_v45 = vld [vmem:[#allocation5 + $0x218] ss:$24 sps:$4 sm:$0xff]   ;;  %v7146_v49 = vld [vmem:[#allocation5 + $0x24c] ss:$24 sps:$4 sm:$0xff]   ;;  %v7148_v52 = vld [vmem:[#allocation5 + $0x248] ss:$24 sps:$4 sm:$0xff]  }
 0x13f   : > { %1353 = vmatpush1.bf16.msra.mxu1 %v7100_v18  ;;  %v692_v47 = vld [vmem:[%s8518_s0 + $0x8] sm:$0xff]  ;;  %v7155_v55 = vld [vmem:[#allocation5 + $0x274] ss:$24 sps:$4 sm:$0xff]   ;;  %v7157_v58 = vld [vmem:[#allocation5 + $0x270] ss:$24 sps:$4 sm:$0xff]   ;;  %v8530_v6 = vshrl.u32 %v793_v5, 7 }
 0x140   : > { %1354 = vmatprep.subr.bf16.mxu1 %v7104_v19  ;;  %1312 = vmatpush1.bf16.msra.mxu0 %v7103_v20  ;;  %v790_v50 = vpack.c.bf16 %v692_v47, %v692_v47  ;;  %v7149_v51 = vld [vmem:[#allocation5 + $0x244] ss:$24 sps:$4 sm:$0xff]   ;;  %v7151_v54 = vld [vmem:[#allocation5 + $0x240] ss:$24 sps:$4 sm:$0xff]   ;;  %v7167_v63 = vld [vmem:[#allocation5 + $0x2d4] ss:$24 sps:$4 sm:$0xff]  }
 0x141   : > { %1313 = vmatprep.subr.bf16.mxu0 %v7107_v21  ;;  %v7152_v53 = vld [vmem:[#allocation5 + $0x27c] ss:$24 sps:$4 sm:$0xff]   ;;  %v7154_v56 = vld [vmem:[#allocation5 + $0x278] ss:$24 sps:$4 sm:$0xff]   ;;  %v7158_v57 = vld [vmem:[#allocation5 + $0x2ac] ss:$24 sps:$4 sm:$0xff]  }
 0x142   : > { %1376 = vmatprep.mubr.bf16.mxu1 %v790_v50  ;;  %1335 = vmatprep.mubr.bf16.mxu0 %v790_v50  ;;  %v7161_v59 = vld [vmem:[#allocation5 + $0x2a4] ss:$24 sps:$4 sm:$0xff]   ;;  %v7160_v60 = vld [vmem:[#allocation5 + $0x2a8] ss:$24 sps:$4 sm:$0xff]   ;;  %v7166_v0 = vld [vmem:[#allocation5 + $0x2d8] ss:$24 sps:$4 sm:$0xff]  }
 0x143   : > { %1355 = vmatpush1.bf16.msra.mxu1 %v7106_v22  ;;  %v7164_v61 = vld [vmem:[#allocation5 + $0x2dc] ss:$24 sps:$4 sm:$0xff]   ;;  %v7163_v62 = vld [vmem:[#allocation5 + $0x2a0] ss:$24 sps:$4 sm:$0xff]   ;;  %v7169_v2 = vld [vmem:[#allocation5 + $0x2d0] ss:$24 sps:$4 sm:$0xff]  }
 0x144   : > { %1356 = vmatprep.subr.bf16.mxu1 %v7110_v23  ;;  %1314 = vmatpush1.bf16.msra.mxu0 %v7109_v24  ;;  %v691_v1 = vld [vmem:[%s8518_s0] sm:$0xff]  ;;  %v8533_v7 = vsub.s32 2, %v8530_v6  ;;  %s8976_s19 = sld [smem:[#allocation30_spill]]  ;;  %v8541_v9 = vsub.s32 0, %v8530_v6  ;;  %vm1426_vm1 = vcmask 523264   ;;  %s8074_s15 = smov 64  }
 0x145   : > { %1315 = vmatprep.subr.bf16.mxu0 %v7113_v25  ;;  %v8522_v3 = vpack.c.bf16 %v691_v1, %v691_v1  ;;  %v7170_v22 = vld [vmem:[#allocation5 + $0x10] ss:$24 sps:$4 sm:$0xff]   ;;  %v7172_v23 = vld [vmem:[#allocation5 + $0x14] ss:$24 sps:$4 sm:$0xff]   ;;  %v7175_v24 = vld [vmem:[#allocation5 + $0x44] ss:$24 sps:$4 sm:$0xff]  }
 0x146   : > { %v7173_v25 = vld [vmem:[#allocation5 + $0x40] ss:$24 sps:$4 sm:$0xff]   ;;  %v7206_v47 = vld [vmem:[#allocation5 + $0x250] ss:$24 sps:$4 sm:$0xff]   ;;  %vm1510_vm3 = vcmask 64512   ;;  %v811_v1 = vsub.s32 4, %v8530_v6  ;;  %vm8693_vm4 = vmpackc.low %vm1426_vm1, %vm1426_vm1 }
 0x147   : > { %1357 = vmatpush1.bf16.msra.mxu1 %v7112_v26  ;;  %v7178_v26 = vld [vmem:[#allocation5 + $0x74] ss:$24 sps:$4 sm:$0xff]   ;;  %s8980_s25 = sld [smem:[#allocation32_spill]]  ;;  %vm3173_vm5 = vcmask 130048   ;;  %s6730_s16 = sshll.u32 %s8183_s27, 8 }
 0x148   : > { %1358 = vmatprep.subr.bf16.mxu1 %v7116_v27  ;;  %1316 = vmatpush1.bf16.msra.mxu0 %v7115_v28  ;;  %v7176_v27 = vld [vmem:[#allocation5 + $0x70] ss:$24 sps:$4 sm:$0xff]   ;;  %v7181_v28 = vld [vmem:[#allocation5 + $0xa4] ss:$24 sps:$4 sm:$0xff]   ;;  %s5972_s27 = scalar_lea.sflag [#allocation4], %s8483_s3  ;;  %p8984_p2 = scmp.ne.s32.totalorder %s8958_s26, 0 }
 0x149   : > { %1317 = vmatprep.subr.bf16.mxu0 %v7119_v29  ;;  %v7179_v29 = vld [vmem:[#allocation5 + $0xa0] ss:$24 sps:$4 sm:$0xff]  }
 0x14a   : > { %v8538_v8 = vld [vmem:[%s8976_s19] sm:$0x3f]  ;;  %s8982_s19 = sld [smem:[#allocation35_spill]] }
 0x14b   : > { %1359 = vmatpush1.bf16.msra.mxu1 %v7118_v30  ;;  %v804_v10 = vrot.slane %v8538_v8, %v8533_v7  ;;  %v796_v11 = vrot.slane %v8538_v8, %v8541_v9  ;;  %v7184_v30 = vld [vmem:[#allocation5 + $0xd4] ss:$24 sps:$4 sm:$0xff]  }
 0x14c   : > { %1360 = vmatprep.subr.bf16.mxu1 %v7122_v31  ;;  %1318 = vmatpush1.bf16.msra.mxu0 %v7121_v32  ;;  %v7182_v31 = vld [vmem:[#allocation5 + $0xd0] ss:$24 sps:$4 sm:$0xff]   ;;  %v7187_v32 = vld [vmem:[#allocation5 + $0x104] ss:$24 sps:$4 sm:$0xff]  }
 0x14d   : > { %1319 = vmatprep.subr.bf16.mxu0 %v7125_v33  ;;  %v7185_v33 = vld [vmem:[#allocation5 + $0x100] ss:$24 sps:$4 sm:$0xff]  }
 0x14f   : > { %1361 = vmatpush1.bf16.msra.mxu1 %v7124_v34  ;;  %v7190_v34 = vld [vmem:[#allocation5 + $0x134] ss:$24 sps:$4 sm:$0xff]  }
 0x150   : > { %1362 = vmatprep.subr.bf16.mxu1 %v7128_v35  ;;  %1320 = vmatpush1.bf16.msra.mxu0 %v7127_v36  ;;  %v7188_v35 = vld [vmem:[#allocation5 + $0x130] ss:$24 sps:$4 sm:$0xff]   ;;  %v7193_v36 = vld [vmem:[#allocation5 + $0x164] ss:$24 sps:$4 sm:$0xff]  }
 0x151   : > { %1321 = vmatprep.subr.bf16.mxu0 %v7131_v37  ;;  %v7191_v37 = vld [vmem:[#allocation5 + $0x160] ss:$24 sps:$4 sm:$0xff]  }
 0x153   : > { %1363 = vmatpush1.bf16.msra.mxu1 %v7130_v38  ;;  %v7196_v38 = vld [vmem:[#allocation5 + $0x194] ss:$24 sps:$4 sm:$0xff]  }
 0x154   : > { %1364 = vmatprep.subr.bf16.mxu1 %v7134_v39  ;;  %1322 = vmatpush1.bf16.msra.mxu0 %v7133_v40  ;;  %v7194_v39 = vld [vmem:[#allocation5 + $0x190] ss:$24 sps:$4 sm:$0xff]   ;;  %v7199_v40 = vld [vmem:[#allocation5 + $0x1c4] ss:$24 sps:$4 sm:$0xff]  }
 0x155   : > { %1323 = vmatprep.subr.bf16.mxu0 %v7137_v41  ;;  %v7197_v41 = vld [vmem:[#allocation5 + $0x1c0] ss:$24 sps:$4 sm:$0xff]  }
 0x157   : > { %1365 = vmatpush1.bf16.msra.mxu1 %v7136_v42  ;;  %v7202_v42 = vld [vmem:[#allocation5 + $0x1f4] ss:$24 sps:$4 sm:$0xff]  }
 0x158   : > { %1366 = vmatprep.subr.bf16.mxu1 %v7140_v43  ;;  %1324 = vmatpush1.bf16.msra.mxu0 %v7139_v44  ;;  %v7200_v43 = vld [vmem:[#allocation5 + $0x1f0] ss:$24 sps:$4 sm:$0xff]   ;;  %v7205_v44 = vld [vmem:[#allocation5 + $0x224] ss:$24 sps:$4 sm:$0xff]  }
 0x159   : > { %1325 = vmatprep.subr.bf16.mxu0 %v7143_v46  ;;  %v7208_v46 = vld [vmem:[#allocation5 + $0x254] ss:$24 sps:$4 sm:$0xff]  }
 0x15b   : > { %1367 = vmatpush1.bf16.msra.mxu1 %v7142_v45  ;;  %v7203_v45 = vld [vmem:[#allocation5 + $0x220] ss:$24 sps:$4 sm:$0xff]  }
 0x15c   : > { %1368 = vmatprep.subr.bf16.mxu1 %v7146_v49  ;;  %1326 = vmatpush1.bf16.msra.mxu0 %v7145_v48  ;;  %v7211_v48 = vld [vmem:[#allocation5 + $0x284] ss:$24 sps:$4 sm:$0xff]   ;;  %v7209_v49 = vld [vmem:[#allocation5 + $0x280] ss:$24 sps:$4 sm:$0xff]  }
 0x15d   : > { %1327 = vmatprep.subr.bf16.mxu0 %v7149_v51  ;;  %v7212_v51 = vld [vmem:[#allocation5 + $0x2b0] ss:$24 sps:$4 sm:$0xff]  }
 0x15f   : > { %1369 = vmatpush1.bf16.msra.mxu1 %v7148_v52  ;;  %v7217_v52 = vld [vmem:[#allocation5 + $0x2e4] ss:$24 sps:$4 sm:$0xff]  }
 0x160   : > { %1370 = vmatprep.subr.bf16.mxu1 %v7152_v53  ;;  %1328 = vmatpush1.bf16.msra.mxu0 %v7151_v54  ;;  %v7215_v53 = vld [vmem:[#allocation5 + $0x2e0] ss:$24 sps:$4 sm:$0xff]   ;;  %v8560_v54 = vand.u32 127, %v793_v5 }
 0x161   : > { %1329 = vmatprep.subr.bf16.mxu0 %v7155_v55 }
 0x162   : > { %vm1508_vm2 = vcmp.gt.s32.totalorder %v8560_v54, %v8530_v6 }
 0x163   : > { %1371 = vmatpush1.bf16.msra.mxu1 %v7154_v56 }
 0x164   : > { %1372 = vmatprep.subr.bf16.mxu1 %v7158_v57  ;;  %1330 = vmatpush1.bf16.msra.mxu0 %v7157_v58 }
 0x165   : > { %1331 = vmatprep.subr.bf16.mxu0 %v7161_v59 }
 0x167   : > { %1373 = vmatpush1.bf16.msra.mxu1 %v7160_v60 }
 0x168   : > { %1374 = vmatprep.subr.bf16.mxu1 %v7164_v61  ;;  %1332 = vmatpush1.bf16.msra.mxu0 %v7163_v62 }
 0x169   : > { %1333 = vmatprep.subr.bf16.mxu0 %v7167_v63 }
 0x16b   : > { %1375 = vmatpush1.bf16.msra.mxu1 %v7166_v0 }
 0x16c   : > { %1334 = vmatpush1.bf16.msra.mxu0 %v7169_v2  ;;  %6771 = vmatprep.subr.mxu1 %v8072_v4 }
 0x16d   : > { %1385 = vmatprep.subr.bf16.mxu0 %v7172_v23 }
 0x16e   : > { %1377 = vmatmul.mubr.bf16.vlgmr.msra.gmra.mrb[0].mxu1 %v8522_v3 }
 0x16f   : > { %1336 = vmatmul.mubr.bf16.vlgmr.msra.gmra.mrb[0].mxu0 %v8522_v3  ;;  %6773 = vmatprep.mubr.msk.f32.mxu1 %vm8073_vm0, %v8072_v4 }
 0x170   : > { %1417 = vmatprep.mubr.bf16.mxu0 %v790_v50  ;;  %1386 = vmatpush1.bf16.msra.mxu0 %v7170_v22  ;;  %v7214_v50 = vld [vmem:[#allocation5 + $0x2b4] ss:$24 sps:$4 sm:$0xff]  }
 0x171   : > { %1387 = vmatprep.subr.bf16.mxu0 %v7175_v24 }
 0x174   : > { %1388 = vmatpush1.bf16.msra.mxu0 %v7173_v25 }
 0x175   : > { %1389 = vmatprep.subr.bf16.mxu0 %v7178_v26 }
 0x178   : > { %1390 = vmatpush1.bf16.msra.mxu0 %v7176_v27 }
 0x179   : > { %1391 = vmatprep.subr.bf16.mxu0 %v7181_v28 }
 0x17c   : > { %1392 = vmatpush1.bf16.msra.mxu0 %v7179_v29 }
 0x17d   : > { %1393 = vmatprep.subr.bf16.mxu0 %v7184_v30 }
 0x180   : > { %1394 = vmatpush1.bf16.msra.mxu0 %v7182_v31 }
 0x181   : > { %1395 = vmatprep.subr.bf16.mxu0 %v7187_v32 }
 0x184   : > { %1396 = vmatpush1.bf16.msra.mxu0 %v7185_v33 }
 0x185   : > { %1397 = vmatprep.subr.bf16.mxu0 %v7190_v34  ;;  %v8592_v34 = vsub.s32 3, %v8530_v6 }
 0x188   : > { %1398 = vmatpush1.bf16.msra.mxu0 %v7188_v35  ;;  %v8595_v35 = vsub.s32 1, %v8530_v6 }
 0x189   : > { %1399 = vmatprep.subr.bf16.mxu0 %v7193_v36  ;;  %v808_v36 = vrot.slane %v8538_v8, %v8592_v34 }
 0x18c   : > { %1400 = vmatpush1.bf16.msra.mxu0 %v7191_v37  ;;  %v815_v37 = vsub.s32 5, %v8530_v6 }
 0x18d   : > { %1401 = vmatprep.subr.bf16.mxu0 %v7196_v38 }
 0x190   : > { %1402 = vmatpush1.bf16.msra.mxu0 %v7194_v39  ;;  %v800_v39 = vrot.slane %v8538_v8, %v8595_v35 }
 0x191   : > { %1403 = vmatprep.subr.bf16.mxu0 %v7199_v40 }
 0x194   : > { %1404 = vmatpush1.bf16.msra.mxu0 %v7197_v41 }
 0x195   : > { %1405 = vmatprep.subr.bf16.mxu0 %v7202_v42  ;;  %v816_v42 = vrot.slane %v8538_v8, %v815_v37 }
 0x198   : > { %1406 = vmatpush1.bf16.msra.mxu0 %v7200_v43 }
 0x199   : > { %1407 = vmatprep.subr.bf16.mxu0 %v7205_v44 }
 0x19c   : > { %1408 = vmatpush1.bf16.msra.mxu0 %v7203_v45 }
 0x19d   : > { %1409 = vmatprep.subr.bf16.mxu0 %v7208_v46 }
 0x1a0   : > { %1410 = vmatpush1.bf16.msra.mxu0 %v7206_v47 }
 0x1a1   : > { %1411 = vmatprep.subr.bf16.mxu0 %v7211_v48 }
 0x1a4   : > { %1412 = vmatpush1.bf16.msra.mxu0 %v7209_v49 }
 0x1a5   : > { %1413 = vmatprep.subr.bf16.mxu0 %v7214_v50 }
 0x1a8   : > { %1414 = vmatpush1.bf16.msra.mxu0 %v7212_v51 }
 0x1a9   : > { %1415 = vmatprep.subr.bf16.mxu0 %v7217_v52 }
 0x1ac   : > { %1416 = vmatpush1.bf16.msra.mxu0 %v7215_v53 }
 0x1af   : > { %1418 = vmatmul.mubr.bf16.vlgmr.msra.gmra.mrb[4].mxu0 %v8522_v3  ;;  %v812_v3 = vrot.slane %v8538_v8, %v811_v1 }
 0x241   : > { %v1378_v12 = vpop.f32.mrb[0].mxu1 }
 0x242   : > { %v1379_v13 = vadd.f32 %v1378_v12, %v804_v10  ;;  %v8547_v14 = vpop.f32.mrb[1].mxu1  ;;  %v1337_v16 = vpop.f32.mrb[0].mxu0 }
 0x243   : > { %v1382_v15 = vpop.f32.mrb[2].mxu1  ;;  %v1338_v18 = vadd.f32 %v1337_v16, %v796_v11  ;;  %v8551_v19 = vpop.f32.mrb[1].mxu0  ;;  %v1381_v41 = vadd.f32 %v8547_v14, %v808_v36  ;;  %v7241_v36 = vld [vmem:[#allocation7 + $0x74] ss:$8 sps:$4 sm:$0xff]  }
 0x244   : > { %v1383_v17 = vpop.f32.mrb[3].mxu1  ;;  %1597 = vrot.lane.b32.xlu1 %v1379_v13, %s8074_s15  ;;  %6772 = vmatpush3.xpose.msk.msra.mxu1 %vm1426_vm1, %v1379_v13  ;;  %v1341_v20 = vpop.f32.mrb[2].mxu0  ;;  %v1340_v43 = vadd.f32 %v8551_v19, %v800_v39  ;;  %v7244_v39 = vld [vmem:[#allocation7 + $0x84] ss:$8 sps:$4 sm:$0xff]  }
 0x245   : > { %6776 = vmatprep.subr.mxu1 %v8072_v4  ;;  %v1342_v21 = vpop.f32.mrb[3].mxu0 }
 0x247   : > { %6774 = vmatmul.mubr.msk.f32.vlgmr.msra.gmra.mrb[4].mxu1 %vm1426_vm1, %v1338_v18 }
 0x248   : > { %1595 = vrot.lane.b32.xlu1 %v1338_v18, %s8074_s15  ;;  %6778 = vmatprep.mubr.msk.f32.mxu1 %vm8073_vm0, %v8072_v4 }
 0x282   : > { %v1419_v2 = vpop.f32.mrb[4].mxu0 }
 0x283   : > { %v1421_v5 = vpop.f32.mrb[5].mxu0  ;;  %v1420_v11 = vadd.f32 %v1419_v2, %v812_v3 }
 0x284   : > { %v1423_v10 = vpop.f32.mrb[6].mxu0  ;;  %v1422_v44 = vadd.f32 %v1421_v5, %v816_v42  ;;  %v7245_v42 = vld [vmem:[#allocation7 + $0x90] ss:$8 sps:$4 sm:$0xff]  }
 0x285   : > { %v1424_v12 = vpop.f32.mrb[7].mxu0  ;;  %6777 = vmatpush3.msra.mxu1 %v1420_v11 }
 0x286   : > { %6781 = vmatprep.subr.mxu1 %v8072_v4 }
 0x2b6   : > { %v1598_v16 = vpop.permute.xlu1 %1597 }
 0x2ba   : > { %v1596_v18 = vpop.permute.xlu1 %1595 }
 0x31a   : > { %v1499_v55 = vpop.f32.mrb[4].mxu1 }
 0x31b   : > { %v1503_v56 = vmul.f32 0.125, %v1499_v55  ;;  %v6775_v57 = vpop.f32.mrb[5].mxu1 }
 0x31d   : > { %v1509_v58 = vsel %vm1508_vm2, -1e+30, %v1503_v56 }
 0x31e   : > { %v1511_v59 = vsel %vm1510_vm3, %v1509_v58, -inf }
 0x31f   : > { %1512 = vmax.xlane.f32.xlu0 %v1511_v59 }
 0x3ac   : > { %v1513_v60 = vpop.xlane.xlu0 %1512 }
 0x3ad   : > { %v1514_v61 = vsub.f32 %v1509_v58, %v1513_v60 }
 0x3af   : > { %v1515_v62 = vmul.f32 1.442695, %v1514_v61 }
 0x3b1   : > { %7650 = vpow2.f32 %v1515_v62 }
 0x3bb   : > { %v7651_v63 = vpop.eup %7650 }
 0x3bc   : > { %v1517_v0 = vsel %vm1510_vm3, %v7651_v63, 0.0 }
 0x3bd   : > { %1518 = vadd.xlane.f32.xlu0 %v1517_v0 }
 0x44a   : > { %v1519_v13 = vpop.xlane.xlu0 %1518 }
 0x44b   : > { %7652 = vrcp.f32 %v1519_v13 }
 0x455   : > { %v7653_v15 = vpop.eup %7652 }
 0x456   : > { %v1521_v17 = vmul.f32 %v7653_v15, %v7651_v63 }
 0x458   : > { %6779 = vmatmul.mubr.msk.f32.vlgmr.msra.gmra.mrb[6].mxu1 %vm1510_vm3, %v1521_v17 }
 0x459   : > { %6782 = vmatpush3.xpose.msk.msra.mxu1 %vm1426_vm1, %v1598_v16  ;;  %6783 = vmatprep.mubr.msk.f32.mxu1 %vm8073_vm0, %v8072_v4 }
 0x45a   : > { %6786 = vmatprep.subr.mxu1 %v8072_v4 }
 0x45c   : > { %6784 = vmatmul.mubr.msk.f32.vlgmr.msra.gmra.mrb[8].mxu1 %vm1426_vm1, %v1596_v18  ;;  %v7218_v18 = vld [vmem:[#allocation7] ss:$8 sps:$4 sm:$0xff]  }
 0x45d   : > { %6788 = vmatprep.mubr.msk.f32.mxu1 %vm8073_vm0, %v8072_v4 }
 0x52b   : > { %v8582_v20 = vpop.f32.mrb[6].mxu1 }
 0x52c   : > { %v6780_v21 = vpop.f32.mrb[7].mxu1 }
 0x52d   : > { %v7220_v21 = vld [vmem:[#allocation7 + $0x4] ss:$8 sps:$4 sm:$0xff]  }
 0x52f   : > { %v1669_v22 = vpop.f32.mrb[8].mxu1 }
 0x530   : > { %v1673_v23 = vmul.f32 0.125, %v1669_v22  ;;  %v6785_v24 = vpop.f32.mrb[9].mxu1  ;;  %v7223_v22 = vld [vmem:[#allocation7 + $0x14] ss:$8 sps:$4 sm:$0xff]  }
 0x531   : > { %v7226_v24 = vld [vmem:[#allocation7 + $0x24] ss:$8 sps:$4 sm:$0xff]  }
 0x532   : > { %v1674_v25 = vsel %vm1508_vm2, -1e+30, %v1673_v23  ;;  %v7221_v23 = vld [vmem:[#allocation7 + $0x10] ss:$8 sps:$4 sm:$0xff]  }
 0x533   : > { %v1675_v26 = vsel %vm1510_vm3, %v1674_v25, -inf }
 0x534   : > { %1676 = vmax.xlane.f32.xlu0 %v1675_v26  ;;  %v7229_v26 = vld [vmem:[#allocation7 + $0x34] ss:$8 sps:$4 sm:$0xff]  }
 0x54a   : > { %1687 = vrot.lane.b32.xlu0 %v1420_v11, %s8074_s15 }
 0x5c1   : > { %v1677_v27 = vpop.xlane.xlu0 %1676 }
 0x5c2   : > { %v1678_v28 = vsub.f32 %v1674_v25, %v1677_v27  ;;  %v7224_v25 = vld [vmem:[#allocation7 + $0x20] ss:$8 sps:$4 sm:$0xff]   ;;  %v7227_v27 = vld [vmem:[#allocation7 + $0x30] ss:$8 sps:$4 sm:$0xff]  }
 0x5c4   : > { %v1679_v29 = vmul.f32 1.442695, %v1678_v28  ;;  %v7232_v28 = vld [vmem:[#allocation7 + $0x44] ss:$8 sps:$4 sm:$0xff]  }
 0x5c5   : > { %v1688_v30 = vpop.permute.xlu0 %1687 }
 0x5c6   : > { %7654 = vpow2.f32 %v1679_v29  ;;  %6787 = vmatpush3.msra.mxu1 %v1688_v30  ;;  %v7230_v29 = vld [vmem:[#allocation7 + $0x40] ss:$8 sps:$4 sm:$0xff]   ;;  %v7235_v30 = vld [vmem:[#allocation7 + $0x54] ss:$8 sps:$4 sm:$0xff]  }
 0x5c7   : > { %6791 = vmatprep.subr.mxu1 %v8072_v4 }
 0x5d0   : > { %v7655_v31 = vpop.eup %7654 }
 0x5d1   : > { %v1681_v32 = vsel %vm1510_vm3, %v7655_v31, 0.0 }
 0x5d2   : > { %1682 = vadd.xlane.f32.xlu1 %v1681_v32  ;;  %v7238_v32 = vld [vmem:[#allocation7 + $0x64] ss:$8 sps:$4 sm:$0xff]  }
 0x65f   : > { %v1683_v33 = vpop.xlane.xlu1 %1682 }
 0x660   : > { %7656 = vrcp.f32 %v1683_v33  ;;  %v7236_v33 = vld [vmem:[#allocation7 + $0x60] ss:$8 sps:$4 sm:$0xff]  }
 0x66a   : > { %v7657_v38 = vpop.eup %7656 }
 0x66b   : > { %v1685_v40 = vmul.f32 %v7657_v38, %v7655_v31  ;;  %v7233_v31 = vld [vmem:[#allocation7 + $0x50] ss:$8 sps:$4 sm:$0xff]  }
 0x66c   : > { %v7239_v38 = vld [vmem:[#allocation7 + $0x70] ss:$8 sps:$4 sm:$0xff]  }
 0x66d   : > { %6789 = vmatmul.mubr.msk.f32.vlgmr.msra.gmra.mrb[10].mxu1 %vm1510_vm3, %v1685_v40  ;;  %v7242_v40 = vld [vmem:[#allocation7 + $0x80] ss:$8 sps:$4 sm:$0xff]  }
 0x66e   : > { %6792 = vmatpush3.xpose.msk.msra.mxu1 %vm1426_vm1, %v1381_v41  ;;  %6793 = vmatprep.mubr.msk.f32.mxu1 %vm8073_vm0, %v8072_v4 }
 0x66f   : > { %6796 = vmatprep.subr.mxu1 %v8072_v4 }
 0x671   : > { %6794 = vmatmul.mubr.msk.f32.vlgmr.msra.gmra.mrb[12].mxu1 %vm1426_vm1, %v1340_v43 }
 0x672   : > { %6797 = vmatpush3.msra.mxu1 %v1422_v44  ;;  %6798 = vmatprep.mubr.msk.f32.mxu1 %vm8073_vm0, %v8072_v4 }
 0x673   : > { %6801 = vmatprep.subr.mxu1 %v8072_v4 }
 0x740   : > { %v8616_v8 = vpop.f32.mrb[10].mxu1 }
 0x741   : > { %v6790_v14 = vpop.f32.mrb[11].mxu1 }
 0x742   : > { %v7253_v14 = vld [vmem:[#allocation7 + $0xb4] ss:$8 sps:$4 sm:$0xff]  }
 0x744   : > { %v1835_v45 = vpop.f32.mrb[12].mxu1 }
 0x745   : > { %v1839_v46 = vmul.f32 0.125, %v1835_v45  ;;  %v6795_v47 = vpop.f32.mrb[13].mxu1  ;;  %v7251_v45 = vld [vmem:[#allocation7 + $0xb0] ss:$8 sps:$4 sm:$0xff]  }
 0x746   : > { %v7254_v47 = vld [vmem:[#allocation7 + $0xc0] ss:$8 sps:$4 sm:$0xff]  }
 0x747   : > { %v1840_v19 = vsel %vm1508_vm2, -1e+30, %v1839_v46  ;;  %v7256_v46 = vld [vmem:[#allocation7 + $0xc4] ss:$8 sps:$4 sm:$0xff]  }
 0x748   : > { %v1841_v48 = vsel %vm1510_vm3, %v1840_v19, -inf }
 0x749   : > { %1842 = vmax.xlane.f32.xlu0 %v1841_v48  ;;  %v7257_v48 = vld [vmem:[#allocation7 + $0xd0] ss:$8 sps:$4 sm:$0xff]  }
 0x75f   : > { %1925 = vrot.lane.b32.xlu0 %v1340_v43, %s8074_s15  ;;  %v7250_v43 = vld [vmem:[#allocation7 + $0xa4] ss:$8 sps:$4 sm:$0xff]  }
 0x7d6   : > { %v1843_v49 = vpop.xlane.xlu0 %1842 }
 0x7d7   : > { %v1844_v50 = vsub.f32 %v1840_v19, %v1843_v49  ;;  %v7259_v19 = vld [vmem:[#allocation7 + $0xd4] ss:$8 sps:$4 sm:$0xff]   ;;  %v7262_v49 = vld [vmem:[#allocation7 + $0xe4] ss:$8 sps:$4 sm:$0xff]  }
 0x7d9   : > { %v1845_v51 = vmul.f32 1.442695, %v1844_v50  ;;  %v7260_v50 = vld [vmem:[#allocation7 + $0xe0] ss:$8 sps:$4 sm:$0xff]  }
 0x7da   : > { %v1926_v59 = vpop.permute.xlu0 %1925 }
 0x7db   : > { %7658 = vpow2.f32 %v1845_v51  ;;  %v7265_v51 = vld [vmem:[#allocation7 + $0xf4] ss:$8 sps:$4 sm:$0xff]  }
 0x7e5   : > { %v7659_v52 = vpop.eup %7658 }
 0x7e6   : > { %v1847_v53 = vsel %vm1510_vm3, %v7659_v52, 0.0 }
 0x7e7   : > { %1848 = vadd.xlane.f32.xlu1 %v1847_v53  ;;  %v7268_v53 = vld [vmem:[#allocation11 + $0x4] ss:$16 sps:$4 sm:$0xff]  }
 0x7f8   : > { %1927 = vrot.lane.b32.xlu1 %v1381_v41, %s8074_s15  ;;  %v7247_v41 = vld [vmem:[#allocation7 + $0x94] ss:$8 sps:$4 sm:$0xff]  }
 0x874   : > { %v1849_v55 = vpop.xlane.xlu1 %1848 }
 0x875   : > { %7660 = vrcp.f32 %v1849_v55 }
 0x878   : > { %v1928_v58 = vpop.permute.xlu1 %1927 }
 0x87f   : > { %v7661_v56 = vpop.eup %7660 }
 0x880   : > { %v1851_v57 = vmul.f32 %v7661_v56, %v7659_v52  ;;  %v7263_v52 = vld [vmem:[#allocation7 + $0xf0] ss:$8 sps:$4 sm:$0xff]  }
 0x882   : > { %6799 = vmatmul.mubr.msk.f32.vlgmr.msra.gmra.mrb[14].mxu1 %vm1510_vm3, %v1851_v57 }
 0x883   : > { %6802 = vmatpush3.xpose.msk.msra.mxu1 %vm1426_vm1, %v1928_v58  ;;  %6803 = vmatprep.mubr.msk.f32.mxu1 %vm8073_vm0, %v8072_v4  ;;  %v7275_v58 = vld [vmem:[#allocation10] ss:$8 sps:$4 sm:$0xff]  }
 0x884   : > { %6806 = vmatprep.subr.mxu1 %v8072_v4 }
 0x886   : > { %6804 = vmatmul.mubr.msk.f32.vlgmr.msra.gmra.mrb[16].mxu1 %vm1426_vm1, %v1926_v59  ;;  %v7277_v59 = vld [vmem:[#allocation10 + $0x4] ss:$8 sps:$4 sm:$0xff]  }
 0x887   : > { %6808 = vmatprep.mubr.msk.f32.mxu1 %vm8073_vm0, %v8072_v4  ;;  %2558 = vmatprep.subr.bf16.mxu0 %v7277_v59  ;;  %v7322_v59 = vld [vmem:[#allocation11 + $0x144] ss:$16 sps:$4 sm:$0xff]  }
 0x888   : > { %2559 = vmatpush1.bf16.msra.mxu0 %v7275_v58  ;;  %v7314_v58 = vld [vmem:[#allocation11 + $0x120] ss:$16 sps:$4 sm:$0xff]  }
 0x955   : > { %v8633_v60 = vpop.f32.mrb[14].mxu1 }
 0x956   : > { %v6800_v61 = vpop.f32.mrb[15].mxu1 }
 0x957   : > { %v7281_v61 = vld [vmem:[#allocation10 + $0x10] ss:$8 sps:$4 sm:$0xff]  }
 0x959   : > { %v1999_v62 = vpop.f32.mrb[16].mxu1 }
 0x95a   : > { %v2003_v63 = vmul.f32 0.125, %v1999_v62  ;;  %v6805_v0 = vpop.f32.mrb[17].mxu1  ;;  %v7283_v62 = vld [vmem:[#allocation10 + $0x14] ss:$8 sps:$4 sm:$0xff]  }
 0x95b   : > { %2560 = vmatprep.subr.bf16.mxu0 %v7283_v62  ;;  %v7289_v0 = vld [vmem:[#allocation10 + $0x24] ss:$8 sps:$4 sm:$0xff]  }
 0x95c   : > { %v2004_v2 = vsel %vm1508_vm2, -1e+30, %v2003_v63  ;;  %2561 = vmatpush1.bf16.msra.mxu0 %v7281_v61  ;;  %v7287_v63 = vld [vmem:[#allocation10 + $0x20] ss:$8 sps:$4 sm:$0xff]   ;;  %v7328_v62 = vld [vmem:[#allocation11 + $0x164] ss:$16 sps:$4 sm:$0xff]  }
 0x95d   : > { %v2005_v3 = vsel %vm1510_vm3, %v2004_v2, -inf  ;;  %2562 = vmatprep.subr.bf16.mxu0 %v7289_v0  ;;  %v7320_v61 = vld [vmem:[#allocation11 + $0x140] ss:$16 sps:$4 sm:$0xff]   ;;  %v7334_v0 = vld [vmem:[#allocation11 + $0x184] ss:$16 sps:$4 sm:$0xff]  }
 0x95e   : > { %2006 = vmax.xlane.f32.xlu1 %v2005_v3  ;;  %v7295_v3 = vld [vmem:[#allocation10 + $0x34] ss:$8 sps:$4 sm:$0xff]  }
 0x960   : > { %2563 = vmatpush1.bf16.msra.mxu0 %v7287_v63  ;;  %v7326_v63 = vld [vmem:[#allocation11 + $0x160] ss:$16 sps:$4 sm:$0xff]  }
 0x961   : > { %2564 = vmatprep.subr.bf16.mxu0 %v7295_v3  ;;  %v7340_v3 = vld [vmem:[#allocation11 + $0x1a4] ss:$16 sps:$4 sm:$0xff]  }
 0x96f   : > { %2017 = vrot.lane.b32.xlu1 %v1422_v44, %s8074_s15  ;;  %v7248_v44 = vld [vmem:[#allocation7 + $0xa0] ss:$8 sps:$4 sm:$0xff]  }
 0x9eb   : > { %v2007_v5 = vpop.xlane.xlu1 %2006 }
 0x9ec   : > { %v2008_v10 = vsub.f32 %v2004_v2, %v2007_v5  ;;  %v7293_v2 = vld [vmem:[#allocation10 + $0x30] ss:$8 sps:$4 sm:$0xff]   ;;  %v7301_v5 = vld [vmem:[#allocation10 + $0x44] ss:$8 sps:$4 sm:$0xff]  }
 0x9ed   : > { %2565 = vmatpush1.bf16.msra.mxu0 %v7293_v2  ;;  %v7332_v2 = vld [vmem:[#allocation11 + $0x180] ss:$16 sps:$4 sm:$0xff]  }
 0x9ee   : > { %v2009_v11 = vmul.f32 1.442695, %v2008_v10  ;;  %2566 = vmatprep.subr.bf16.mxu0 %v7301_v5  ;;  %v7305_v10 = vld [vmem:[#allocation10 + $0x50] ss:$8 sps:$4 sm:$0xff]   ;;  %v7346_v5 = vld [vmem:[#allocation11 + $0x1c4] ss:$16 sps:$4 sm:$0xff]  }
 0x9ef   : > { %v2018_v12 = vpop.permute.xlu1 %2017 }
 0x9f0   : > { %7662 = vpow2.f32 %v2009_v11  ;;  %6807 = vmatpush3.msra.mxu1 %v2018_v12  ;;  %v7307_v11 = vld [vmem:[#allocation10 + $0x54] ss:$8 sps:$4 sm:$0xff]   ;;  %v7311_v12 = vld [vmem:[#allocation10 + $0x60] ss:$8 sps:$4 sm:$0xff]  }
 0x9f1   : > { %2309 = vmatprep.subr.bf16.mxu1 %v7220_v21  ;;  %v7331_v21 = vld [vmem:[#allocation10 + $0x94] ss:$8 sps:$4 sm:$0xff]  }
 0x9fa   : > { %v7663_v13 = vpop.eup %7662 }
 0x9fb   : > { %v2011_v15 = vsel %vm1510_vm3, %v7663_v13, 0.0 }
 0x9fc   : > { %2012 = vadd.xlane.f32.xlu0 %v2011_v15  ;;  %v7317_v15 = vld [vmem:[#allocation10 + $0x70] ss:$8 sps:$4 sm:$0xff]  }
 0xa89   : > { %v2013_v16 = vpop.xlane.xlu0 %2012 }
 0xa8a   : > { %7664 = vrcp.f32 %v2013_v16  ;;  %v7319_v16 = vld [vmem:[#allocation10 + $0x74] ss:$8 sps:$4 sm:$0xff]  }
 0xa94   : > { %v7665_v17 = vpop.eup %7664 }
 0xa95   : > { %v2015_v54 = vmul.f32 %v7665_v17, %v7663_v13  ;;  %v7313_v13 = vld [vmem:[#allocation10 + $0x64] ss:$8 sps:$4 sm:$0xff]   ;;  %v7323_v17 = vld [vmem:[#allocation10 + $0x80] ss:$8 sps:$4 sm:$0xff]  }
 0xa97   : > { %6809 = vmatmul.mubr.msk.f32.vlgmr.msra.gmra.mrb[18].mxu1 %vm1510_vm3, %v2015_v54  ;;  %v7325_v54 = vld [vmem:[#allocation10 + $0x84] ss:$8 sps:$4 sm:$0xff]  }
 0xa98   : > { %2310 = vmatpush1.bf16.msra.mxu1 %v7218_v18  ;;  %v7329_v18 = vld [vmem:[#allocation10 + $0x90] ss:$8 sps:$4 sm:$0xff]  }
 0xa99   : > { %2311 = vmatprep.subr.bf16.mxu1 %v7223_v22  ;;  %v7335_v22 = vld [vmem:[#allocation10 + $0xa0] ss:$8 sps:$4 sm:$0xff]  }
 0xa9c   : > { %2312 = vmatpush1.bf16.msra.mxu1 %v7221_v23  ;;  %v7337_v23 = vld [vmem:[#allocation10 + $0xa4] ss:$8 sps:$4 sm:$0xff]  }
 0xa9d   : > { %2313 = vmatprep.subr.bf16.mxu1 %v7226_v24  ;;  %v7341_v24 = vld [vmem:[#allocation10 + $0xb0] ss:$8 sps:$4 sm:$0xff]  }
 0xaa0   : > { %2314 = vmatpush1.bf16.msra.mxu1 %v7224_v25  ;;  %v7343_v25 = vld [vmem:[#allocation10 + $0xb4] ss:$8 sps:$4 sm:$0xff]  }
 0xaa1   : > { %2315 = vmatprep.subr.bf16.mxu1 %v7229_v26  ;;  %v7347_v26 = vld [vmem:[#allocation10 + $0xc0] ss:$8 sps:$4 sm:$0xff]  }
 0xaa4   : > { %2316 = vmatpush1.bf16.msra.mxu1 %v7227_v27  ;;  %v7349_v27 = vld [vmem:[#allocation10 + $0xc4] ss:$8 sps:$4 sm:$0xff]  }
 0xaa5   : > { %2317 = vmatprep.subr.bf16.mxu1 %v7232_v28  ;;  %v7353_v28 = vld [vmem:[#allocation10 + $0xd0] ss:$8 sps:$4 sm:$0xff]  }
 0xaa8   : > { %2318 = vmatpush1.bf16.msra.mxu1 %v7230_v29  ;;  %v7355_v29 = vld [vmem:[#allocation10 + $0xd4] ss:$8 sps:$4 sm:$0xff]  }
 0xaa9   : > { %2319 = vmatprep.subr.bf16.mxu1 %v7235_v30 }
 0xaac   : > { %2320 = vmatpush1.bf16.msra.mxu1 %v7233_v31 }
 0xaad   : > { %2321 = vmatprep.subr.bf16.mxu1 %v7238_v32 }
 0xab0   : > { %2322 = vmatpush1.bf16.msra.mxu1 %v7236_v33  ;;  %v688_v33 = vld [vmem:[%s8487_s30 + $0x8] sm:$0xff] }
 0xab1   : > { %2323 = vmatprep.subr.bf16.mxu1 %v7241_v36  ;;  %v690_v36 = vld [vmem:[%s8487_s30 + $0x18] sm:$0xff] }
 0xab4   : > { %2324 = vmatpush1.bf16.msra.mxu1 %v7239_v38 }
 0xab5   : > { %2325 = vmatprep.subr.bf16.mxu1 %v7244_v39 }
 0xab8   : > { %2326 = vmatpush1.bf16.msra.mxu1 %v7242_v40 }
 0xab9   : > { %2327 = vmatprep.subr.bf16.mxu1 %v7247_v41 }
 0xabc   : > { %2328 = vmatpush1.bf16.msra.mxu1 %v7245_v42  ;;  %v7266_v42 = vld [vmem:[#allocation11] ss:$16 sps:$4 sm:$0xff]  }
 0xabd   : > { %2329 = vmatprep.subr.bf16.mxu1 %v7250_v43  ;;  %v8650_v43 = vpack.c.bf16 %v690_v36, %v688_v33  ;;  %v7683_v36 = vld [vmem:[%s8518_s0 + $0x8] sm:$0xff] }
 0xac0   : > { %2330 = vmatpush1.bf16.msra.mxu1 %v7248_v44  ;;  %v7271_v44 = vld [vmem:[#allocation11 + $0x24] ss:$16 sps:$4 sm:$0xff]  }
 0xac1   : > { %2331 = vmatprep.subr.bf16.mxu1 %v7253_v14  ;;  %v7269_v14 = vld [vmem:[#allocation11 + $0x20] ss:$16 sps:$4 sm:$0xff]  }
 0xac4   : > { %2332 = vmatpush1.bf16.msra.mxu1 %v7251_v45  ;;  %v7274_v45 = vld [vmem:[#allocation11 + $0x44] ss:$16 sps:$4 sm:$0xff]  }
 0xac5   : > { %2333 = vmatprep.subr.bf16.mxu1 %v7256_v46  ;;  %v7272_v46 = vld [vmem:[#allocation11 + $0x40] ss:$16 sps:$4 sm:$0xff]  }
 0xac8   : > { %2334 = vmatpush1.bf16.msra.mxu1 %v7254_v47  ;;  %v7286_v47 = vld [vmem:[#allocation11 + $0x84] ss:$16 sps:$4 sm:$0xff]  }
 0xac9   : > { %2335 = vmatprep.subr.bf16.mxu1 %v7259_v19  ;;  %v7284_v19 = vld [vmem:[#allocation11 + $0x80] ss:$16 sps:$4 sm:$0xff]  }
 0xacc   : > { %2336 = vmatpush1.bf16.msra.mxu1 %v7257_v48  ;;  %v7292_v48 = vld [vmem:[#allocation11 + $0xa4] ss:$16 sps:$4 sm:$0xff]  }
 0xacd   : > { %2337 = vmatprep.subr.bf16.mxu1 %v7262_v49  ;;  %v7290_v49 = vld [vmem:[#allocation11 + $0xa0] ss:$16 sps:$4 sm:$0xff]  }
 0xad0   : > { %2338 = vmatpush1.bf16.msra.mxu1 %v7260_v50  ;;  %v7298_v50 = vld [vmem:[#allocation11 + $0xc4] ss:$16 sps:$4 sm:$0xff]  }
 0xad1   : > { %2339 = vmatprep.subr.bf16.mxu1 %v7265_v51  ;;  %v7296_v51 = vld [vmem:[#allocation11 + $0xc0] ss:$16 sps:$4 sm:$0xff]  }
 0xad4   : > { %2340 = vmatpush1.bf16.msra.mxu1 %v7263_v52  ;;  %v7304_v52 = vld [vmem:[#allocation11 + $0xe4] ss:$16 sps:$4 sm:$0xff]  }
 0xad5   : > { %3007 = vmatprep.subr.bf16.mxu1 %v7268_v53  ;;  %v7302_v53 = vld [vmem:[#allocation11 + $0xe0] ss:$16 sps:$4 sm:$0xff]  }
 0xb6a   : > { %v2089_v55 = vpop.f32.mrb[18].mxu1 }
 0xb6b   : > { %v7044_v56 = vpack.i.bf16 %v8616_v8, %v2089_v55  ;;  %v6810_v57 = vpop.f32.mrb[19].mxu1  ;;  %v7299_v8 = vld [vmem:[#allocation10 + $0x40] ss:$8 sps:$4 sm:$0xff]   ;;  %v7310_v55 = vld [vmem:[#allocation11 + $0x104] ss:$16 sps:$4 sm:$0xff]  }
 0xb6c   : > { %2567 = vmatpush1.bf16.msra.mxu0 %v7299_v8  ;;  %v7316_v57 = vld [vmem:[#allocation11 + $0x124] ss:$16 sps:$4 sm:$0xff]   ;;  %v7338_v8 = vld [vmem:[#allocation11 + $0x1a0] ss:$16 sps:$4 sm:$0xff]  }
 0xb6d   : > { %7045 = vrot.lane.b32.xlu0 %v7044_v56, %s8074_s15  ;;  %2568 = vmatprep.subr.bf16.mxu0 %v7307_v11  ;;  %v7308_v56 = vld [vmem:[#allocation11 + $0x100] ss:$16 sps:$4 sm:$0xff]   ;;  %v7352_v11 = vld [vmem:[#allocation11 + $0x1e4] ss:$16 sps:$4 sm:$0xff]  }
 0xb70   : > { %2569 = vmatpush1.bf16.msra.mxu0 %v7305_v10  ;;  %v7344_v10 = vld [vmem:[#allocation11 + $0x1c0] ss:$16 sps:$4 sm:$0xff]  }
 0xb71   : > { %2570 = vmatprep.subr.bf16.mxu0 %v7313_v13  ;;  %v687_v13 = vld [vmem:[%s8487_s30] sm:$0xff] }
 0xb74   : > { %2571 = vmatpush1.bf16.msra.mxu0 %v7311_v12  ;;  %v7350_v12 = vld [vmem:[#allocation11 + $0x1e0] ss:$16 sps:$4 sm:$0xff]  }
 0xb75   : > { %2572 = vmatprep.subr.bf16.mxu0 %v7319_v16 }
 0xb78   : > { %2573 = vmatpush1.bf16.msra.mxu0 %v7317_v15  ;;  %v689_v15 = vld [vmem:[%s8487_s30 + $0x10] sm:$0xff]  ;;  %s8977_s30 = sld [smem:[#allocation33_spill]] }
 0xb79   : > { %2574 = vmatprep.subr.bf16.mxu0 %v7325_v54  ;;  %v8655_v16 = vpack.c.bf16 %v689_v15, %v687_v13  ;;  %v7356_v54 = vld [vmem:[#allocation10 + $0xe0] ss:$8 sps:$4 sm:$0xff]   ;;  %v7379_v13 = vld [vmem:[#allocation11 + $0xac] ss:$16 sps:$4 sm:$0xff]  }
 0xb7a   : > { %v7377_v15 = vld [vmem:[#allocation11 + $0xa8] ss:$16 sps:$4 sm:$0xff]  }
 0xb7c   : > { %2575 = vmatpush1.bf16.msra.mxu0 %v7323_v17  ;;  %v7358_v17 = vld [vmem:[#allocation10 + $0xe4] ss:$8 sps:$4 sm:$0xff]  }
 0xb7d   : > { %2576 = vmatprep.subr.bf16.mxu0 %v7331_v21  ;;  %v7361_v21 = vld [vmem:[#allocation10 + $0xf4] ss:$8 sps:$4 sm:$0xff]  }
 0xb80   : > { %2577 = vmatpush1.bf16.msra.mxu0 %v7329_v18  ;;  %v7359_v18 = vld [vmem:[#allocation10 + $0xf0] ss:$8 sps:$4 sm:$0xff]  }
 0xb81   : > { %2578 = vmatprep.subr.bf16.mxu0 %v7337_v23  ;;  %v2137_v23 = vld [vmem:[#allocation8] sm:$0x3] }
 0xb84   : > { %2579 = vmatpush1.bf16.msra.mxu0 %v7335_v22  ;;  %v8075_v22 = vmov 0.0|0.0  }
 0xb85   : > { %2580 = vmatprep.subr.bf16.mxu0 %v7343_v25  ;;  %v2146_v25 = vrot.slane %v2137_v23, %v8595_v35 }
 0xb88   : > { %2581 = vmatpush1.bf16.msra.mxu0 %v7341_v24  ;;  %v2142_v24 = vrot.slane %v2137_v23, %v8541_v9  ;;  %v7388_v23 = vld [vmem:[#allocation11 + $0x10c] ss:$16 sps:$4 sm:$0xff]  }
 0xb89   : > { %2582 = vmatprep.subr.bf16.mxu0 %v7349_v27 }
 0xb8c   : > { %2583 = vmatpush1.bf16.msra.mxu0 %v7347_v26 }
 0xb8d   : > { %2584 = vmatprep.subr.bf16.mxu0 %v7355_v29 }
 0xb90   : > { %2585 = vmatpush1.bf16.msra.mxu0 %v7353_v28 }
 0xb91   : > { %2586 = vmatprep.subr.bf16.mxu0 %v7358_v17  ;;  %v7382_v17 = vld [vmem:[#allocation11 + $0xcc] ss:$16 sps:$4 sm:$0xff]  }
 0xb94   : > { %2587 = vmatpush1.bf16.msra.mxu0 %v7356_v54  ;;  %v7380_v54 = vld [vmem:[#allocation11 + $0xc8] ss:$16 sps:$4 sm:$0xff]  }
 0xb95   : > { %2588 = vmatprep.subr.bf16.mxu0 %v7361_v21  ;;  %v7383_v21 = vld [vmem:[#allocation11 + $0xe8] ss:$16 sps:$4 sm:$0xff]  }
 0xb98   : > { %2589 = vmatpush1.bf16.msra.mxu0 %v7359_v18  ;;  %v7385_v18 = vld [vmem:[#allocation11 + $0xec] ss:$16 sps:$4 sm:$0xff]  }
 0xbdf   : > { %v7046_v30 = vpop.permute.xlu0 %7045 }
 0xbe0   : > { %v7048_v31 = vunpack.i.h.bf16 %v7046_v30  ;;  %v7047_v32 = vunpack.i.l.bf16 %v7046_v30 }
 0xbe2   : > { %v2101_v38 = vsel %vm1426_vm1, %v8582_v20, %v7048_v31  ;;  %v2102_v39 = vsel %vm1426_vm1, %v8633_v60, %v7047_v32  ;;  %v7280_v20 = vld [vmem:[#allocation11 + $0x64] ss:$16 sps:$4 sm:$0xff]   ;;  %v7278_v60 = vld [vmem:[#allocation11 + $0x60] ss:$16 sps:$4 sm:$0xff]  }
 0xbe3   : > { %v2135_v40 = vpack.c.bf16 %v2101_v38, %v2101_v38  ;;  %v2136_v41 = vpack.c.bf16 %v2102_v39, %v2102_v39  ;;  %v7682_v31 = vld [vmem:[%s8518_s0] sm:$0xff]  ;;  %s8981_s0 = sld [smem:[#allocation34_spill]] }
 0xbe5   : > { %2341 = vmatprep.mubr.bf16.mxu1 %v2136_v41  ;;  %v8677_v41 = vld [vmem:[%s8977_s30] sm:$0xf] }
 0xbe6   : > { %2342 = vmatmul.mubr.bf16.vlgmr.msra.gmra.mrb[20].mxu1 %v2135_v40 }
 0xbe7   : > { %3008 = vmatpush1.bf16.msra.mxu1 %v7266_v42  ;;  %3039 = vmatprep.mubr.bf16.mxu1 %v8650_v43  ;;  %v2670_v42 = vrot.slane %v8677_v41, %v8541_v9 }
 0xbe8   : > { %3009 = vmatprep.subr.bf16.mxu1 %v7271_v44  ;;  %v2674_v44 = vrot.slane %v8677_v41, %v8595_v35 }
 0xbeb   : > { %3010 = vmatpush1.bf16.msra.mxu1 %v7269_v14 }
 0xbec   : > { %3011 = vmatprep.subr.bf16.mxu1 %v7274_v45 }
 0xbef   : > { %3012 = vmatpush1.bf16.msra.mxu1 %v7272_v46 }
 0xbf0   : > { %3013 = vmatprep.subr.bf16.mxu1 %v7280_v20 }
 0xbf3   : > { %3014 = vmatpush1.bf16.msra.mxu1 %v7278_v60 }
 0xbf4   : > { %3015 = vmatprep.subr.bf16.mxu1 %v7286_v47 }
 0xbf7   : > { %3016 = vmatpush1.bf16.msra.mxu1 %v7284_v19 }
 0xbf8   : > { %3017 = vmatprep.subr.bf16.mxu1 %v7292_v48 }
 0xbfb   : > { %3018 = vmatpush1.bf16.msra.mxu1 %v7290_v49 }
 0xbfc   : > { %3019 = vmatprep.subr.bf16.mxu1 %v7298_v50 }
 0xbff   : > { %3020 = vmatpush1.bf16.msra.mxu1 %v7296_v51 }
 0xc00   : > { %3021 = vmatprep.subr.bf16.mxu1 %v7304_v52 }
 0xc03   : > { %3022 = vmatpush1.bf16.msra.mxu1 %v7302_v53  ;;  %v8711_v53 = vld [vmem:[%s8980_s25] sm:$0x3]  ;;  %s8983_s25 = sld [smem:[#allocation36_spill]] }
 0xc04   : > { %3023 = vmatprep.subr.bf16.mxu1 %v7310_v55  ;;  %v2391_v55 = vrot.slane %v8711_v53, %v8541_v9 }
 0xc07   : > { %3024 = vmatpush1.bf16.msra.mxu1 %v7308_v56 }
 0xc08   : > { %3025 = vmatprep.subr.bf16.mxu1 %v7316_v57 }
 0xc09   : > { %s8873_s2 = scalar_lea.hbm %s8983_s25, %s6730_s16 }
 0xc0b   : > { %3026 = vmatpush1.bf16.msra.mxu1 %v7314_v58 }
 0xc0c   : > { %3027 = vmatprep.subr.bf16.mxu1 %v7322_v59 }
 0xc0f   : > { %3028 = vmatpush1.bf16.msra.mxu1 %v7320_v61 }
 0xc10   : > { %3029 = vmatprep.subr.bf16.mxu1 %v7328_v62  ;;  %v7362_v62 = vld [vmem:[#allocation11 + $0x8] ss:$16 sps:$4 sm:$0xff]  }
 0xc13   : > { %3030 = vmatpush1.bf16.msra.mxu1 %v7326_v63  ;;  %v7364_v63 = vld [vmem:[#allocation11 + $0xc] ss:$16 sps:$4 sm:$0xff]  }
 0xc14   : > { %3031 = vmatprep.subr.bf16.mxu1 %v7334_v0  ;;  %v7367_v0 = vld [vmem:[#allocation11 + $0x2c] ss:$16 sps:$4 sm:$0xff]   ;;  %3050 = vmatprep.subr.bf16.mxu0 %v7364_v63 }
 0xc17   : > { %3032 = vmatpush1.bf16.msra.mxu1 %v7332_v2  ;;  %v7365_v2 = vld [vmem:[#allocation11 + $0x28] ss:$16 sps:$4 sm:$0xff]  }
 0xc18   : > { %3033 = vmatprep.subr.bf16.mxu1 %v7340_v3  ;;  %v7370_v3 = vld [vmem:[#allocation11 + $0x4c] ss:$16 sps:$4 sm:$0xff]  }
 0xc1b   : > { %3034 = vmatpush1.bf16.msra.mxu1 %v7338_v8  ;;  %v7368_v8 = vld [vmem:[#allocation11 + $0x48] ss:$16 sps:$4 sm:$0xff]  }
 0xc1c   : > { %3035 = vmatprep.subr.bf16.mxu1 %v7346_v5  ;;  %v7373_v5 = vld [vmem:[#allocation11 + $0x6c] ss:$16 sps:$4 sm:$0xff]  }
 0xc1f   : > { %3036 = vmatpush1.bf16.msra.mxu1 %v7344_v10  ;;  %v7371_v10 = vld [vmem:[#allocation11 + $0x68] ss:$16 sps:$4 sm:$0xff]  }
 0xc20   : > { %3037 = vmatprep.subr.bf16.mxu1 %v7352_v11  ;;  %v7376_v11 = vld [vmem:[#allocation11 + $0x8c] ss:$16 sps:$4 sm:$0xff]  }
 0xc23   : > { %3038 = vmatpush1.bf16.msra.mxu1 %v7350_v12  ;;  %v7374_v12 = vld [vmem:[#allocation11 + $0x88] ss:$16 sps:$4 sm:$0xff]  }
 0xc24   : > { %6867 = vmatprep.subr.bf16.mxu1 %v8075_v22 }
 0xc26   : > { %3040 = vmatmul.mubr.bf16.vlgmr.msra.gmra.mrb[24].mxu1 %v8655_v16 }
 0xc27   : > { %6815 = vmatprep.mubr.msk.f32.mxu1 %vm8073_vm0, %v8072_v4 }
 0xcb9   : > { %v2343_v26 = vpop.f32.mrb[20].mxu1 }
 0xcba   : > { %v2344_v27 = vadd.f32 %v2343_v26, %v2142_v24  ;;  %v2345_v28 = vpop.f32.mrb[21].mxu1  ;;  %v7386_v24 = vld [vmem:[#allocation11 + $0x108] ss:$16 sps:$4 sm:$0xff]  }
 0xcbb   : > { %v2346_v29 = vadd.f32 %v2345_v28, %v2146_v25  ;;  %v2347_v30 = vpop.f32.mrb[22].mxu1  ;;  %v7391_v25 = vld [vmem:[#allocation11 + $0x12c] ss:$16 sps:$4 sm:$0xff]   ;;  %v7389_v26 = vld [vmem:[#allocation11 + $0x128] ss:$16 sps:$4 sm:$0xff]  }
 0xcbc   : > { %v8664_v32 = vadd.f32 %v7682_v31, %v2344_v27  ;;  %v2348_v33 = vpop.f32.mrb[23].mxu1  ;;  %v7394_v27 = vld [vmem:[#allocation11 + $0x14c] ss:$16 sps:$4 sm:$0xff]   ;;  %v7392_v28 = vld [vmem:[#allocation11 + $0x148] ss:$16 sps:$4 sm:$0xff]  }
 0xcbd   : > { %v8667_v38 = vadd.f32 %v7683_v36, %v2346_v29  ;;  %v7397_v29 = vld [vmem:[#allocation11 + $0x16c] ss:$16 sps:$4 sm:$0xff]   ;;  %v7395_v30 = vld [vmem:[#allocation11 + $0x168] ss:$16 sps:$4 sm:$0xff]  }
 0xcbe   : > { %v2384_v40 = vpack.c.bf16 %v8664_v32, %v8664_v32  ;;  %v7400_v31 = vld [vmem:[#allocation11 + $0x18c] ss:$16 sps:$4 sm:$0xff]   ;;  %v7398_v33 = vld [vmem:[#allocation11 + $0x188] ss:$16 sps:$4 sm:$0xff]  }
 0xcbf   : > { %v2385_v39 = vpack.c.bf16 %v8667_v38, %v8667_v38  ;;  %v7403_v36 = vld [vmem:[#allocation11 + $0x1ac] ss:$16 sps:$4 sm:$0xff]  }
 0xcc1   : > { %2590 = vmatprep.mubr.bf16.mxu0 %v2385_v39  ;;  %v7401_v39 = vld [vmem:[#allocation11 + $0x1a8] ss:$16 sps:$4 sm:$0xff]  }
 0xcc2   : > { %2591 = vmatmul.mubr.bf16.vlgmr.msra.gmra.mrb[8].mxu0 %v2384_v40  ;;  %v7406_v40 = vld [vmem:[#allocation11 + $0x1cc] ss:$16 sps:$4 sm:$0xff]  }
 0xcc3   : > { %3082 = vmatprep.mubr.bf16.mxu0 %v8650_v43  ;;  %3051 = vmatpush1.bf16.msra.mxu0 %v7362_v62 }
 0xcc4   : > { %3052 = vmatprep.subr.bf16.mxu0 %v7367_v0  ;;  %v2682_v0 = vrot.slane %v8677_v41, %v8592_v34 }
 0xcc7   : > { %3053 = vmatpush1.bf16.msra.mxu0 %v7365_v2 }
 0xcc8   : > { %3054 = vmatprep.subr.bf16.mxu0 %v7370_v3 }
 0xccb   : > { %3055 = vmatpush1.bf16.msra.mxu0 %v7368_v8 }
 0xccc   : > { %3056 = vmatprep.subr.bf16.mxu0 %v7373_v5 }
 0xccf   : > { %3057 = vmatpush1.bf16.msra.mxu0 %v7371_v10 }
 0xcd0   : > { %3058 = vmatprep.subr.bf16.mxu0 %v7376_v11 }
 0xcd3   : > { %3059 = vmatpush1.bf16.msra.mxu0 %v7374_v12 }
 0xcd4   : > { %3060 = vmatprep.subr.bf16.mxu0 %v7379_v13 }
 0xcd7   : > { %3061 = vmatpush1.bf16.msra.mxu0 %v7377_v15 }
 0xcd8   : > { %3062 = vmatprep.subr.bf16.mxu0 %v7382_v17 }
 0xcdb   : > { %3063 = vmatpush1.bf16.msra.mxu0 %v7380_v54 }
 0xcdc   : > { %3064 = vmatprep.subr.bf16.mxu0 %v7385_v18 }
 0xcdf   : > { %3065 = vmatpush1.bf16.msra.mxu0 %v7383_v21 }
 0xce0   : > { %3066 = vmatprep.subr.bf16.mxu0 %v7388_v23 }
 0xce3   : > { %3067 = vmatpush1.bf16.msra.mxu0 %v7386_v24 }
 0xce4   : > { %3068 = vmatprep.subr.bf16.mxu0 %v7391_v25 }
 0xce7   : > { %3069 = vmatpush1.bf16.msra.mxu0 %v7389_v26 }
 0xce8   : > { %3070 = vmatprep.subr.bf16.mxu0 %v7394_v27 }
 0xceb   : > { %3071 = vmatpush1.bf16.msra.mxu0 %v7392_v28 }
 0xcec   : > { %3072 = vmatprep.subr.bf16.mxu0 %v7397_v29 }
 0xcef   : > { %3073 = vmatpush1.bf16.msra.mxu0 %v7395_v30 }
 0xcf0   : > { %3074 = vmatprep.subr.bf16.mxu0 %v7400_v31 }
 0xcf3   : > { %3075 = vmatpush1.bf16.msra.mxu0 %v7398_v33 }
 0xcf4   : > { %3076 = vmatprep.subr.bf16.mxu0 %v7403_v36 }
 0xcf7   : > { %3077 = vmatpush1.bf16.msra.mxu0 %v7401_v39 }
 0xcf8   : > { %3078 = vmatprep.subr.bf16.mxu0 %v7406_v40 }
 0xcf9   : > { %v3041_v14 = vpop.f32.mrb[24].mxu1 }
 0xcfa   : > { %v8683_v45 = vadd.f32 %v3041_v14, %v2670_v42  ;;  %v3043_v46 = vpop.f32.mrb[25].mxu1  ;;  %v7407_v14 = vld [vmem:[#allocation11 + $0x1e8] ss:$16 sps:$4 sm:$0xff]  }
 0xcfb   : > { %v8685_v20 = vadd.f32 %v3043_v46, %v2674_v44  ;;  %v3045_v60 = vpop.f32.mrb[26].mxu1 }
 0xcfc   : > { %v8687_v47 = vadd.f32 %v3045_v60, %v2670_v42  ;;  %v3047_v43 = vpop.f32.mrb[27].mxu1  ;;  %v7404_v42 = vld [vmem:[#allocation11 + $0x1c8] ss:$16 sps:$4 sm:$0xff]  }
 0xcfd   : > { %v8689_v19 = vadd.f32 %v3047_v43, %v2674_v44  ;;  %v7409_v44 = vld [vmem:[#allocation11 + $0x1ec] ss:$16 sps:$4 sm:$0xff]   ;;  %3079 = vmatpush1.bf16.msra.mxu0 %v7404_v42 }
 0xcfe   : > { %v7049_v49 = vpack.i.bf16 %v8687_v47, %v8683_v45  ;;  %v6868_v50 = vpack.c.bf16 %v8687_v47, %v8683_v45  ;;  %3080 = vmatprep.subr.bf16.mxu0 %v7409_v44 }
 0xcff   : > { %v7059_v51 = vpack.i.bf16 %v8689_v19, %v8685_v20  ;;  %v6882_v52 = vpack.c.bf16 %v8689_v19, %v8685_v20 }
 0xd00   : > { %6870 = vmatpush3.bf16.xpose.msk.msra.mxu1 %vm8693_vm4, %v6868_v50 }
 0xd01   : > { %6871 = vmatprep.subr.bf16.mxu1 %v8075_v22  ;;  %3081 = vmatpush1.bf16.msra.mxu0 %v7407_v14 }
 0xd04   : > { %3083 = vmatmul.mubr.bf16.vlgmr.msra.gmra.mrb[12].mxu0 %v8655_v16  ;;  %v2678_v16 = vrot.slane %v8677_v41, %v8533_v7 }
 0xd95   : > { %v2592_v56 = vpop.f32.mrb[8].mxu0 }
 0xd96   : > { %v8715_v57 = vadd.f32 %v2592_v56, %v2391_v55  ;;  %v8717_v58 = vpop.f32.mrb[9].mxu0 }
 0xd97   : > { %v2596_v59 = vpop.f32.mrb[10].mxu0 }
 0xd98   : > { %v2597_v61 = vpop.f32.mrb[11].mxu0  ;;  %6816 = vmatmul.mubr.msk.f32.vlgmr.msra.gmra.mrb[28].mxu1 %vm1426_vm1, %v8715_v57 }
 0xd99   : > { %6822 = vmatprep.mubr.msk.f32.mxu1 %vm8073_vm0, %v8072_v4 }
 0xdd7   : > { %v3084_v63 = vpop.f32.mrb[12].mxu0 }
 0xdd8   : > { %v3085_v2 = vadd.f32 %v3084_v63, %v2678_v16  ;;  %v3086_v3 = vpop.f32.mrb[13].mxu0 }
 0xdd9   : > { %v3088_v8 = vpop.f32.mrb[14].mxu0  ;;  %v8734_v47 = vadd.f32 %v3086_v3, %v2682_v0 }
 0xdda   : > { %v3089_v45 = vadd.f32 %v3088_v8, %v2678_v16  ;;  %v3090_v10 = vpop.f32.mrb[15].mxu0 }
 0xddb   : > { %v8736_v11 = vadd.f32 %v3090_v10, %v2682_v0 }
 0xddc   : > { %v6872_v5 = vpack.c.bf16 %v3089_v45, %v3085_v2 }
 0xddd   : > { %v7064_v12 = vpack.i.bf16 %v8736_v11, %v8734_v47  ;;  %v6886_v13 = vpack.c.bf16 %v8736_v11, %v8734_v47  ;;  %v7418_v47 = vld [vmem:[#allocation13 + $0x24] ss:$8 sps:$4 sm:$0xff]   ;;  %v7416_v11 = vld [vmem:[#allocation13 + $0x20] ss:$8 sps:$4 sm:$0xff]  }
 0xdde   : > { %6873 = vmatpush3.bf16.msra.mxu1 %v6872_v5 }
 0xddf   : > { %6874 = vmatprep.subr.bf16.mxu1 %v8075_v22 }
 0xe6b   : > { %v3168_v46 = vpop.f32.mrb[28].mxu1 }
 0xe6c   : > { %v3172_v60 = vmul.f32 0.125, %v3168_v46  ;;  %v6817_v43 = vpop.f32.mrb[29].mxu1 }
 0xe6e   : > { %v3174_v50 = vsel %vm3173_vm5, %v3172_v60, -inf }
 0xe6f   : > { %3175 = vmax.xlane.f32.xlu1 %v3174_v50  ;;  %v2395_v50 = vrot.slane %v8711_v53, %v8595_v35 }
 0xe80   : > { %7050 = vrot.lane.b32.xlu1 %v7049_v49, %s8074_s15  ;;  %v7054_v49 = vpack.i.bf16 %v3089_v45, %v3085_v2 }
 0xefc   : > { %v3176_v55 = vpop.xlane.xlu1 %3175 }
 0xefd   : > { %v3177_v56 = vsub.f32 %v3172_v60, %v3176_v55  ;;  %v2595_v55 = vadd.f32 %v8717_v58, %v2395_v50  ;;  %v7431_v50 = vld [vmem:[#allocation13 + $0x70] ss:$8 sps:$4 sm:$0xff]  }
 0xeff   : > { %v3178_v59 = vmul.f32 1.442695, %v3177_v56 }
 0xf00   : > { %v7051_v15 = vpop.permute.xlu1 %7050 }
 0xf01   : > { %7666 = vpow2.f32 %v3178_v59  ;;  %v7053_v17 = vunpack.i.h.bf16 %v7051_v15  ;;  %v7052_v54 = vunpack.i.l.bf16 %v7051_v15 }
 0xf03   : > { %v6875_v23 = vpack.c.bf16 %v7053_v17, %v7052_v54 }
 0xf0b   : > { %v7667_v61 = vpop.eup %7666 }
 0xf0c   : > { %v3180_v62 = vsel %vm3173_vm5, %v7667_v61, 0.0 }
 0xf0d   : > { %3181 = vadd.xlane.f32.xlu0 %v3180_v62 }
 0xf23   : > { %3258 = vrot.lane.b32.xlu0 %v8715_v57, %s8074_s15 }
 0xf9a   : > { %v3182_v41 = vpop.xlane.xlu0 %3181 }
 0xf9b   : > { %7668 = vrcp.f32 %v3182_v41 }
 0xf9e   : > { %v3259_v24 = vpop.permute.xlu0 %3258 }
 0xfa5   : > { %v7669_v18 = vpop.eup %7668 }
 0xfa6   : > { %v3184_v21 = vmul.f32 %v7669_v18, %v7667_v61 }
 0xfa8   : > { %6823 = vmatmul.mubr.msk.f32.vlgmr.msra.gmra.mrb[30].mxu1 %vm3173_vm5, %v3184_v21 }
 0xfa9   : > { %6877 = vmatpush3.bf16.xpose.msk.msra.mxu1 %vm8693_vm4, %v6875_v23  ;;  %6829 = vmatprep.mubr.msk.f32.mxu1 %vm8073_vm0, %v8072_v4 }
 0xfaa   : > { %6878 = vmatprep.subr.bf16.mxu1 %v8075_v22 }
 0xfb0   : > { %6830 = vmatmul.mubr.msk.f32.vlgmr.msra.gmra.mrb[32].mxu1 %vm1426_vm1, %v3259_v24 }
 0xfb1   : > { %6836 = vmatprep.mubr.msk.f32.mxu1 %vm8073_vm0, %v8072_v4 }
0x107b   : > { %v8754_v57 = vpop.f32.mrb[30].mxu1 }
0x107c   : > { %v6824_v25 = vpop.f32.mrb[31].mxu1 }
0x1083   : > { %v3336_v26 = vpop.f32.mrb[32].mxu1 }
0x1084   : > { %v3340_v27 = vmul.f32 0.125, %v3336_v26  ;;  %v6831_v28 = vpop.f32.mrb[33].mxu1 }
0x1086   : > { %v3341_v29 = vsel %vm3173_vm5, %v3340_v27, -inf }
0x1087   : > { %3342 = vmax.xlane.f32.xlu1 %v3341_v29 }
0x1098   : > { %7055 = vrot.lane.b32.xlu1 %v7054_v49, %s8074_s15 }
0x1114   : > { %v3343_v30 = vpop.xlane.xlu1 %3342 }
0x1115   : > { %v3344_v31 = vsub.f32 %v3340_v27, %v3343_v30  ;;  %v7410_v30 = vld [vmem:[#allocation13] ss:$8 sps:$4 sm:$0xff]  }
0x1117   : > { %v3345_v33 = vmul.f32 1.442695, %v3344_v31  ;;  %v7412_v31 = vld [vmem:[#allocation13 + $0x4] ss:$8 sps:$4 sm:$0xff]  }
0x1118   : > { %v7056_v36 = vpop.permute.xlu1 %7055  ;;  %3988 = vmatprep.subr.bf16.mxu0 %v7412_v31 }
0x1119   : > { %7670 = vpow2.f32 %v3345_v33  ;;  %v7058_v39 = vunpack.i.h.bf16 %v7056_v36  ;;  %v7057_v40 = vunpack.i.l.bf16 %v7056_v36  ;;  %v7415_v33 = vld [vmem:[#allocation13 + $0x14] ss:$8 sps:$4 sm:$0xff]   ;;  %3989 = vmatpush1.bf16.msra.mxu0 %v7410_v30  ;;  %v7413_v36 = vld [vmem:[#allocation13 + $0x10] ss:$8 sps:$4 sm:$0xff]   ;;  %v4059_v30 = vld [vmem:[#allocation14 + $0xe0] sm:$0xff] }
0x111a   : > { %3990 = vmatprep.subr.bf16.mxu0 %v7415_v33 }
0x111b   : > { %v6879_v42 = vpack.c.bf16 %v7058_v39, %v7057_v40  ;;  %v7419_v39 = vld [vmem:[#allocation13 + $0x30] ss:$8 sps:$4 sm:$0xff]   ;;  %v7424_v40 = vld [vmem:[#allocation13 + $0x44] ss:$8 sps:$4 sm:$0xff]  }
0x111d   : > { %6880 = vmatpush3.bf16.msra.mxu1 %v6879_v42  ;;  %3991 = vmatpush1.bf16.msra.mxu0 %v7413_v36  ;;  %v7422_v42 = vld [vmem:[#allocation13 + $0x40] ss:$8 sps:$4 sm:$0xff]  }
0x111e   : > { %6881 = vmatprep.subr.bf16.mxu1 %v8075_v22  ;;  %3992 = vmatprep.subr.bf16.mxu0 %v7418_v47  ;;  %v4063_v36 = vld [vmem:[#allocation14 + $0x100] sm:$0xff] }
0x111f   : > { %v4067_v47 = vld [vmem:[#allocation14 + $0x120] sm:$0xff] }
0x1121   : > { %3993 = vmatpush1.bf16.msra.mxu0 %v7416_v11  ;;  %v6500_v11 = vcombine.high %v4063_v36, %v4067_v47 }
0x1123   : > { %v7671_v44 = vpop.eup %7670 }
0x1124   : > { %v3347_v14 = vsel %vm3173_vm5, %v7671_v44, 0.0 }
0x1125   : > { %3348 = vadd.xlane.f32.xlu0 %v3347_v14  ;;  %v7425_v14 = vld [vmem:[#allocation13 + $0x50] ss:$8 sps:$4 sm:$0xff]  }
0x11b2   : > { %v3349_v46 = vpop.xlane.xlu0 %3348 }
0x11b3   : > { %7672 = vrcp.f32 %v3349_v46  ;;  %v7430_v46 = vld [vmem:[#allocation13 + $0x64] ss:$8 sps:$4 sm:$0xff]  }
0x11bd   : > { %v7673_v60 = vpop.eup %7672 }
0x11be   : > { %v3351_v43 = vmul.f32 %v7673_v60, %v7671_v44  ;;  %v7427_v44 = vld [vmem:[#allocation13 + $0x54] ss:$8 sps:$4 sm:$0xff]   ;;  %v7428_v60 = vld [vmem:[#allocation13 + $0x60] ss:$8 sps:$4 sm:$0xff]  }
0x11c0   : > { %6837 = vmatmul.mubr.msk.f32.vlgmr.msra.gmra.mrb[34].mxu1 %vm3173_vm5, %v3351_v43  ;;  %v7433_v43 = vld [vmem:[#allocation13 + $0x74] ss:$8 sps:$4 sm:$0xff]  }
0x11c1   : > { %6884 = vmatpush3.bf16.xpose.msk.msra.mxu1 %vm8693_vm4, %v6882_v52  ;;  %6843 = vmatprep.mubr.msk.f32.mxu1 %vm8073_vm0, %v8072_v4 }
0x11c2   : > { %6885 = vmatprep.subr.bf16.mxu1 %v8075_v22 }
0x11c8   : > { %6844 = vmatmul.mubr.msk.f32.vlgmr.msra.gmra.mrb[36].mxu1 %vm1426_vm1, %v2595_v55 }
0x11c9   : > { %6887 = vmatpush3.bf16.msra.mxu1 %v6886_v13  ;;  %6850 = vmatprep.mubr.msk.f32.mxu1 %vm8073_vm0, %v8072_v4 }
0x11ca   : > { %6888 = vmatprep.subr.bf16.mxu1 %v8075_v22 }
0x1293   : > { %v8776_v56 = vpop.f32.mrb[34].mxu1 }
0x1294   : > { %v6838_v52 = vpop.f32.mrb[35].mxu1 }
0x1295   : > { %v7434_v52 = vld [vmem:[#allocation13 + $0x80] ss:$8 sps:$4 sm:$0xff]  }
0x129b   : > { %v3508_v59 = vpop.f32.mrb[36].mxu1 }
0x129c   : > { %v3512_v61 = vmul.f32 0.125, %v3508_v59  ;;  %v6845_v62 = vpop.f32.mrb[37].mxu1  ;;  %v7439_v59 = vld [vmem:[#allocation13 + $0x94] ss:$8 sps:$4 sm:$0xff]  }
0x129d   : > { %v7442_v62 = vld [vmem:[#allocation13 + $0xa4] ss:$8 sps:$4 sm:$0xff]  }
0x129e   : > { %v3513_v53 = vsel %vm3173_vm5, %v3512_v61, -inf }
0x129f   : > { %3514 = vmax.xlane.f32.xlu0 %v3513_v53  ;;  %v7440_v53 = vld [vmem:[#allocation13 + $0xa0] ss:$8 sps:$4 sm:$0xff]  }
0x12b5   : > { %7060 = vrot.lane.b32.xlu0 %v7059_v51, %s8074_s15 }
0x12b9   : > { %3597 = vrot.lane.b32.xlu0 %v2595_v55, %s8074_s15  ;;  %v7436_v55 = vld [vmem:[#allocation13 + $0x84] ss:$8 sps:$4 sm:$0xff]  }
0x132c   : > { %v3515_v58 = vpop.xlane.xlu0 %3514 }
0x132d   : > { %v3516_v16 = vsub.f32 %v3512_v61, %v3515_v58  ;;  %v7437_v61 = vld [vmem:[#allocation13 + $0x90] ss:$8 sps:$4 sm:$0xff]   ;;  %v7445_v58 = vld [vmem:[#allocation13 + $0xb4] ss:$8 sps:$4 sm:$0xff]  }
0x132f   : > { %v3517_v63 = vmul.f32 1.442695, %v3516_v16  ;;  %v7443_v16 = vld [vmem:[#allocation13 + $0xb0] ss:$8 sps:$4 sm:$0xff]  }
0x1330   : > { %v7061_v8 = vpop.permute.xlu0 %7060 }
0x1331   : > { %7674 = vpow2.f32 %v3517_v63  ;;  %v7063_v45 = vunpack.i.h.bf16 %v7061_v8  ;;  %v7062_v49 = vunpack.i.l.bf16 %v7061_v8  ;;  %v7448_v63 = vld [vmem:[#allocation13 + $0xc4] ss:$8 sps:$4 sm:$0xff]  }
0x1332   : > { %v7454_v8 = vld [vmem:[#allocation13 + $0xe4] ss:$8 sps:$4 sm:$0xff]  }
0x1333   : > { %v6889_v13 = vpack.c.bf16 %v7063_v45, %v7062_v49  ;;  %v7452_v45 = vld [vmem:[#allocation13 + $0xe0] ss:$8 sps:$4 sm:$0xff]   ;;  %v7457_v49 = vld [vmem:[#allocation13 + $0xf4] ss:$8 sps:$4 sm:$0xff]  }
0x1334   : > { %v3598_v20 = vpop.permute.xlu0 %3597 }
0x133b   : > { %v7675_v0 = vpop.eup %7674 }
0x133c   : > { %v3519_v2 = vsel %vm3173_vm5, %v7675_v0, 0.0 }
0x133d   : > { %3520 = vadd.xlane.f32.xlu1 %v3519_v2  ;;  %v7451_v2 = vld [vmem:[#allocation13 + $0xd4] ss:$8 sps:$4 sm:$0xff]  }
0x13ca   : > { %v3521_v3 = vpop.xlane.xlu1 %3520 }
0x13cb   : > { %7676 = vrcp.f32 %v3521_v3  ;;  %v7449_v3 = vld [vmem:[#allocation13 + $0xd0] ss:$8 sps:$4 sm:$0xff]  }
0x13d5   : > { %v7677_v5 = vpop.eup %7676 }
0x13d6   : > { %v3523_v10 = vmul.f32 %v7677_v5, %v7675_v0  ;;  %v7446_v0 = vld [vmem:[#allocation13 + $0xc0] ss:$8 sps:$4 sm:$0xff]   ;;  %v7455_v5 = vld [vmem:[#allocation13 + $0xf0] ss:$8 sps:$4 sm:$0xff]  }
0x13d8   : > { %6851 = vmatmul.mubr.msk.f32.vlgmr.msra.gmra.mrb[38].mxu1 %vm3173_vm5, %v3523_v10  ;;  %v4031_v10 = vld [vmem:[#allocation14] sm:$0xff] }
0x13d9   : > { %6891 = vmatpush3.bf16.xpose.msk.msra.mxu1 %vm8693_vm4, %v6889_v13  ;;  %6857 = vmatprep.mubr.msk.f32.mxu1 %vm8073_vm0, %v8072_v4  ;;  %v4035_v13 = vld [vmem:[#allocation14 + $0x20] sm:$0xff] }
0x13da   : > { %6892 = vmatprep.subr.bf16.mxu1 %v8075_v22 }
0x13e0   : > { %6858 = vmatmul.mubr.msk.f32.vlgmr.msra.gmra.mrb[40].mxu1 %vm1426_vm1, %v3598_v20  ;;  %v8803_v20 = vld [vmem:[#allocation14 + $0x8] sm:$0xff] }
0x13e1   : > { %6864 = vmatprep.mubr.msk.f32.mxu1 %vm8073_vm0, %v8072_v4 }
0x14ab   : > { %v8794_v19 = vpop.f32.mrb[38].mxu1 }
0x14ac   : > { %v6852_v51 = vpop.f32.mrb[39].mxu1 }
0x14ad   : > { %v6467_v51 = vcombine.low %v4031_v10, %v4035_v13 }
0x14b3   : > { %v3675_v41 = vpop.f32.mrb[40].mxu1 }
0x14b4   : > { %v3679_v15 = vmul.f32 0.125, %v3675_v41  ;;  %v6859_v17 = vpop.f32.mrb[41].mxu1  ;;  %v6468_v41 = vcombine.high %v4031_v10, %v4035_v13 }
0x14b5   : > { %v4039_v17 = vld [vmem:[#allocation14 + $0x40] sm:$0xff] }
0x14b6   : > { %v3680_v48 = vsel %vm3173_vm5, %v3679_v15, -inf }
0x14b7   : > { %3681 = vmax.xlane.f32.xlu0 %v3680_v48  ;;  %v4043_v48 = vld [vmem:[#allocation14 + $0x60] sm:$0xff] }
0x1544   : > { %v3682_v54 = vpop.xlane.xlu0 %3681 }
0x1545   : > { %v3683_v18 = vsub.f32 %v3679_v15, %v3682_v54  ;;  %v8805_v15 = vld [vmem:[#allocation14 + $0x28] sm:$0xff] }
0x1546   : > { %v6469_v54 = vcombine.low %v8803_v20, %v8805_v15 }
0x1547   : > { %v3684_v21 = vmul.f32 1.442695, %v3683_v18  ;;  %v6470_v18 = vcombine.high %v8803_v20, %v8805_v15 }
0x1549   : > { %7678 = vpow2.f32 %v3684_v21  ;;  %v6476_v21 = vcombine.high %v4039_v17, %v4043_v48 }
0x1553   : > { %v7679_v22 = vpop.eup %7678 }
0x1554   : > { %v3686_v23 = vsel %vm3173_vm5, %v7679_v22, 0.0 }
0x1555   : > { %3687 = vadd.xlane.f32.xlu1 %v3686_v23  ;;  %v6475_v23 = vcombine.low %v4039_v17, %v4043_v48 }
0x1566   : > { %7065 = vrot.lane.b32.xlu1 %v7064_v12, %s8074_s15  ;;  %v7421_v12 = vld [vmem:[#allocation13 + $0x34] ss:$8 sps:$4 sm:$0xff]  }
0x1567   : > { %3994 = vmatprep.subr.bf16.mxu0 %v7421_v12  ;;  %v4071_v12 = vld [vmem:[#allocation14 + $0x140] sm:$0xff] }
0x1568   : > { %3995 = vmatpush1.bf16.msra.mxu0 %v7419_v39  ;;  %v4075_v39 = vld [vmem:[#allocation14 + $0x160] sm:$0xff] }
0x1569   : > { %3996 = vmatprep.subr.bf16.mxu0 %v7424_v40  ;;  %v6508_v40 = vcombine.high %v4071_v12, %v4075_v39 }
0x156c   : > { %3997 = vmatpush1.bf16.msra.mxu0 %v7422_v42  ;;  %v6507_v42 = vcombine.low %v4071_v12, %v4075_v39  ;;  %v4056_v12 = vld [vmem:[#allocation14 + $0xc8] sm:$0xff] }
0x156d   : > { %3998 = vmatprep.subr.bf16.mxu0 %v7427_v44  ;;  %v4079_v44 = vld [vmem:[#allocation14 + $0x180] sm:$0xff]  ;;  %v4060_v39 = vld [vmem:[#allocation14 + $0xe8] sm:$0xff] }
0x1570   : > { %3999 = vmatpush1.bf16.msra.mxu0 %v7425_v14  ;;  %v4083_v14 = vld [vmem:[#allocation14 + $0x1a0] sm:$0xff] }
0x1571   : > { %4000 = vmatprep.subr.bf16.mxu0 %v7430_v46  ;;  %v6516_v46 = vcombine.high %v4079_v44, %v4083_v14 }
0x1574   : > { %4001 = vmatpush1.bf16.msra.mxu0 %v7428_v60  ;;  %v6515_v60 = vcombine.low %v4079_v44, %v4083_v14  ;;  %v6493_v44 = vcombine.low %v4056_v12, %v4060_v39 }
0x1575   : > { %4002 = vmatprep.subr.bf16.mxu0 %v7433_v43  ;;  %v4087_v43 = vld [vmem:[#allocation14 + $0x1c0] sm:$0xff] }
0x1578   : > { %4003 = vmatpush1.bf16.msra.mxu0 %v7431_v50  ;;  %v4091_v50 = vld [vmem:[#allocation14 + $0x1e0] sm:$0xff] }
0x1579   : > { %4004 = vmatprep.subr.bf16.mxu0 %v7436_v55  ;;  %v6524_v55 = vcombine.high %v4087_v43, %v4091_v50 }
0x157c   : > { %4005 = vmatpush1.bf16.msra.mxu0 %v7434_v52  ;;  %v6523_v52 = vcombine.low %v4087_v43, %v4091_v50  ;;  %v4084_v43 = vld [vmem:[#allocation14 + $0x1a8] sm:$0xff] }
0x157d   : > { %4006 = vmatprep.subr.bf16.mxu0 %v7439_v59  ;;  %v4095_v59 = vld [vmem:[#allocation14 + $0x200] sm:$0xff] }
0x1580   : > { %4007 = vmatpush1.bf16.msra.mxu0 %v7437_v61  ;;  %v4099_v61 = vld [vmem:[#allocation14 + $0x220] sm:$0xff] }
0x1581   : > { %4008 = vmatprep.subr.bf16.mxu0 %v7442_v62  ;;  %v6532_v62 = vcombine.high %v4095_v59, %v4099_v61 }
0x1584   : > { %4009 = vmatpush1.bf16.msra.mxu0 %v7440_v53  ;;  %v6531_v53 = vcombine.low %v4095_v59, %v4099_v61  ;;  %v4092_v59 = vld [vmem:[#allocation14 + $0x1e8] sm:$0xff] }
0x1585   : > { %4010 = vmatprep.subr.bf16.mxu0 %v7445_v58  ;;  %v4103_v58 = vld [vmem:[#allocation14 + $0x240] sm:$0xff] }
0x1588   : > { %4011 = vmatpush1.bf16.msra.mxu0 %v7443_v16  ;;  %v4107_v16 = vld [vmem:[#allocation14 + $0x260] sm:$0xff] }
0x1589   : > { %4012 = vmatprep.subr.bf16.mxu0 %v7448_v63  ;;  %v6540_v63 = vcombine.high %v4103_v58, %v4107_v16 }
0x158c   : > { %4013 = vmatpush1.bf16.msra.mxu0 %v7446_v0  ;;  %v6539_v0 = vcombine.low %v4103_v58, %v4107_v16  ;;  %v4100_v58 = vld [vmem:[#allocation14 + $0x228] sm:$0xff] }
0x158d   : > { %4014 = vmatprep.subr.bf16.mxu0 %v7451_v2  ;;  %v4111_v2 = vld [vmem:[#allocation14 + $0x280] sm:$0xff] }
0x1590   : > { %4015 = vmatpush1.bf16.msra.mxu0 %v7449_v3  ;;  %v4115_v3 = vld [vmem:[#allocation14 + $0x2a0] sm:$0xff] }
0x1591   : > { %4016 = vmatprep.subr.bf16.mxu0 %v7454_v8  ;;  %v6548_v8 = vcombine.high %v4111_v2, %v4115_v3 }
0x1594   : > { %4017 = vmatpush1.bf16.msra.mxu0 %v7452_v45  ;;  %v6547_v45 = vcombine.low %v4111_v2, %v4115_v3  ;;  %v4108_v2 = vld [vmem:[#allocation14 + $0x268] sm:$0xff] }
0x1595   : > { %4018 = vmatprep.subr.bf16.mxu0 %v7457_v49  ;;  %v4119_v49 = vld [vmem:[#allocation14 + $0x2c0] sm:$0xff] }
0x1598   : > { %4019 = vmatpush1.bf16.msra.mxu0 %v7455_v5  ;;  %v4123_v5 = vld [vmem:[#allocation14 + $0x2e0] sm:$0xff] }
0x1599   : > { %4884 = vmatprep.subr.bf16.mxu0 %v6470_v18  ;;  %v6556_v10 = vcombine.high %v4119_v49, %v4123_v5  ;;  %v6555_v13 = vcombine.low %v4119_v49, %v4123_v5  ;;  %v4135_v18 = vld [vmem:[#allocation14 + $0x340] sm:$0xff]  ;;  %v4116_v49 = vld [vmem:[#allocation14 + $0x2a8] sm:$0xff] }
0x15e2   : > { %v3688_v4 = vpop.xlane.xlu1 %3687 }
0x15e3   : > { %7680 = vrcp.f32 %v3688_v4 }
0x15e6   : > { %v7066_v24 = vpop.permute.xlu1 %7065 }
0x15e7   : > { %v7068_v25 = vunpack.i.h.bf16 %v7066_v24  ;;  %v7067_v26 = vunpack.i.l.bf16 %v7066_v24 }
0x15e9   : > { %v6893_v27 = vpack.c.bf16 %v7068_v25, %v7067_v26  ;;  %v4047_v25 = vld [vmem:[#allocation14 + $0x80] sm:$0xff] }
0x15ea   : > { %v4051_v26 = vld [vmem:[#allocation14 + $0xa0] sm:$0xff] }
0x15eb   : > { %6894 = vmatpush3.bf16.msra.mxu1 %v6893_v27  ;;  %v6484_v27 = vcombine.high %v4047_v25, %v4051_v26 }
0x15ec   : > { %4843 = vmatprep.subr.bf16.mxu1 %v6468_v41  ;;  %v4131_v41 = vld [vmem:[#allocation14 + $0x320] sm:$0xff] }
0x15ed   : > { %v7681_v28 = vpop.eup %7680 }
0x15ee   : > { %v3690_v29 = vmul.f32 %v7681_v28, %v7679_v22  ;;  %v6483_v28 = vcombine.low %v4047_v25, %v4051_v26  ;;  %v4040_v26 = vld [vmem:[#allocation14 + $0x48] sm:$0xff] }
0x15f0   : > { %6865 = vmatmul.mubr.msk.f32.vlgmr.msra.gmra.mrb[42].mxu1 %vm3173_vm5, %v3690_v29  ;;  %v4055_v29 = vld [vmem:[#allocation14 + $0xc0] sm:$0xff] }
0x15f1   : > { %4844 = vmatpush1.bf16.msra.mxu1 %v6467_v51  ;;  %v6492_v31 = vcombine.high %v4055_v29, %v4059_v30  ;;  %v6491_v33 = vcombine.low %v4055_v29, %v4059_v30  ;;  %v4127_v51 = vld [vmem:[#allocation14 + $0x300] sm:$0xff] }
0x15f2   : > { %4845 = vmatprep.subr.bf16.mxu1 %v6476_v21  ;;  %v6564_v17 = vcombine.high %v4127_v51, %v4131_v41  ;;  %v6563_v48 = vcombine.low %v4127_v51, %v4131_v41  ;;  %v4139_v21 = vld [vmem:[#allocation14 + $0x360] sm:$0xff]  ;;  %v4124_v51 = vld [vmem:[#allocation14 + $0x2e8] sm:$0xff] }
0x15f5   : > { %4846 = vmatpush1.bf16.msra.mxu1 %v6475_v23  ;;  %v6571_v23 = vcombine.low %v4135_v18, %v4139_v21 }
0x15f6   : > { %4847 = vmatprep.subr.bf16.mxu1 %v6484_v27  ;;  %v4044_v27 = vld [vmem:[#allocation14 + $0x68] sm:$0xff] }
0x15f9   : > { %4848 = vmatpush1.bf16.msra.mxu1 %v6483_v28 }
0x15fa   : > { %4849 = vmatprep.subr.bf16.mxu1 %v6492_v31 }
0x15fd   : > { %4850 = vmatpush1.bf16.msra.mxu1 %v6491_v33  ;;  %v6478_v33 = vcombine.high %v4040_v26, %v4044_v27 }
0x15fe   : > { %4851 = vmatprep.subr.bf16.mxu1 %v6500_v11  ;;  %v6477_v11 = vcombine.low %v4040_v26, %v4044_v27  ;;  %v4143_v27 = vld [vmem:[#allocation14 + $0x380] sm:$0xff] }
0x16c3   : > { %v3768_v22 = vpop.f32.mrb[42].mxu1 }
0x16c4   : > { %v7069_v4 = vpack.i.bf16 %v8776_v56, %v3768_v22  ;;  %v6866_v24 = vpop.f32.mrb[43].mxu1  ;;  %v6499_v56 = vcombine.low %v4063_v36, %v4067_v47  ;;  %v6572_v22 = vcombine.high %v4135_v18, %v4139_v21  ;;  %v4048_v36 = vld [vmem:[#allocation14 + $0x88] sm:$0xff] }
0x16c5   : > { %v4052_v47 = vld [vmem:[#allocation14 + $0xa8] sm:$0xff] }
0x16c6   : > { %7070 = vrot.lane.b32.xlu1 %v7069_v4, %s8074_s15  ;;  %4852 = vmatpush1.bf16.msra.mxu1 %v6499_v56  ;;  %v6486_v56 = vcombine.high %v4048_v36, %v4052_v47  ;;  %v4132_v18 = vld [vmem:[#allocation14 + $0x328] sm:$0xff]  ;;  %s6180_s15 = sshll.u32 %s8483_s3, 4 }
0x16c7   : > { %4853 = vmatprep.subr.bf16.mxu1 %v6508_v40  ;;  %v4064_v40 = vld [vmem:[#allocation14 + $0x108] sm:$0xff]  ;;  %s681_s1 = scalar_lea.vmem [#allocation19], %s6180_s15 }
0x16c8   : > { %s5986_s30 = sshll.u32 %s681_s1, 4  ;;  %s8875_s30 = int_to_ptr.vmem [resolvable:$true] %s5986_s30 }
0x16c9   : > { %s7966_s18 = scalar_lea.vmem %s8875_s30, 256 }
0x16ca   : > { %4854 = vmatpush1.bf16.msra.mxu1 %v6507_v42  ;;  %v4068_v42 = vld [vmem:[#allocation14 + $0x128] sm:$0xff]  ;;  %p7967_p0 = scmp.ne.s32.totalorder %s8875_s30, %s7966_s18 }
0x16cb   : > { %4855 = vmatprep.subr.bf16.mxu1 %v6516_v46  ;;  %v6502_v14 = vcombine.high %v4064_v40, %v4068_v42  ;;  %v4072_v46 = vld [vmem:[#allocation14 + $0x148] sm:$0xff]  ;;  %v6501_v20 = vcombine.low %v4064_v40, %v4068_v42 }
0x16cc   : > { %p7968_p8 = pnand %p7967_p0, %p8984_p2 }
0x16ce   : > { %4856 = vmatpush1.bf16.msra.mxu1 %v6515_v60  ;;  %v4076_v60 = vld [vmem:[#allocation14 + $0x168] sm:$0xff]  ;;  %p7969_p6 = pneg %p7968_p8 }
0x16cf   : > { %4857 = vmatprep.subr.bf16.mxu1 %v6524_v55  ;;  %v6510_v15 = vcombine.high %v4072_v46, %v4076_v60  ;;  %v6509_v50 = vcombine.low %v4072_v46, %v4076_v60  ;;  %v4034_v46 = vld [vmem:[#allocation14 + $0x18] sm:$0xff] }
0x16d2   : > { %4858 = vmatpush1.bf16.msra.mxu1 %v6523_v52  ;;  %v4088_v52 = vld [vmem:[#allocation14 + $0x1c8] sm:$0xff] }
0x16d3   : > { %4859 = vmatprep.subr.bf16.mxu1 %v6532_v62  ;;  %v6526_v62 = vcombine.high %v4088_v52, %v4092_v59  ;;  %v6525_v16 = vcombine.low %v4088_v52, %v4092_v59 }
0x16d6   : > { %4860 = vmatpush1.bf16.msra.mxu1 %v6531_v53  ;;  %v4096_v53 = vld [vmem:[#allocation14 + $0x208] sm:$0xff] }
0x16d7   : > { %4861 = vmatprep.subr.bf16.mxu1 %v6540_v63  ;;  %v6534_v63 = vcombine.high %v4096_v53, %v4100_v58  ;;  %v6533_v3 = vcombine.low %v4096_v53, %v4100_v58 }
0x16da   : > { %4862 = vmatpush1.bf16.msra.mxu1 %v6539_v0  ;;  %v4104_v0 = vld [vmem:[#allocation14 + $0x248] sm:$0xff] }
0x16db   : > { %4863 = vmatprep.subr.bf16.mxu1 %v6548_v8  ;;  %v6542_v8 = vcombine.high %v4104_v0, %v4108_v2  ;;  %v6541_v5 = vcombine.low %v4104_v0, %v4108_v2  ;;  %v4041_v2 = vld [vmem:[#allocation14 + $0x50] sm:$0xff] }
0x16de   : > { %4864 = vmatpush1.bf16.msra.mxu1 %v6547_v45  ;;  %v4112_v45 = vld [vmem:[#allocation14 + $0x288] sm:$0xff] }
0x16df   : > { %4865 = vmatprep.subr.bf16.mxu1 %v6556_v10  ;;  %v6550_v10 = vcombine.high %v4112_v45, %v4116_v49  ;;  %v6549_v41 = vcombine.low %v4112_v45, %v4116_v49  ;;  %v4046_v45 = vld [vmem:[#allocation14 + $0x78] sm:$0xff] }
0x16e2   : > { %4866 = vmatpush1.bf16.msra.mxu1 %v6555_v13  ;;  %v4120_v13 = vld [vmem:[#allocation14 + $0x2c8] sm:$0xff] }
0x16e3   : > { %4867 = vmatprep.subr.bf16.mxu1 %v6564_v17  ;;  %v6558_v17 = vcombine.high %v4120_v13, %v4124_v51  ;;  %v6557_v21 = vcombine.low %v4120_v13, %v4124_v51  ;;  %v4053_v51 = vld [vmem:[#allocation14 + $0xb0] sm:$0xff] }
0x16e6   : > { %4868 = vmatpush1.bf16.msra.mxu1 %v6563_v48  ;;  %v4128_v48 = vld [vmem:[#allocation14 + $0x308] sm:$0xff] }
0x16e7   : > { %4869 = vmatprep.subr.bf16.mxu1 %v6572_v22  ;;  %v6566_v22 = vcombine.high %v4128_v48, %v4132_v18 }
0x16ea   : > { %4870 = vmatpush1.bf16.msra.mxu1 %v6571_v23  ;;  %v4136_v23 = vld [vmem:[#allocation14 + $0x348] sm:$0xff] }
0x1738   : > { %v7071_v4 = vpop.permute.xlu1 %7070 }
0x1739   : > { %v7073_v24 = vunpack.i.h.bf16 %v7071_v4  ;;  %v7072_v25 = vunpack.i.l.bf16 %v7071_v4  ;;  %v4140_v4 = vld [vmem:[#allocation14 + $0x368] sm:$0xff] }
0x173a   : > { %v6573_v26 = vcombine.low %v4136_v23, %v4140_v4 }
0x173b   : > { %v3780_v28 = vsel %vm1426_vm1, %v8754_v57, %v7073_v24  ;;  %v3781_v29 = vsel %vm1426_vm1, %v8794_v19, %v7072_v25  ;;  %v6485_v57 = vcombine.low %v4048_v36, %v4052_v47  ;;  %v6494_v19 = vcombine.high %v4056_v12, %v4060_v39  ;;  %v4152_v12 = vld [vmem:[#allocation14 + $0x3c8] sm:$0xff] }
0x173c   : > { %v3814_v30 = vpack.c.bf16 %v3780_v28, %v3780_v28  ;;  %v3815_v31 = vpack.c.bf16 %v3781_v29, %v3781_v29  ;;  %v6565_v24 = vcombine.low %v4128_v48, %v4132_v18  ;;  %v6574_v25 = vcombine.high %v4136_v23, %v4140_v4  ;;  %v4147_v28 = vld [vmem:[#allocation14 + $0x3a0] sm:$0xff]  ;;  %v4144_v29 = vld [vmem:[#allocation14 + $0x388] sm:$0xff]  ;;  %v4061_v23 = vld [vmem:[#allocation14 + $0xf0] sm:$0xff] }
0x173d   : > { %v4058_v4 = vld [vmem:[#allocation14 + $0xd8] sm:$0xff] }
0x173e   : > { %4020 = vmatprep.mubr.bf16.mxu0 %v3815_v31  ;;  %v4148_v31 = vld [vmem:[#allocation14 + $0x3a8] sm:$0xff] }
0x173f   : > { %4021 = vmatmul.mubr.bf16.vlgmr.msra.gmra.mrb[16].mxu0 %v3814_v30  ;;  %v6580_v30 = vcombine.high %v4143_v27, %v4147_v28  ;;  %v6581_v36 = vcombine.low %v4144_v29, %v4148_v31  ;;  %v6582_v47 = vcombine.high %v4144_v29, %v4148_v31  ;;  %v4065_v29 = vld [vmem:[#allocation14 + $0x110] sm:$0xff]  ;;  %v4066_v31 = vld [vmem:[#allocation14 + $0x118] sm:$0xff] }
0x1740   : > { %4885 = vmatpush1.bf16.msra.mxu0 %v6469_v54  ;;  %v4080_v54 = vld [vmem:[#allocation14 + $0x188] sm:$0xff] }
0x1741   : > { %4886 = vmatprep.subr.bf16.mxu0 %v6478_v33  ;;  %v6518_v55 = vcombine.high %v4080_v54, %v4084_v43  ;;  %v6517_v61 = vcombine.low %v4080_v54, %v4084_v43  ;;  %v6579_v33 = vcombine.low %v4143_v27, %v4147_v28  ;;  %4871 = vmatprep.subr.bf16.mxu1 %v6580_v30  ;;  %v4069_v30 = vld [vmem:[#allocation14 + $0x130] sm:$0xff] }
0x1743   : > { %4872 = vmatpush1.bf16.msra.mxu1 %v6579_v33  ;;  %v4070_v33 = vld [vmem:[#allocation14 + $0x138] sm:$0xff] }
0x1744   : > { %4887 = vmatpush1.bf16.msra.mxu0 %v6477_v11  ;;  %v4151_v11 = vld [vmem:[#allocation14 + $0x3c0] sm:$0xff] }
0x1745   : > { %4888 = vmatprep.subr.bf16.mxu0 %v6486_v56  ;;  %v4155_v56 = vld [vmem:[#allocation14 + $0x3e0] sm:$0xff] }
0x1746   : > { %v6588_v39 = vcombine.high %v4151_v11, %v4155_v56 }
0x1748   : > { %4889 = vmatpush1.bf16.msra.mxu0 %v6485_v57  ;;  %v4156_v57 = vld [vmem:[#allocation14 + $0x3e8] sm:$0xff]  ;;  %4873 = vmatprep.subr.bf16.mxu1 %v6588_v39  ;;  %v4077_v39 = vld [vmem:[#allocation14 + $0x170] sm:$0xff] }
0x1749   : > { %4890 = vmatprep.subr.bf16.mxu0 %v6494_v19  ;;  %v6587_v19 = vcombine.low %v4151_v11, %v4155_v56  ;;  %v6589_v40 = vcombine.low %v4152_v12, %v4156_v57  ;;  %v6590_v42 = vcombine.high %v4152_v12, %v4156_v57  ;;  %v6504_v11 = vcombine.high %v4065_v29, %v4069_v30  ;;  %v4073_v12 = vld [vmem:[#allocation14 + $0x150] sm:$0xff]  ;;  %v4074_v57 = vld [vmem:[#allocation14 + $0x158] sm:$0xff] }
0x174a   : > { %v6506_v56 = vcombine.high %v4066_v31, %v4070_v33 }
0x174b   : > { %4874 = vmatpush1.bf16.msra.mxu1 %v6587_v19  ;;  %v4078_v19 = vld [vmem:[#allocation14 + $0x178] sm:$0xff] }
0x174c   : > { %4891 = vmatpush1.bf16.msra.mxu0 %v6493_v44  ;;  %v4033_v44 = vld [vmem:[#allocation14 + $0x10] sm:$0xff] }
0x174d   : > { %4892 = vmatprep.subr.bf16.mxu0 %v6502_v14  ;;  %v4037_v14 = vld [vmem:[#allocation14 + $0x30] sm:$0xff] }
0x174e   : > { %v6472_v60 = vcombine.high %v4033_v44, %v4037_v14 }
0x1750   : > { %4893 = vmatpush1.bf16.msra.mxu0 %v6501_v20  ;;  %v4038_v20 = vld [vmem:[#allocation14 + $0x38] sm:$0xff]  ;;  %4925 = vmatprep.subr.bf16.mxu1 %v6472_v60  ;;  %v4085_v60 = vld [vmem:[#allocation14 + $0x1b0] sm:$0xff] }
0x1751   : > { %4894 = vmatprep.subr.bf16.mxu0 %v6510_v15  ;;  %v6471_v15 = vcombine.low %v4033_v44, %v4037_v14  ;;  %v6473_v54 = vcombine.low %v4034_v46, %v4038_v20  ;;  %v6474_v43 = vcombine.high %v4034_v46, %v4038_v20  ;;  %v6512_v44 = vcombine.high %v4073_v12, %v4077_v39  ;;  %v4081_v46 = vld [vmem:[#allocation14 + $0x190] sm:$0xff]  ;;  %v4082_v20 = vld [vmem:[#allocation14 + $0x198] sm:$0xff] }
0x1752   : > { %v6514_v14 = vcombine.high %v4074_v57, %v4078_v19 }
0x1754   : > { %4895 = vmatpush1.bf16.msra.mxu0 %v6509_v50  ;;  %v3816_v50 = vld [vmem:[%s8981_s0] sm:$0x3]  ;;  %s8076_s0 = smov [#allocation19]  }
0x1755   : > { %4896 = vmatprep.subr.bf16.mxu0 %v6518_v55  ;;  %v3821_v55 = vrot.slane %v3816_v50, %v8541_v9  ;;  %v3825_v52 = vrot.slane %v3816_v50, %v8595_v35  ;;  %v6520_v50 = vcombine.high %v4081_v46, %v4085_v60  ;;  %s7970_s9 = sshll.u32 %s8076_s0, 4  ;;  %s7971_s9 = int_to_ptr.vmem [resolvable:$false] %s7970_s9 }
0x1756   : > { %s7972_s5 = scalar_lea.vmem %s7971_s9, 512  ;;  %p7973_p10 = scmp.lt.s32.totalorder %s8875_s30, %s7971_s9 }
0x1757   : > { %p7974_p11 = scmp.lt.s32.totalorder %s7972_s5, %s7966_s18 }
0x1758   : > { %4897 = vmatpush1.bf16.msra.mxu0 %v6517_v61 }
0x1759   : > { %4898 = vmatprep.subr.bf16.mxu0 %v6526_v62  ;;  %p7975_p3 = por %p7974_p11, %p7973_p10 }
0x175b   : > { %p7976_p5 = pnand %p7975_p3, %p7969_p6 }
0x175c   : > { %4899 = vmatpush1.bf16.msra.mxu0 %v6525_v16 }
0x175d   : > { %4900 = vmatprep.subr.bf16.mxu0 %v6534_v63 }
0x1760   : > { %4901 = vmatpush1.bf16.msra.mxu0 %v6533_v3  ;;  %v4045_v3 = vld [vmem:[#allocation14 + $0x70] sm:$0xff] }
0x1761   : > { %4902 = vmatprep.subr.bf16.mxu0 %v6542_v8  ;;  %v4042_v8 = vld [vmem:[#allocation14 + $0x58] sm:$0xff] }
0x1762   : > { %v6482_v13 = vcombine.high %v4042_v8, %v4046_v45  ;;  %v6481_v48 = vcombine.low %v4042_v8, %v4046_v45  ;;  %v4101_v8 = vld [vmem:[#allocation14 + $0x230] sm:$0xff]  ;;  %v4098_v45 = vld [vmem:[#allocation14 + $0x218] sm:$0xff] }
0x1764   : > { %4903 = vmatpush1.bf16.msra.mxu0 %v6541_v5 }
0x1765   : > { %4904 = vmatprep.subr.bf16.mxu0 %v6550_v10  ;;  %v4049_v10 = vld [vmem:[#allocation14 + $0x90] sm:$0xff] }
0x1766   : > { %v6488_v18 = vcombine.high %v4049_v10, %v4053_v51 }
0x1768   : > { %4905 = vmatpush1.bf16.msra.mxu0 %v6549_v41  ;;  %v4050_v41 = vld [vmem:[#allocation14 + $0x98] sm:$0xff] }
0x1769   : > { %4906 = vmatprep.subr.bf16.mxu0 %v6558_v17  ;;  %v6479_v17 = vcombine.low %v4041_v2, %v4045_v3 }
0x176c   : > { %4907 = vmatpush1.bf16.msra.mxu0 %v6557_v21 }
0x176d   : > { %4908 = vmatprep.subr.bf16.mxu0 %v6566_v22  ;;  %v4057_v22 = vld [vmem:[#allocation14 + $0xd0] sm:$0xff] }
0x176e   : > { %v6496_v27 = vcombine.high %v4057_v22, %v4061_v23 }
0x1770   : > { %4909 = vmatpush1.bf16.msra.mxu0 %v6565_v24  ;;  %v4062_v24 = vld [vmem:[#allocation14 + $0xf8] sm:$0xff] }
0x1771   : > { %4910 = vmatprep.subr.bf16.mxu0 %v6574_v25  ;;  %v6487_v25 = vcombine.low %v4049_v10, %v4053_v51  ;;  %v6498_v28 = vcombine.high %v4058_v4, %v4062_v24 }
0x1774   : > { %4911 = vmatpush1.bf16.msra.mxu0 %v6573_v26 }
0x1775   : > { %4912 = vmatprep.subr.bf16.mxu0 %v6582_v47  ;;  %v6497_v47 = vcombine.low %v4058_v4, %v4062_v24  ;;  %v4113_v4 = vld [vmem:[#allocation14 + $0x290] sm:$0xff] }
0x1776   : > { %v4117_v24 = vld [vmem:[#allocation14 + $0x2b0] sm:$0xff] }
0x1778   : > { %4913 = vmatpush1.bf16.msra.mxu0 %v6581_v36  ;;  %v6495_v36 = vcombine.low %v4057_v22, %v4061_v23 }
0x1779   : > { %4914 = vmatprep.subr.bf16.mxu0 %v6590_v42  ;;  %v6505_v42 = vcombine.low %v4066_v31, %v4070_v33  ;;  %v4121_v31 = vld [vmem:[#allocation14 + $0x2d0] sm:$0xff] }
0x177a   : > { %v4125_v33 = vld [vmem:[#allocation14 + $0x2f0] sm:$0xff] }
0x177c   : > { %4915 = vmatpush1.bf16.msra.mxu0 %v6589_v40  ;;  %v6503_v40 = vcombine.low %v4065_v29, %v4069_v30  ;;  %v6552_v29 = vcombine.high %v4113_v4, %v4117_v24 }
0x177d   : > { %4966 = vmatprep.subr.bf16.mxu0 %v6474_v43  ;;  %v6513_v43 = vcombine.low %v4074_v57, %v4078_v19  ;;  %v4129_v57 = vld [vmem:[#allocation14 + $0x310] sm:$0xff] }
0x177e   : > { %v4133_v19 = vld [vmem:[#allocation14 + $0x330] sm:$0xff] }
0x1812   : > { %v4022_v59 = vpop.f32.mrb[16].mxu0 }
0x1813   : > { %v4023_v61 = vadd.f32 %v4022_v59, %v3821_v55  ;;  %v4024_v62 = vpop.f32.mrb[17].mxu0  ;;  %v4093_v59 = vld [vmem:[#allocation14 + $0x1f0] sm:$0xff] }
0x1814   : > { %v4025_v53 = vadd.f32 %v4024_v62, %v3825_v52  ;;  %v4026_v58 = vpop.f32.mrb[18].mxu0  ;;  %v4089_v52 = vld [vmem:[#allocation14 + $0x1d0] sm:$0xff]  ;;  %v4094_v62 = vld [vmem:[#allocation14 + $0x1f8] sm:$0xff] }
0x1815   : > { %v8826_v16 = vadd.f32 %v4023_v61, %v8664_v32  ;;  %v4027_v63 = vpop.f32.mrb[19].mxu0  ;;  %v6480_v32 = vcombine.high %v4041_v2, %v4045_v3  ;;  %v4090_v61 = vld [vmem:[#allocation14 + $0x1d8] sm:$0xff]  ;;  %v4097_v3 = vld [vmem:[#allocation14 + $0x210] sm:$0xff]  ;;  %v6527_v10 = vcombine.low %v4089_v52, %v4093_v59 }
0x1816   : > { %v8829_v0 = vadd.f32 %v4025_v53, %v8667_v38  ;;  %v4054_v38 = vld [vmem:[#allocation14 + $0xb8] sm:$0xff]  ;;  %v6519_v53 = vcombine.low %v4081_v46, %v4085_v60  ;;  %v6528_v63 = vcombine.high %v4089_v52, %v4093_v59  ;;  %v6530_v2 = vcombine.high %v4090_v61, %v4094_v62 }
0x1817   : > { %v8835_v5 = vpack.c.bf16 %v8826_v16, %v8826_v16  ;;  %v6490_v21 = vcombine.high %v4050_v41, %v4054_v38  ;;  %v6489_v26 = vcombine.low %v4050_v41, %v4054_v38  ;;  %v4105_v41 = vld [vmem:[#allocation14 + $0x250] sm:$0xff]  ;;  %v6568_v46 = vcombine.high %v4129_v57, %v4133_v19 }
0x1818   : > { %v4160_v49 = vpack.c.bf16 %v8829_v0, %v8829_v0  ;;  %v4109_v38 = vld [vmem:[#allocation14 + $0x270] sm:$0xff] }
0x1819   : > { %v6544_v22 = vcombine.high %v4105_v41, %v4109_v38 }
0x181a   : > { %4875 = vmatprep.mubr.bf16.mxu1 %v4160_v49  ;;  %4916 = vmatprep.mubr.bf16.mxu0 %v4160_v49 }
0x181b   : > { %4876 = vmatmul.mubr.bf16.vlgmr.msra.gmra.mrb[44].mxu1 %v8835_v5  ;;  %4917 = vmatmul.mubr.bf16.vlgmr.msra.gmra.mrb[20].mxu0 %v8835_v5 }
0x181c   : > { %4926 = vmatpush1.bf16.msra.mxu1 %v6471_v15  ;;  %4967 = vmatpush1.bf16.msra.mxu0 %v6473_v54  ;;  %v4086_v15 = vld [vmem:[#allocation14 + $0x1b8] sm:$0xff]  ;;  %v6511_v54 = vcombine.low %v4073_v12, %v4077_v39  ;;  %v6560_v12 = vcombine.high %v4121_v31, %v4125_v33 }
0x181d   : > { %4957 = vmatprep.mubr.bf16.mxu1 %v4160_v49  ;;  %4998 = vmatprep.mubr.bf16.mxu0 %v4160_v49  ;;  %v6522_v55 = vcombine.high %v4082_v20, %v4086_v15  ;;  %v6521_v58 = vcombine.low %v4082_v20, %v4086_v15  ;;  %v4102_v49 = vld [vmem:[#allocation14 + $0x238] sm:$0xff]  ;;  %v4137_v20 = vld [vmem:[#allocation14 + $0x350] sm:$0xff] }
0x181e   : > { %4927 = vmatprep.subr.bf16.mxu1 %v6480_v32  ;;  %4968 = vmatprep.subr.bf16.mxu0 %v6482_v13  ;;  %v6529_v32 = vcombine.low %v4090_v61, %v4094_v62  ;;  %v6536_v13 = vcombine.high %v4097_v3, %v4101_v8  ;;  %v6538_v51 = vcombine.high %v4098_v45, %v4102_v49  ;;  %v4141_v15 = vld [vmem:[#allocation14 + $0x370] sm:$0xff] }
0x181f   : > { %v6576_v52 = vcombine.high %v4137_v20, %v4141_v15  ;;  %v4145_v61 = vld [vmem:[#allocation14 + $0x390] sm:$0xff] }
0x1820   : > { %4928 = vmatpush1.bf16.msra.mxu1 %v6479_v17  ;;  %4969 = vmatpush1.bf16.msra.mxu0 %v6481_v48  ;;  %v4106_v17 = vld [vmem:[#allocation14 + $0x258] sm:$0xff]  ;;  %v4149_v62 = vld [vmem:[#allocation14 + $0x3b0] sm:$0xff] }
0x1821   : > { %4929 = vmatprep.subr.bf16.mxu1 %v6488_v18  ;;  %4970 = vmatprep.subr.bf16.mxu0 %v6490_v21  ;;  %v4110_v48 = vld [vmem:[#allocation14 + $0x278] sm:$0xff]  ;;  %v6535_v18 = vcombine.low %v4097_v3, %v4101_v8  ;;  %v6537_v21 = vcombine.low %v4098_v45, %v4102_v49  ;;  %v6584_v3 = vcombine.high %v4145_v61, %v4149_v62  ;;  %v4153_v45 = vld [vmem:[#allocation14 + $0x3d0] sm:$0xff] }
0x1822   : > { %v6546_v23 = vcombine.high %v4106_v17, %v4110_v48  ;;  %v4157_v49 = vld [vmem:[#allocation14 + $0x3f0] sm:$0xff] }
0x1824   : > { %4930 = vmatpush1.bf16.msra.mxu1 %v6487_v25  ;;  %4971 = vmatpush1.bf16.msra.mxu0 %v6489_v26  ;;  %v4114_v25 = vld [vmem:[#allocation14 + $0x298] sm:$0xff] }
0x1825   : > { %4931 = vmatprep.subr.bf16.mxu1 %v6496_v27  ;;  %4972 = vmatprep.subr.bf16.mxu0 %v6498_v28  ;;  %v4118_v26 = vld [vmem:[#allocation14 + $0x2b8] sm:$0xff]  ;;  %v6543_v27 = vcombine.low %v4105_v41, %v4109_v38  ;;  %v6545_v28 = vcombine.low %v4106_v17, %v4110_v48  ;;  %v6592_v41 = vcombine.high %v4153_v45, %v4157_v49 }
0x1826   : > { %v6554_v30 = vcombine.high %v4114_v25, %v4118_v26  ;;  %v6591_v17 = vcombine.low %v4153_v45, %v4157_v49  ;;  %v7529_v45 = vld [vmem:[#allocation17 + $0x1b4] ss:$8 sps:$4 sm:$0xff]   ;;  %v7524_v49 = vld [vmem:[#allocation17 + $0xb0] ss:$8 sps:$4 sm:$0xff]  }
0x1828   : > { %4932 = vmatpush1.bf16.msra.mxu1 %v6495_v36  ;;  %4973 = vmatpush1.bf16.msra.mxu0 %v6497_v47  ;;  %v4122_v36 = vld [vmem:[#allocation14 + $0x2d8] sm:$0xff] }
0x1829   : > { %4933 = vmatprep.subr.bf16.mxu1 %v6504_v11  ;;  %4974 = vmatprep.subr.bf16.mxu0 %v6506_v56  ;;  %v4126_v47 = vld [vmem:[#allocation14 + $0x2f8] sm:$0xff]  ;;  %v6551_v11 = vcombine.low %v4113_v4, %v4117_v24  ;;  %v6553_v56 = vcombine.low %v4114_v25, %v4118_v26 }
0x182a   : > { %v6562_v39 = vcombine.high %v4122_v36, %v4126_v47  ;;  %v7466_v4 = vld [vmem:[#allocation17 + $0x14] ss:$8 sps:$4 sm:$0xff]   ;;  %v7464_v25 = vld [vmem:[#allocation17 + $0x10] ss:$8 sps:$4 sm:$0xff]  }
0x182b   : > { %v7469_v24 = vld [vmem:[#allocation17 + $0x114] ss:$8 sps:$4 sm:$0xff]   ;;  %v7467_v26 = vld [vmem:[#allocation17 + $0x110] ss:$8 sps:$4 sm:$0xff]  }
0x182c   : > { %4934 = vmatpush1.bf16.msra.mxu1 %v6503_v40  ;;  %4975 = vmatpush1.bf16.msra.mxu0 %v6505_v42  ;;  %v4130_v40 = vld [vmem:[#allocation14 + $0x318] sm:$0xff] }
0x182d   : > { %4935 = vmatprep.subr.bf16.mxu1 %v6512_v44  ;;  %4976 = vmatprep.subr.bf16.mxu0 %v6514_v14  ;;  %v4134_v42 = vld [vmem:[#allocation14 + $0x338] sm:$0xff]  ;;  %v6559_v44 = vcombine.low %v4121_v31, %v4125_v33  ;;  %v6561_v14 = vcombine.low %v4122_v36, %v4126_v47  ;;  %v7484_v47 = vld [vmem:[#allocation17 + $0x44] ss:$8 sps:$4 sm:$0xff]  }
0x182e   : > { %v6570_v60 = vcombine.high %v4130_v40, %v4134_v42  ;;  %v7478_v31 = vld [vmem:[#allocation17 + $0x34] ss:$8 sps:$4 sm:$0xff]   ;;  %v7476_v36 = vld [vmem:[#allocation17 + $0x30] ss:$8 sps:$4 sm:$0xff]  }
0x182f   : > { %v7481_v33 = vld [vmem:[#allocation17 + $0x134] ss:$8 sps:$4 sm:$0xff]  }
0x1830   : > { %4936 = vmatpush1.bf16.msra.mxu1 %v6511_v54  ;;  %4977 = vmatpush1.bf16.msra.mxu0 %v6513_v43  ;;  %v4138_v54 = vld [vmem:[#allocation14 + $0x358] sm:$0xff] }
0x1831   : > { %4937 = vmatprep.subr.bf16.mxu1 %v6520_v50  ;;  %4978 = vmatprep.subr.bf16.mxu0 %v6522_v55  ;;  %v4142_v43 = vld [vmem:[#allocation14 + $0x378] sm:$0xff]  ;;  %v6567_v50 = vcombine.low %v4129_v57, %v4133_v19  ;;  %v6569_v55 = vcombine.low %v4130_v40, %v4134_v42  ;;  %v7496_v42 = vld [vmem:[#allocation17 + $0x64] ss:$8 sps:$4 sm:$0xff]  }
0x1832   : > { %v6578_v59 = vcombine.high %v4138_v54, %v4142_v43  ;;  %v7493_v57 = vld [vmem:[#allocation17 + $0x154] ss:$8 sps:$4 sm:$0xff]   ;;  %v7488_v19 = vld [vmem:[#allocation17 + $0x50] ss:$8 sps:$4 sm:$0xff]  }
0x1833   : > { %v7491_v40 = vld [vmem:[#allocation17 + $0x150] ss:$8 sps:$4 sm:$0xff]  }
0x1834   : > { %4938 = vmatpush1.bf16.msra.mxu1 %v6519_v53  ;;  %4979 = vmatpush1.bf16.msra.mxu0 %v6521_v58  ;;  %v4146_v53 = vld [vmem:[#allocation14 + $0x398] sm:$0xff] }
0x1835   : > { %4939 = vmatprep.subr.bf16.mxu1 %v6528_v63  ;;  %4980 = vmatprep.subr.bf16.mxu0 %v6530_v2  ;;  %v4150_v58 = vld [vmem:[#allocation14 + $0x3b8] sm:$0xff]  ;;  %v6575_v63 = vcombine.low %v4137_v20, %v4141_v15  ;;  %v6577_v2 = vcombine.low %v4138_v54, %v4142_v43  ;;  %v7508_v43 = vld [vmem:[#allocation17 + $0x84] ss:$8 sps:$4 sm:$0xff]  }
0x1836   : > { %v6586_v8 = vcombine.high %v4146_v53, %v4150_v58  ;;  %v7505_v20 = vld [vmem:[#allocation17 + $0x174] ss:$8 sps:$4 sm:$0xff]   ;;  %v7500_v15 = vld [vmem:[#allocation17 + $0x70] ss:$8 sps:$4 sm:$0xff]  }
0x1837   : > { %v7503_v54 = vld [vmem:[#allocation17 + $0x170] ss:$8 sps:$4 sm:$0xff]  }
0x1838   : > { %4940 = vmatpush1.bf16.msra.mxu1 %v6527_v10  ;;  %4981 = vmatpush1.bf16.msra.mxu0 %v6529_v32  ;;  %v4154_v10 = vld [vmem:[#allocation14 + $0x3d8] sm:$0xff] }
0x1839   : > { %4941 = vmatprep.subr.bf16.mxu1 %v6536_v13  ;;  %4982 = vmatprep.subr.bf16.mxu0 %v6538_v51  ;;  %v4158_v32 = vld [vmem:[#allocation14 + $0x3f8] sm:$0xff]  ;;  %v6583_v13 = vcombine.low %v4145_v61, %v4149_v62  ;;  %v6585_v51 = vcombine.low %v4146_v53, %v4150_v58  ;;  %v7520_v58 = vld [vmem:[#allocation17 + $0xa4] ss:$8 sps:$4 sm:$0xff]  }
0x183a   : > { %v6594_v38 = vcombine.high %v4154_v10, %v4158_v32  ;;  %v6593_v48 = vcombine.low %v4154_v10, %v4158_v32  ;;  %v7517_v61 = vld [vmem:[#allocation17 + $0x194] ss:$8 sps:$4 sm:$0xff]   ;;  %v7512_v62 = vld [vmem:[#allocation17 + $0x90] ss:$8 sps:$4 sm:$0xff]   ;;  %v7532_v32 = vld [vmem:[#allocation17 + $0xc4] ss:$8 sps:$4 sm:$0xff]  }
0x183b   : > { %v7515_v53 = vld [vmem:[#allocation17 + $0x190] ss:$8 sps:$4 sm:$0xff]  }
0x183c   : > { %4942 = vmatpush1.bf16.msra.mxu1 %v6535_v18  ;;  %4983 = vmatpush1.bf16.msra.mxu0 %v6537_v21  ;;  %v7460_v18 = vld [vmem:[#allocation17 + $0x4] ss:$8 sps:$4 sm:$0xff]   ;;  %v7527_v10 = vld [vmem:[#allocation17 + $0x1b0] ss:$8 sps:$4 sm:$0xff]  }
0x183d   : > { %4943 = vmatprep.subr.bf16.mxu1 %v6544_v22  ;;  %4984 = vmatprep.subr.bf16.mxu0 %v6546_v23  ;;  %v7463_v21 = vld [vmem:[#allocation17 + $0x104] ss:$8 sps:$4 sm:$0xff]   ;;  %v7458_v22 = vld [vmem:[#allocation17] ss:$8 sps:$4 sm:$0xff]  }
0x183e   : > { %v7461_v23 = vld [vmem:[#allocation17 + $0x100] ss:$8 sps:$4 sm:$0xff]  }
0x1840   : > { %4944 = vmatpush1.bf16.msra.mxu1 %v6543_v27  ;;  %4985 = vmatpush1.bf16.msra.mxu0 %v6545_v28  ;;  %v7472_v27 = vld [vmem:[#allocation17 + $0x24] ss:$8 sps:$4 sm:$0xff]  }
0x1841   : > { %4945 = vmatprep.subr.bf16.mxu1 %v6552_v29  ;;  %4986 = vmatprep.subr.bf16.mxu0 %v6554_v30  ;;  %v7475_v28 = vld [vmem:[#allocation17 + $0x124] ss:$8 sps:$4 sm:$0xff]   ;;  %v7470_v29 = vld [vmem:[#allocation17 + $0x20] ss:$8 sps:$4 sm:$0xff]  }
0x1842   : > { %v7473_v30 = vld [vmem:[#allocation17 + $0x120] ss:$8 sps:$4 sm:$0xff]  }
0x1844   : > { %4946 = vmatpush1.bf16.msra.mxu1 %v6551_v11  ;;  %4987 = vmatpush1.bf16.msra.mxu0 %v6553_v56  ;;  %v7487_v11 = vld [vmem:[#allocation17 + $0x144] ss:$8 sps:$4 sm:$0xff]   ;;  %v7482_v56 = vld [vmem:[#allocation17 + $0x40] ss:$8 sps:$4 sm:$0xff]  }
0x1845   : > { %4947 = vmatprep.subr.bf16.mxu1 %v6560_v12  ;;  %4988 = vmatprep.subr.bf16.mxu0 %v6562_v39  ;;  %v7485_v12 = vld [vmem:[#allocation17 + $0x140] ss:$8 sps:$4 sm:$0xff]   ;;  %v7490_v39 = vld [vmem:[#allocation17 + $0x54] ss:$8 sps:$4 sm:$0xff]  }
0x1848   : > { %4948 = vmatpush1.bf16.msra.mxu1 %v6559_v44  ;;  %4989 = vmatpush1.bf16.msra.mxu0 %v6561_v14  ;;  %v7499_v44 = vld [vmem:[#allocation17 + $0x164] ss:$8 sps:$4 sm:$0xff]   ;;  %v7494_v14 = vld [vmem:[#allocation17 + $0x60] ss:$8 sps:$4 sm:$0xff]  }
0x1849   : > { %4949 = vmatprep.subr.bf16.mxu1 %v6568_v46  ;;  %4990 = vmatprep.subr.bf16.mxu0 %v6570_v60  ;;  %v7497_v46 = vld [vmem:[#allocation17 + $0x160] ss:$8 sps:$4 sm:$0xff]   ;;  %v7502_v60 = vld [vmem:[#allocation17 + $0x74] ss:$8 sps:$4 sm:$0xff]  }
0x184c   : > { %4950 = vmatpush1.bf16.msra.mxu1 %v6567_v50  ;;  %4991 = vmatpush1.bf16.msra.mxu0 %v6569_v55  ;;  %v7511_v50 = vld [vmem:[#allocation17 + $0x184] ss:$8 sps:$4 sm:$0xff]   ;;  %v7506_v55 = vld [vmem:[#allocation17 + $0x80] ss:$8 sps:$4 sm:$0xff]  }
0x184d   : > { %4951 = vmatprep.subr.bf16.mxu1 %v6576_v52  ;;  %4992 = vmatprep.subr.bf16.mxu0 %v6578_v59  ;;  %v7509_v52 = vld [vmem:[#allocation17 + $0x180] ss:$8 sps:$4 sm:$0xff]   ;;  %v7514_v59 = vld [vmem:[#allocation17 + $0x94] ss:$8 sps:$4 sm:$0xff]  }
0x1850   : > { %4952 = vmatpush1.bf16.msra.mxu1 %v6575_v63  ;;  %4993 = vmatpush1.bf16.msra.mxu0 %v6577_v2  ;;  %v7523_v63 = vld [vmem:[#allocation17 + $0x1a4] ss:$8 sps:$4 sm:$0xff]   ;;  %v7518_v2 = vld [vmem:[#allocation17 + $0xa0] ss:$8 sps:$4 sm:$0xff]  }
0x1851   : > { %4953 = vmatprep.subr.bf16.mxu1 %v6584_v3  ;;  %4994 = vmatprep.subr.bf16.mxu0 %v6586_v8  ;;  %v7521_v3 = vld [vmem:[#allocation17 + $0x1a0] ss:$8 sps:$4 sm:$0xff]   ;;  %v7526_v8 = vld [vmem:[#allocation17 + $0xb4] ss:$8 sps:$4 sm:$0xff]  }
0x1854   : > { %4954 = vmatpush1.bf16.msra.mxu1 %v6583_v13  ;;  %4995 = vmatpush1.bf16.msra.mxu0 %v6585_v51  ;;  %v7535_v13 = vld [vmem:[#allocation17 + $0x1c4] ss:$8 sps:$4 sm:$0xff]   ;;  %v7530_v51 = vld [vmem:[#allocation17 + $0xc0] ss:$8 sps:$4 sm:$0xff]  }
0x1855   : > { %4955 = vmatprep.subr.bf16.mxu1 %v6592_v41  ;;  %4996 = vmatprep.subr.bf16.mxu0 %v6594_v38  ;;  %v7533_v41 = vld [vmem:[#allocation17 + $0x1c0] ss:$8 sps:$4 sm:$0xff]   ;;  %v7538_v38 = vld [vmem:[#allocation17 + $0xd4] ss:$8 sps:$4 sm:$0xff]  }
0x1858   : > { %4956 = vmatpush1.bf16.msra.mxu1 %v6591_v17  ;;  %4997 = vmatpush1.bf16.msra.mxu0 %v6593_v48  ;;  %v7541_v17 = vld [vmem:[#allocation17 + $0x1d4] ss:$8 sps:$4 sm:$0xff]   ;;  %v7536_v48 = vld [vmem:[#allocation17 + $0xd0] ss:$8 sps:$4 sm:$0xff]  }
0x1859   : > { %5803 = vmatprep.subr.bf16.mxu1 %v7460_v18  ;;  %5844 = vmatprep.subr.bf16.mxu0 %v7463_v21  ;;  %v7539_v18 = vld [vmem:[#allocation17 + $0x1d0] ss:$8 sps:$4 sm:$0xff]   ;;  %v7544_v21 = vld [vmem:[#allocation17 + $0xe4] ss:$8 sps:$4 sm:$0xff]  }
0x185b   : > { %4958 = vmatmul.mubr.bf16.vlgmr.msra.gmra.mrb[48].mxu1 %v8835_v5  ;;  %4999 = vmatmul.mubr.bf16.vlgmr.msra.gmra.mrb[24].mxu0 %v8835_v5  ;;  %v7479_v5 = vld [vmem:[#allocation17 + $0x130] ss:$8 sps:$4 sm:$0xff]  }
0x185c   : > { %5804 = vmatpush1.bf16.msra.mxu1 %v7458_v22  ;;  %5845 = vmatpush1.bf16.msra.mxu0 %v7461_v23  ;;  %v7547_v22 = vld [vmem:[#allocation17 + $0x1e4] ss:$8 sps:$4 sm:$0xff]   ;;  %v7542_v23 = vld [vmem:[#allocation17 + $0xe0] ss:$8 sps:$4 sm:$0xff]  }
0x185d   : > { %5805 = vmatprep.subr.bf16.mxu1 %v7466_v4  ;;  %5846 = vmatprep.subr.bf16.mxu0 %v7469_v24  ;;  %v7545_v4 = vld [vmem:[#allocation17 + $0x1e0] ss:$8 sps:$4 sm:$0xff]   ;;  %v7550_v24 = vld [vmem:[#allocation17 + $0xf4] ss:$8 sps:$4 sm:$0xff]  }
0x1860   : > { %5806 = vmatpush1.bf16.msra.mxu1 %v7464_v25  ;;  %5847 = vmatpush1.bf16.msra.mxu0 %v7467_v26  ;;  %v7553_v25 = vld [vmem:[#allocation17 + $0x1f4] ss:$8 sps:$4 sm:$0xff]   ;;  %v7548_v26 = vld [vmem:[#allocation17 + $0xf0] ss:$8 sps:$4 sm:$0xff]  }
0x1861   : > { %5807 = vmatprep.subr.bf16.mxu1 %v7472_v27  ;;  %5848 = vmatprep.subr.bf16.mxu0 %v7475_v28  ;;  %v7551_v27 = vld [vmem:[#allocation17 + $0x1f0] ss:$8 sps:$4 sm:$0xff]   ;;  %v7556_v28 = vld [vmem:[#allocation17 + $0x204] ss:$8 sps:$4 sm:$0xff]  }
0x1864   : > { %5808 = vmatpush1.bf16.msra.mxu1 %v7470_v29  ;;  %5849 = vmatpush1.bf16.msra.mxu0 %v7473_v30  ;;  %v7559_v29 = vld [vmem:[#allocation17 + $0x304] ss:$8 sps:$4 sm:$0xff]   ;;  %v8841_v30 = vld [vmem:[#allocation16] sm:$0xff] }
0x1865   : > { %5809 = vmatprep.subr.bf16.mxu1 %v7478_v31  ;;  %5850 = vmatprep.subr.bf16.mxu0 %v7481_v33  ;;  %v4166_v31 = vrot.slane %v8841_v30, %v8541_v9  ;;  %v4174_v33 = vrot.slane %v8841_v30, %v8533_v7 }
0x1868   : > { %5810 = vmatpush1.bf16.msra.mxu1 %v7476_v36  ;;  %5851 = vmatpush1.bf16.msra.mxu0 %v7479_v5  ;;  %v4170_v36 = vrot.slane %v8841_v30, %v8595_v35  ;;  %v4178_v5 = vrot.slane %v8841_v30, %v8592_v34  ;;  %v7557_v34 = vld [vmem:[#allocation17 + $0x300] ss:$8 sps:$4 sm:$0xff]  }
0x1869   : > { %5811 = vmatprep.subr.bf16.mxu1 %v7484_v47  ;;  %5852 = vmatprep.subr.bf16.mxu0 %v7487_v11 }
0x186c   : > { %5812 = vmatpush1.bf16.msra.mxu1 %v7482_v56  ;;  %5853 = vmatpush1.bf16.msra.mxu0 %v7485_v12 }
0x186d   : > { %5813 = vmatprep.subr.bf16.mxu1 %v7490_v39  ;;  %5854 = vmatprep.subr.bf16.mxu0 %v7493_v57 }
0x1870   : > { %5814 = vmatpush1.bf16.msra.mxu1 %v7488_v19  ;;  %5855 = vmatpush1.bf16.msra.mxu0 %v7491_v40 }
0x1871   : > { %5815 = vmatprep.subr.bf16.mxu1 %v7496_v42  ;;  %5856 = vmatprep.subr.bf16.mxu0 %v7499_v44 }
0x1874   : > { %5816 = vmatpush1.bf16.msra.mxu1 %v7494_v14  ;;  %5857 = vmatpush1.bf16.msra.mxu0 %v7497_v46 }
0x1875   : > { %5817 = vmatprep.subr.bf16.mxu1 %v7502_v60  ;;  %5858 = vmatprep.subr.bf16.mxu0 %v7505_v20 }
0x1878   : > { %5818 = vmatpush1.bf16.msra.mxu1 %v7500_v15  ;;  %5859 = vmatpush1.bf16.msra.mxu0 %v7503_v54 }
0x1879   : > { %5819 = vmatprep.subr.bf16.mxu1 %v7508_v43  ;;  %5860 = vmatprep.subr.bf16.mxu0 %v7511_v50  ;;  %v7554_v50 = vld [vmem:[#allocation17 + $0x200] ss:$8 sps:$4 sm:$0xff]  }
0x187c   : > { %5820 = vmatpush1.bf16.msra.mxu1 %v7506_v55  ;;  %5861 = vmatpush1.bf16.msra.mxu0 %v7509_v52 }
0x187d   : > { %5821 = vmatprep.subr.bf16.mxu1 %v7514_v59  ;;  %5862 = vmatprep.subr.bf16.mxu0 %v7517_v61  ;;  %v7562_v59 = vld [vmem:[#allocation17 + $0x214] ss:$8 sps:$4 sm:$0xff]  }
0x187e   : > { %v7565_v61 = vld [vmem:[#allocation17 + $0x314] ss:$8 sps:$4 sm:$0xff]  }
0x1880   : > { %5822 = vmatpush1.bf16.msra.mxu1 %v7512_v62  ;;  %5863 = vmatpush1.bf16.msra.mxu0 %v7515_v53  ;;  %v7560_v62 = vld [vmem:[#allocation17 + $0x210] ss:$8 sps:$4 sm:$0xff]  }
0x1881   : > { %5823 = vmatprep.subr.bf16.mxu1 %v7520_v58  ;;  %5864 = vmatprep.subr.bf16.mxu0 %v7523_v63  ;;  %v7563_v53 = vld [vmem:[#allocation17 + $0x310] ss:$8 sps:$4 sm:$0xff]   ;;  %v7568_v58 = vld [vmem:[#allocation17 + $0x224] ss:$8 sps:$4 sm:$0xff]  }
0x1882   : > { %v7571_v63 = vld [vmem:[#allocation17 + $0x324] ss:$8 sps:$4 sm:$0xff]  }
0x1884   : > { %5824 = vmatpush1.bf16.msra.mxu1 %v7518_v2  ;;  %5865 = vmatpush1.bf16.msra.mxu0 %v7521_v3  ;;  %v7566_v2 = vld [vmem:[#allocation17 + $0x220] ss:$8 sps:$4 sm:$0xff]  }
0x1885   : > { %5825 = vmatprep.subr.bf16.mxu1 %v7526_v8  ;;  %5866 = vmatprep.subr.bf16.mxu0 %v7529_v45  ;;  %v7569_v3 = vld [vmem:[#allocation17 + $0x320] ss:$8 sps:$4 sm:$0xff]   ;;  %v7574_v8 = vld [vmem:[#allocation17 + $0x234] ss:$8 sps:$4 sm:$0xff]  }
0x1886   : > { %v7577_v45 = vld [vmem:[#allocation17 + $0x334] ss:$8 sps:$4 sm:$0xff]  }
0x1888   : > { %5826 = vmatpush1.bf16.msra.mxu1 %v7524_v49  ;;  %5867 = vmatpush1.bf16.msra.mxu0 %v7527_v10  ;;  %v7572_v49 = vld [vmem:[#allocation17 + $0x230] ss:$8 sps:$4 sm:$0xff]  }
0x1889   : > { %5827 = vmatprep.subr.bf16.mxu1 %v7532_v32  ;;  %5868 = vmatprep.subr.bf16.mxu0 %v7535_v13  ;;  %v7575_v10 = vld [vmem:[#allocation17 + $0x330] ss:$8 sps:$4 sm:$0xff]   ;;  %v7580_v32 = vld [vmem:[#allocation17 + $0x244] ss:$8 sps:$4 sm:$0xff]  }
0x188a   : > { %v7583_v13 = vld [vmem:[#allocation17 + $0x344] ss:$8 sps:$4 sm:$0xff]  }
0x188c   : > { %5828 = vmatpush1.bf16.msra.mxu1 %v7530_v51  ;;  %5869 = vmatpush1.bf16.msra.mxu0 %v7533_v41  ;;  %v7578_v51 = vld [vmem:[#allocation17 + $0x240] ss:$8 sps:$4 sm:$0xff]  }
0x188d   : > { %5829 = vmatprep.subr.bf16.mxu1 %v7538_v38  ;;  %5870 = vmatprep.subr.bf16.mxu0 %v7541_v17  ;;  %v7581_v41 = vld [vmem:[#allocation17 + $0x340] ss:$8 sps:$4 sm:$0xff]   ;;  %v7586_v38 = vld [vmem:[#allocation17 + $0x254] ss:$8 sps:$4 sm:$0xff]  }
0x188e   : > { %v7589_v17 = vld [vmem:[#allocation17 + $0x354] ss:$8 sps:$4 sm:$0xff]  }
0x1890   : > { %5830 = vmatpush1.bf16.msra.mxu1 %v7536_v48  ;;  %5871 = vmatpush1.bf16.msra.mxu0 %v7539_v18  ;;  %v7584_v48 = vld [vmem:[#allocation17 + $0x250] ss:$8 sps:$4 sm:$0xff]  }
0x1891   : > { %5831 = vmatprep.subr.bf16.mxu1 %v7544_v21  ;;  %5872 = vmatprep.subr.bf16.mxu0 %v7547_v22  ;;  %v7587_v18 = vld [vmem:[#allocation17 + $0x350] ss:$8 sps:$4 sm:$0xff]   ;;  %v7592_v21 = vld [vmem:[#allocation17 + $0x264] ss:$8 sps:$4 sm:$0xff]  }
0x1892   : > { %v7595_v22 = vld [vmem:[#allocation17 + $0x364] ss:$8 sps:$4 sm:$0xff]  }
0x1894   : > { %5832 = vmatpush1.bf16.msra.mxu1 %v7542_v23  ;;  %5873 = vmatpush1.bf16.msra.mxu0 %v7545_v4  ;;  %v7590_v23 = vld [vmem:[#allocation17 + $0x260] ss:$8 sps:$4 sm:$0xff]  }
0x1895   : > { %5833 = vmatprep.subr.bf16.mxu1 %v7550_v24  ;;  %5874 = vmatprep.subr.bf16.mxu0 %v7553_v25  ;;  %v7593_v4 = vld [vmem:[#allocation17 + $0x360] ss:$8 sps:$4 sm:$0xff]   ;;  %v7598_v24 = vld [vmem:[#allocation17 + $0x274] ss:$8 sps:$4 sm:$0xff]  }
0x1896   : > { %v7601_v25 = vld [vmem:[#allocation17 + $0x374] ss:$8 sps:$4 sm:$0xff]  }
0x1898   : > { %5834 = vmatpush1.bf16.msra.mxu1 %v7548_v26  ;;  %5875 = vmatpush1.bf16.msra.mxu0 %v7551_v27  ;;  %v7596_v26 = vld [vmem:[#allocation17 + $0x270] ss:$8 sps:$4 sm:$0xff]  }
0x1899   : > { %5885 = vmatprep.subr.bf16.mxu1 %v7556_v28  ;;  %5926 = vmatprep.subr.bf16.mxu0 %v7559_v29  ;;  %v7599_v27 = vld [vmem:[#allocation17 + $0x370] ss:$8 sps:$4 sm:$0xff]   ;;  %v7604_v28 = vld [vmem:[#allocation17 + $0x284] ss:$8 sps:$4 sm:$0xff]  }
0x189a   : > { %v7607_v29 = vld [vmem:[#allocation17 + $0x384] ss:$8 sps:$4 sm:$0xff]  }
0x18ee   : > { %v4877_v47 = vpop.f32.mrb[44].mxu1  ;;  %v4918_v11 = vpop.f32.mrb[20].mxu0 }
0x18ef   : > { %v4878_v56 = vadd.f32 %v4877_v47, %v4166_v31  ;;  %v4919_v12 = vadd.f32 %v4918_v11, %v4174_v33  ;;  %v4879_v39 = vpop.f32.mrb[45].mxu1  ;;  %v4920_v57 = vpop.f32.mrb[21].mxu0  ;;  %v7602_v31 = vld [vmem:[#allocation17 + $0x280] ss:$8 sps:$4 sm:$0xff]   ;;  %v7608_v47 = vld [vmem:[#allocation17 + $0x290] ss:$8 sps:$4 sm:$0xff]  }
0x18f0   : > { %v4880_v19 = vadd.f32 %v4879_v39, %v4170_v36  ;;  %v4921_v40 = vadd.f32 %v4920_v57, %v4178_v5  ;;  %v4881_v42 = vpop.f32.mrb[46].mxu1  ;;  %v4922_v44 = vpop.f32.mrb[22].mxu0  ;;  %v7605_v33 = vld [vmem:[#allocation17 + $0x380] ss:$8 sps:$4 sm:$0xff]   ;;  %v7610_v36 = vld [vmem:[#allocation17 + $0x294] ss:$8 sps:$4 sm:$0xff]  }
0x18f1   : > { %v5007_v14 = vmax.f32 %v4878_v56, 0.0  ;;  %v5009_v46 = vmax.f32 %v4919_v12, 0.0  ;;  %v4882_v60 = vpop.f32.mrb[47].mxu1  ;;  %v4923_v7 = vpop.f32.mrb[23].mxu0  ;;  %v7613_v5 = vld [vmem:[#allocation17 + $0x394] ss:$8 sps:$4 sm:$0xff]  }
0x18f2   : > { %v5008_v20 = vmax.f32 %v4880_v19, 0.0  ;;  %v5010_v15 = vmax.f32 %v4921_v40, 0.0  ;;  %v7611_v11 = vld [vmem:[#allocation17 + $0x390] ss:$8 sps:$4 sm:$0xff]   ;;  %v7616_v56 = vld [vmem:[#allocation17 + $0x2a4] ss:$8 sps:$4 sm:$0xff]  }
0x18f3   : > { %v5143_v55 = vpack.c.bf16 %v5007_v14, %v5007_v14  ;;  %v5145_v52 = vpack.c.bf16 %v5009_v46, %v5009_v46  ;;  %v7619_v12 = vld [vmem:[#allocation17 + $0x3a4] ss:$8 sps:$4 sm:$0xff]   ;;  %v7614_v39 = vld [vmem:[#allocation17 + $0x2a0] ss:$8 sps:$4 sm:$0xff]   ;;  %v7622_v19 = vld [vmem:[#allocation17 + $0x2b4] ss:$8 sps:$4 sm:$0xff]  }
0x18f4   : > { %v5144_v54 = vpack.c.bf16 %v5008_v20, %v5008_v20  ;;  %v5146_v43 = vpack.c.bf16 %v5010_v15, %v5010_v15  ;;  %v7617_v57 = vld [vmem:[#allocation17 + $0x3a0] ss:$8 sps:$4 sm:$0xff]   ;;  %v7625_v40 = vld [vmem:[#allocation17 + $0x3b4] ss:$8 sps:$4 sm:$0xff]   ;;  %v7620_v42 = vld [vmem:[#allocation17 + $0x2b0] ss:$8 sps:$4 sm:$0xff]  }
0x18f5   : > { %v7623_v44 = vld [vmem:[#allocation17 + $0x3b0] ss:$8 sps:$4 sm:$0xff]   ;;  %v7628_v14 = vld [vmem:[#allocation17 + $0x2c4] ss:$8 sps:$4 sm:$0xff]   ;;  %v7626_v60 = vld [vmem:[#allocation17 + $0x2c0] ss:$8 sps:$4 sm:$0xff]  }
0x18f6   : > { %5835 = vmatprep.mubr.bf16.mxu1 %v5144_v54  ;;  %5876 = vmatprep.mubr.bf16.mxu0 %v5146_v43  ;;  %v7631_v46 = vld [vmem:[#allocation17 + $0x3c4] ss:$8 sps:$4 sm:$0xff]   ;;  %v7629_v7 = vld [vmem:[#allocation17 + $0x3c0] ss:$8 sps:$4 sm:$0xff]   ;;  %v7634_v20 = vld [vmem:[#allocation17 + $0x2d4] ss:$8 sps:$4 sm:$0xff]  }
0x18f7   : > { %5836 = vmatmul.mubr.bf16.vlgmr.msra.gmra.mrb[52].mxu1 %v5143_v55  ;;  %5877 = vmatmul.mubr.bf16.vlgmr.msra.gmra.mrb[28].mxu0 %v5145_v52  ;;  %v7637_v15 = vld [vmem:[#allocation17 + $0x3d4] ss:$8 sps:$4 sm:$0xff]   ;;  %v4189_v54 = vsub.s32 6, %v8530_v6  ;;  %v7632_v43 = vld [vmem:[#allocation17 + $0x2d0] ss:$8 sps:$4 sm:$0xff]  }
0x18f8   : > { %5886 = vmatpush1.bf16.msra.mxu1 %v7554_v50  ;;  %5927 = vmatpush1.bf16.msra.mxu0 %v7557_v34  ;;  %v7635_v50 = vld [vmem:[#allocation17 + $0x3d0] ss:$8 sps:$4 sm:$0xff]   ;;  %v4193_v34 = vsub.s32 7, %v8530_v6  ;;  %v7640_v55 = vld [vmem:[#allocation17 + $0x2e4] ss:$8 sps:$4 sm:$0xff]  }
0x18f9   : > { %5887 = vmatprep.subr.bf16.mxu1 %v7562_v59  ;;  %5928 = vmatprep.subr.bf16.mxu0 %v7565_v61  ;;  %v7643_v52 = vld [vmem:[#allocation17 + $0x3e4] ss:$8 sps:$4 sm:$0xff]   ;;  %v4182_v59 = vrot.slane %v8841_v30, %v811_v1  ;;  %v4190_v61 = vrot.slane %v8841_v30, %v4189_v54 }
0x18fc   : > { %5888 = vmatpush1.bf16.msra.mxu1 %v7560_v62  ;;  %5929 = vmatpush1.bf16.msra.mxu0 %v7563_v53  ;;  %v4186_v62 = vrot.slane %v8841_v30, %v815_v37  ;;  %v4194_v53 = vrot.slane %v8841_v30, %v4193_v34  ;;  %v7644_v37 = vld [vmem:[#allocation17 + $0x2f0] ss:$8 sps:$4 sm:$0xff]  }
0x18fd   : > { %5889 = vmatprep.subr.bf16.mxu1 %v7568_v58  ;;  %5930 = vmatprep.subr.bf16.mxu0 %v7571_v63  ;;  %v7638_v58 = vld [vmem:[#allocation17 + $0x2e0] ss:$8 sps:$4 sm:$0xff]   ;;  %v7647_v30 = vld [vmem:[#allocation17 + $0x3f0] ss:$8 sps:$4 sm:$0xff]  }
0x18fe   : > { %v7641_v63 = vld [vmem:[#allocation17 + $0x3e0] ss:$8 sps:$4 sm:$0xff]  }
0x1900   : > { %5890 = vmatpush1.bf16.msra.mxu1 %v7566_v2  ;;  %5931 = vmatpush1.bf16.msra.mxu0 %v7569_v3  ;;  %v7646_v2 = vld [vmem:[#allocation17 + $0x2f4] ss:$8 sps:$4 sm:$0xff]  }
0x1901   : > { %5891 = vmatprep.subr.bf16.mxu1 %v7574_v8  ;;  %5932 = vmatprep.subr.bf16.mxu0 %v7577_v45  ;;  %v7649_v3 = vld [vmem:[#allocation17 + $0x3f4] ss:$8 sps:$4 sm:$0xff]  }
0x1904   : > { %5892 = vmatpush1.bf16.msra.mxu1 %v7572_v49  ;;  %5933 = vmatpush1.bf16.msra.mxu0 %v7575_v10 }
0x1905   : > { %5893 = vmatprep.subr.bf16.mxu1 %v7580_v32  ;;  %5934 = vmatprep.subr.bf16.mxu0 %v7583_v13 }
0x1908   : > { %5894 = vmatpush1.bf16.msra.mxu1 %v7578_v51  ;;  %5935 = vmatpush1.bf16.msra.mxu0 %v7581_v41 }
0x1909   : > { %5895 = vmatprep.subr.bf16.mxu1 %v7586_v38  ;;  %5936 = vmatprep.subr.bf16.mxu0 %v7589_v17 }
0x190c   : > { %5896 = vmatpush1.bf16.msra.mxu1 %v7584_v48  ;;  %5937 = vmatpush1.bf16.msra.mxu0 %v7587_v18 }
0x190d   : > { %5897 = vmatprep.subr.bf16.mxu1 %v7592_v21  ;;  %5938 = vmatprep.subr.bf16.mxu0 %v7595_v22 }
0x1910   : > { %5898 = vmatpush1.bf16.msra.mxu1 %v7590_v23  ;;  %5939 = vmatpush1.bf16.msra.mxu0 %v7593_v4 }
0x1911   : > { %5899 = vmatprep.subr.bf16.mxu1 %v7598_v24  ;;  %5940 = vmatprep.subr.bf16.mxu0 %v7601_v25 }
0x1914   : > { %5900 = vmatpush1.bf16.msra.mxu1 %v7596_v26  ;;  %5941 = vmatpush1.bf16.msra.mxu0 %v7599_v27  ;;  %v5151_v26 = vld [vmem:[%s8982_s19] sm:$0x3] }
0x1915   : > { %5901 = vmatprep.subr.bf16.mxu1 %v7604_v28  ;;  %5942 = vmatprep.subr.bf16.mxu0 %v7607_v29  ;;  %v5156_v27 = vrot.slane %v5151_v26, %v8541_v9  ;;  %v5160_v28 = vrot.slane %v5151_v26, %v8595_v35 }
0x1918   : > { %5902 = vmatpush1.bf16.msra.mxu1 %v7602_v31  ;;  %5943 = vmatpush1.bf16.msra.mxu0 %v7605_v33 }
0x1919   : > { %5903 = vmatprep.subr.bf16.mxu1 %v7610_v36  ;;  %5944 = vmatprep.subr.bf16.mxu0 %v7613_v5 }
0x191c   : > { %5904 = vmatpush1.bf16.msra.mxu1 %v7608_v47  ;;  %5945 = vmatpush1.bf16.msra.mxu0 %v7611_v11 }
0x191d   : > { %5905 = vmatprep.subr.bf16.mxu1 %v7616_v56  ;;  %5946 = vmatprep.subr.bf16.mxu0 %v7619_v12 }
0x1920   : > { %5906 = vmatpush1.bf16.msra.mxu1 %v7614_v39  ;;  %5947 = vmatpush1.bf16.msra.mxu0 %v7617_v57 }
0x1921   : > { %5907 = vmatprep.subr.bf16.mxu1 %v7622_v19  ;;  %5948 = vmatprep.subr.bf16.mxu0 %v7625_v40 }
0x1924   : > { %5908 = vmatpush1.bf16.msra.mxu1 %v7620_v42  ;;  %5949 = vmatpush1.bf16.msra.mxu0 %v7623_v44 }
0x1925   : > { %5909 = vmatprep.subr.bf16.mxu1 %v7628_v14  ;;  %5950 = vmatprep.subr.bf16.mxu0 %v7631_v46 }
0x1928   : > { %5910 = vmatpush1.bf16.msra.mxu1 %v7626_v60  ;;  %5951 = vmatpush1.bf16.msra.mxu0 %v7629_v7 }
0x1929   : > { %5911 = vmatprep.subr.bf16.mxu1 %v7634_v20  ;;  %5952 = vmatprep.subr.bf16.mxu0 %v7637_v15 }
0x192c   : > { %5912 = vmatpush1.bf16.msra.mxu1 %v7632_v43  ;;  %5953 = vmatpush1.bf16.msra.mxu0 %v7635_v50 }
0x192d   : > { %5913 = vmatprep.subr.bf16.mxu1 %v7640_v55  ;;  %5954 = vmatprep.subr.bf16.mxu0 %v7643_v52 }
0x192e   : > { %v4959_v8 = vpop.f32.mrb[48].mxu1  ;;  %v5000_v45 = vpop.f32.mrb[24].mxu0 }
0x192f   : > { %v4960_v49 = vadd.f32 %v4959_v8, %v4182_v59  ;;  %v5001_v1 = vadd.f32 %v5000_v45, %v4190_v61  ;;  %v4961_v10 = vpop.f32.mrb[49].mxu1  ;;  %v5002_v32 = vpop.f32.mrb[25].mxu0 }
0x1930   : > { %v4962_v13 = vadd.f32 %v4961_v10, %v4186_v62  ;;  %v5003_v51 = vadd.f32 %v5002_v32, %v4194_v53  ;;  %v4963_v41 = vpop.f32.mrb[50].mxu1  ;;  %v5004_v6 = vpop.f32.mrb[26].mxu0  ;;  %5914 = vmatpush1.bf16.msra.mxu1 %v7638_v58  ;;  %5955 = vmatpush1.bf16.msra.mxu0 %v7641_v63 }
0x1931   : > { %v5011_v38 = vmax.f32 %v4960_v49, 0.0  ;;  %v5013_v17 = vmax.f32 %v5001_v1, 0.0  ;;  %v4964_v48 = vpop.f32.mrb[51].mxu1  ;;  %v5005_v18 = vpop.f32.mrb[27].mxu0  ;;  %5915 = vmatprep.subr.bf16.mxu1 %v7646_v2  ;;  %5956 = vmatprep.subr.bf16.mxu0 %v7649_v3 }
0x1932   : > { %v5012_v21 = vmax.f32 %v4962_v13, 0.0  ;;  %v5014_v22 = vmax.f32 %v5003_v51, 0.0 }
0x1933   : > { %v5147_v24 = vpack.c.bf16 %v5011_v38, %v5011_v38  ;;  %v5149_v25 = vpack.c.bf16 %v5013_v17, %v5013_v17 }
0x1934   : > { %v5148_v23 = vpack.c.bf16 %v5012_v21, %v5012_v21  ;;  %v5150_v4 = vpack.c.bf16 %v5014_v22, %v5014_v22  ;;  %5916 = vmatpush1.bf16.msra.mxu1 %v7644_v37  ;;  %5957 = vmatpush1.bf16.msra.mxu0 %v7647_v30 }
0x1936   : > { %5917 = vmatprep.mubr.bf16.mxu1 %v5148_v23  ;;  %5958 = vmatprep.mubr.bf16.mxu0 %v5150_v4 }
0x1937   : > { %5918 = vmatmul.mubr.bf16.vlgmr.msra.gmra.mrb[56].mxu1 %v5147_v24  ;;  %5959 = vmatmul.mubr.bf16.vlgmr.msra.gmra.mrb[32].mxu0 %v5149_v25 }
0x19ca   : > { %v5837_v29 = vpop.f32.mrb[52].mxu1  ;;  %v5878_v31 = vpop.f32.mrb[28].mxu0 }
0x19cb   : > { %v5838_v33 = vadd.f32 %v5837_v29, %v5156_v27  ;;  %v5839_v36 = vpop.f32.mrb[53].mxu1  ;;  %v5880_v5 = vpop.f32.mrb[29].mxu0 }
0x19cc   : > { %v5840_v47 = vadd.f32 %v5839_v36, %v5160_v28  ;;  %v5841_v11 = vpop.f32.mrb[54].mxu1  ;;  %v5882_v56 = vpop.f32.mrb[30].mxu0 }
0x19cd   : > { %v5879_v12 = vadd.f32 %v5878_v31, %v5838_v33  ;;  %v5842_v39 = vpop.f32.mrb[55].mxu1  ;;  %v5883_v57 = vpop.f32.mrb[31].mxu0 }
0x19ce   : > { %v5881_v19 = vadd.f32 %v5880_v5, %v5840_v47 }
0x1a0a   : > { %v5919_v40 = vpop.f32.mrb[56].mxu1  ;;  %v5960_v42 = vpop.f32.mrb[32].mxu0 }
0x1a0b   : > { %v5920_v44 = vadd.f32 %v5919_v40, %v5879_v12  ;;  %v5921_v9 = vpop.f32.mrb[57].mxu1  ;;  %v5962_v14 = vpop.f32.mrb[33].mxu0 }
0x1a0c   : > { %v5922_v35 = vadd.f32 %v5921_v9, %v5881_v19  ;;  %v5923_v46 = vpop.f32.mrb[58].mxu1  ;;  %v5964_v60 = vpop.f32.mrb[34].mxu0 }
0x1a0d   : > { %v5961_v7 = vadd.f32 %v5960_v42, %v5920_v44  ;;  %v5924_v20 = vpop.f32.mrb[59].mxu1  ;;  %v5965_v15 = vpop.f32.mrb[35].mxu0 }
0x1a0e   : > { %v5963_v54 = vadd.f32 %v5962_v14, %v5922_v35 }
0x1a0f   : > { %v5967_v43 = vadd.f32 %v5961_v7, %v8826_v16 }
0x1a10   : > { %v5968_v50 = vadd.f32 %v5963_v54, %v8829_v0 }
0x1a11   : > { %5969 = vst [vmem:[%s681_s1] sm:$0xff] %v5967_v43 }
0x1a12   : > { %5970 = vst [vmem:[%s681_s1 + $0x8] sm:$0xff] %v5968_v50 }
0x1a13   : > { %7979 = shalt.err (!%p7976_p5)
}
0x1a14   : > { %s7980_s3 = scalar_lea.hbm %s8873_s2, 256  ;;  %s7984_s16 = scalar_lea.hbm %s8983_s25, 512 }
0x1a15   : > { %p7981_p9 = scmp.ne.s32.totalorder %s8873_s2, %s7980_s3  ;;  %p7985_p12 = scmp.lt.u32.totalorder %s8873_s2, %s8983_s25 }
0x1a16   : > { %p7986_p1 = scmp.lt.u32.totalorder %s7984_s16, %s7980_s3  ;;  %p7988_p0 = scmp.lt.u32.totalorder %s7980_s3, %s8873_s2 }
0x1a17   : > { %p7982_p7 = pnand %p7981_p9, %p8984_p2 }
0x1a18   : > { %p7987_p13 = por %p7986_p1, %p7985_p12 }
0x1a19   : > { %p7983_p4 = pneg %p7982_p7 }
0x1a1a   : > { %p7989_p8 = por %p7988_p0, %p7987_p13 }
0x1a1c   : > { %p7990_p6 = pnand %p7989_p8, %p7983_p4 }
0x1a1e   : > { %7993 = shalt.err (!%p7990_p6)
}
0x1a1f   : > { %6933 = dma.vmem_to_hbm [thread:$0]  (%p8984_p2), %s8875_s30, 256, %s8873_s2, %s5972_s27  }
0x1a20 PF: > { %s5998_s11 = sand.u32 1, %s8040_s21   ;;  %p8985_p10 = scmp.ne.s32.totalorder %s8959_s17, 0 }
0x1a21   : > { %p8986_p11 = scmp.ge.s32.totalorder %s8052_s24, 2  ;;  %s5999_s18 = scalar_lea.sflag [#allocation4], %s5998_s11 }
0x1a23   : > { %p6968_p3 = pnand %p8986_p11, %p8985_p10 }
0x1a25   : > { %8035 = dma.done.wait (!%p6968_p3), %s5999_s18, 256  }
0x1a26   : > { %8037 = vsyncadd (!%p6968_p3), %s5999_s18, 4294967040  ;;  %p34_p5 = scmp.ge.s32.totalorder %s8407_s29, 4   ;;  %s8987_s21 = smov %s8044_s22 }
0x1a27   : > { %s8988_s22 = smov %s8048_s23  ;;  %s8989_s23 = smov %s8419_s7 }
0x1a28   : > { %s8990_s24 = smov %s8407_s29  ;;  %36 = sbr.rel (!%p34_p5) target bundleno = 21 (0x15), region = 168 }
0x1a2f   :  { %6004 = vsyncpa [#allocation3], 1 }
0x1a30   :  { %6006 = vsyncpa [#allocation3 + $0x1], 1 }
0x1a31   :  { %6007 = vsyncpa [#allocation6], 1 }
0x1a32   :  { %6008 = vsyncpa [#allocation9], 1 }
0x1a33   :  { %6009 = vsyncpa [#allocation12], 1 }
0x1a34   :  { %6010 = vsyncpa [#allocation15], 1 }
0x1a35   :  { %6011 = vsyncpa [#allocation18], 1 }
0x1a36   :  { %6012 = vsyncpa [#allocation4], 1 }
0x1a37   :  { %6014 = vsyncpa [#allocation4 + $0x1], 1 }

</bundles_post_ra>
